<compile_context>
chip_gen: v7x
topology: tpu7x:2x2x1
jax: 0.10.0
libtpu: 0.0.40
codegen_flags: <defaults>
</compile_context>

<pallas_src>
import functools

import numpy as np

import jax
import jax.numpy as jnp
from jax.experimental import pallas as pl
from jax.experimental.pallas import tpu as pltpu


# --------------------------------------------------------------------------
# Fused kernel (one grid step == one image)
# --------------------------------------------------------------------------
def _cnn_fused_kernel(p1_ref, w1_ref, b1_ref,
                      t2_ref, w2_ref, b2_ref,
                      t3_ref, w3_ref, b3_ref,
                      pool1_ref, pool2_ref, pool3_ref,
                      fc1w_ref, fc1b_ref, fc2w_ref, fc2b_ref,
                      out_ref):
    f32 = jnp.float32

    def conv3x3_relu(f, t_ref, w_ref, b_ref):
        # f: (S, Cin) f32, t_ref: (9, S, S) 0/1 row-gather, w_ref: (9, Cin, Cout)
        acc = None
        for t in range(9):
            shifted = jnp.dot(t_ref[t], f, preferred_element_type=f32)      # (S, Cin)
            term = jnp.dot(shifted.astype(w_ref.dtype), w_ref[t],
                           preferred_element_type=f32)                      # (S, Cout)
            acc = term if acc is None else acc + term
        return jnp.maximum(acc + b_ref[...], 0.0)

    def maxpool2x2(h, pool_ref):
        # h: (S, C) f32, pool_ref: (4, S//4, S) 0/1 gather -> (S//4, C)
        out = None
        for k in range(4):
            g = jnp.dot(pool_ref[k], h, preferred_element_type=f32)
            out = g if out is None else jnp.maximum(out, g)
        return out

    # conv1 + ReLU + pool (K padded 9->16: sublane-aligned, non-degenerate)
    h = jnp.dot(p1_ref[...], w1_ref[...], preferred_element_type=f32)       # (S1, 32)
    h = jnp.maximum(h + b1_ref[...], 0.0)
    f = maxpool2x2(h, pool1_ref)                                            # (S2, 32)

    # conv2 / conv3 (+ ReLU + fused pool), everything stays in VMEM
    f = maxpool2x2(conv3x3_relu(f, t2_ref, w2_ref, b2_ref), pool2_ref)      # (S3, 64)
    f = maxpool2x2(conv3x3_relu(f, t3_ref, w3_ref, b3_ref), pool3_ref)      # (S4, 64)

    # fc1 + ReLU  (NCHW flatten order folded into fc1 weight layout on host)
    y = fc1b_ref[...]                                                       # (1, 1024)
    for s in range(f.shape[0]):
        y = y + jnp.dot(f[s:s + 1, :].astype(fc1w_ref.dtype), fc1w_ref[s],
                        preferred_element_type=f32)
    y = jnp.maximum(y, 0.0)

    # fc2 (output padded to 128 lanes -> unmasked lane-dense store)
    z = jnp.dot(y.astype(fc2w_ref.dtype), fc2w_ref[...],
                preferred_element_type=f32) + fc2b_ref[...]                 # (1, 128)
    out_ref[...] = z.astype(out_ref.dtype)


# --------------------------------------------------------------------------
# Host-side structural constants (0/1 gather matrices, trace-time numpy)
# --------------------------------------------------------------------------
def _shift_mats(H, W):
    """(9, H*W, H*W) row-gather matrices for a 3x3 'same' conv (zero pad)."""
    S = H * W
    m = np.zeros((9, S, S), np.float32)
    t = 0
    for ky in range(3):
        for kx in range(3):
            dy, dx = ky - 1, kx - 1
            for y in range(H):
                yy = y + dy
                if 0 <= yy < H:
                    for x in range(W):
                        xx = x + dx
                        if 0 <= xx < W:
                            m[t, y * W + x, yy * W + xx] = 1.0
            t += 1
    return m


def _pool_mats(H, W):
    """(4, (H//2)*(W//2), H*W) gather matrices for the 4 positions of a 2x2 pool."""
    Hp, Wp = H // 2, W // 2
    m = np.zeros((4, Hp * Wp, H * W), np.float32)
    k = 0
    for py in range(2):
        for px in range(2):
            for y in range(Hp):
                for x in range(Wp):
                    m[k, y * Wp + x, (2 * y + py) * W + (2 * x + px)] = 1.0
            k += 1
    return m


def _layer1_patches(x_nchw):
    """Raw-input 3x3 patches, spatial-major: (B, H*W, 16) with taps 9..15 = 0."""
    B, _, H, W = x_nchw.shape
    xp = jnp.pad(x_nchw[:, 0], ((0, 0), (1, 1), (1, 1)))
    taps = [xp[:, ky:ky + H, kx:kx + W].reshape(B, H * W)
            for ky in range(3) for kx in range(3)]
    p = jnp.stack(taps, axis=-1)                          # (B, H*W, 9)
    return jnp.pad(p, ((0, 0), (0, 0), (0, 7)))           # pad K 9 -> 16


def _pack_constants(params, H, W, class_num, weight_dtype=jnp.bfloat16):
    f32 = jnp.float32
    S4 = (H // 8) * (W // 8)

    w1m = jnp.zeros((16, 32), f32).at[:9].set(params["w1"].reshape(9, 32))
    b1 = params["b1"].reshape(1, 32).astype(f32)
    w2 = params["w2"].reshape(9, 32, 64).astype(weight_dtype)
    b2 = params["b2"].reshape(1, 64).astype(f32)
    w3 = params["w3"].reshape(9, 64, 64).astype(weight_dtype)
    b3 = params["b3"].reshape(1, 64).astype(f32)

    t2 = jnp.asarray(_shift_mats(H // 2, W // 2))         # (9, S2, S2)
    t3 = jnp.asarray(_shift_mats(H // 4, W // 4))         # (9, S3, S3)
    pool1 = jnp.asarray(_pool_mats(H, W))                 # (4, S2, S1)
    pool2 = jnp.asarray(_pool_mats(H // 2, W // 2))       # (4, S3, S2)
    pool3 = jnp.asarray(_pool_mats(H // 4, W // 4))       # (4, S4, S3)

    # torch flattens NCHW: feature index = c*S4 + s.  Regroup fc1_w so the
    # kernel consumes the spatial-major (s, c) final feature map directly.
    fc1w = (params["fc1_w"].reshape(64, S4, 1024)
            .transpose(1, 0, 2).astype(weight_dtype))     # (S4, 64, 1024)
    fc1b = params["fc1_b"].reshape(1, 1024).astype(f32)

    n_pad = 128 * ((class_num + 127) // 128)
    fc2w = (jnp.zeros((1024, n_pad), f32)
            .at[:, :class_num].set(params["fc2_w"]).astype(weight_dtype))
    fc2b = (jnp.zeros((1, n_pad), f32)
            .at[:, :class_num].set(params["fc2_b"].reshape(1, class_num)))

    return (w1m, b1, t2, w2, b2, t3, w3, b3,
            pool1, pool2, pool3, fc1w, fc1b, fc2w, fc2b)


def _const_spec(arr):
    """Whole-array block, constant index map -> fetched once, VMEM-resident."""
    return pl.BlockSpec(arr.shape, lambda i, _n=arr.ndim: (0,) * _n)


# --------------------------------------------------------------------------
# Forward pass (single fused pallas_call)
# --------------------------------------------------------------------------
def cnn_forward(params, x_nchw, digit_num, class_num):
    B, cin, H, W = x_nchw.shape
    assert cin == 1 and H % 8 == 0 and W % 8 == 0, (cin, H, W)
    S1 = H * W
    n_pad = 128 * ((class_num + 127) // 128)

    p1 = _layer1_patches(x_nchw)                          # (B, S1, 16) f32
    consts = _pack_constants(params, H, W, class_num)

    out = pl.pallas_call(
        _cnn_fused_kernel,
        out_shape=jax.ShapeDtypeStruct((B, 1, n_pad), jnp.float32),
        grid=(B,),
        in_specs=[pl.BlockSpec((None, S1, 16), lambda i: (i, 0, 0))]
                 + [_const_spec(c) for c in consts],
        out_specs=pl.BlockSpec((None, 1, n_pad), lambda i: (i, 0, 0)),
        compiler_params=pltpu.CompilerParams(
            dimension_semantics=("parallel",)),
    )(p1, *consts)

    logits = out[:, 0, :class_num]
    return logits.reshape(B, digit_num, class_num // digit_num)


# --------------------------------------------------------------------------
# Params + pure-JAX reference (for a loose numerical sanity check)
# --------------------------------------------------------------------------
def init_params(key, height, width, class_num):
    ks = jax.random.split(key, 7)

    def conv_w(k, cin, cout):
        return jax.random.normal(k, (3, 3, cin, cout), jnp.float32) / jnp.sqrt(9.0 * cin)

    def lin_w(k, din, dout):
        return jax.random.normal(k, (din, dout), jnp.float32) / jnp.sqrt(float(din))

    input_num = (height // 8) * (width // 8) * 64
    return {
        "w1": conv_w(ks[0], 1, 32),   "b1": jnp.zeros((32,), jnp.float32),
        "w2": conv_w(ks[1], 32, 64),  "b2": jnp.zeros((64,), jnp.float32),
        "w3": conv_w(ks[2], 64, 64),  "b3": jnp.zeros((64,), jnp.float32),
        "fc1_w": lin_w(ks[3], input_num, 1024),
        "fc1_b": 0.01 * jax.random.normal(ks[4], (1024,), jnp.float32),
        "fc2_w": lin_w(ks[5], 1024, class_num),
        "fc2_b": 0.01 * jax.random.normal(ks[6], (class_num,), jnp.float32),
    }


def reference_forward(params, x_nchw, digit_num):
    def block(x, w, b):
        y = jax.lax.conv_general_dilated(
            x, w, window_strides=(1, 1), padding="SAME",
            dimension_numbers=("NCHW", "HWIO", "NCHW"))
        y = jax.nn.relu(y + b[None, :, None, None])
        return jax.lax.reduce_window(y, -jnp.inf, jax.lax.max,
                                     (1, 1, 2, 2), (1, 1, 2, 2), "VALID")

    y = block(x_nchw, params["w1"], params["b1"])
    y = block(y, params["w2"], params["b2"])
    y = block(y, params["w3"], params["b3"])
    B = x_nchw.shape[0]
    y = y.reshape(B, -1)                                  # NCHW flatten
    y = jax.nn.relu(y @ params["fc1_w"] + params["fc1_b"])
    y = y @ params["fc2_w"] + params["fc2_b"]
    return y.reshape(B, digit_num, -1)


if __name__ == "__main__":
    height, width = 16, 16
    digit_num, class_num = 4, 40       # -> output (B, 4, 10)
    batch = 2

    key = jax.random.PRNGKey(0)
    pkey, xkey = jax.random.split(key)
    params = init_params(pkey, height, width, class_num)
    x = jax.random.normal(xkey, (batch, 1, height, width), jnp.float32)

    fwd = jax.jit(functools.partial(cnn_forward, digit_num=digit_num,
                                    class_num=class_num))
    out = jax.block_until_ready(fwd(params, x))

    assert out.shape == (batch, digit_num, class_num // digit_num), out.shape
    assert out.dtype == jnp.float32

    ref = jax.block_until_ready(reference_forward(params, x, digit_num))
    max_ref = float(jnp.max(jnp.abs(ref)))
    max_err = float(jnp.max(jnp.abs(out - ref)))
    # loose tolerance: kernel uses bf16 MXU operands for the big weights
    assert max_err <= 0.1 * max_ref + 5e-2, (max_err, max_ref)

    print("KERNEL_OK")
</pallas_src>

<mosaic_0001>
module attributes {stable_mosaic.version = 11 : i64} {
  func.func @_cnn_fused_kernel(%arg0: i32, %arg1: memref<1x256x16xf32, #tpu.memory_space<vmem>>, %arg2: memref<16x32xf32, #tpu.memory_space<vmem>>, %arg3: memref<1x32xf32, #tpu.memory_space<vmem>>, %arg4: memref<9x64x64xf32, #tpu.memory_space<vmem>>, %arg5: memref<9x32x64xbf16, #tpu.memory_space<vmem>>, %arg6: memref<1x64xf32, #tpu.memory_space<vmem>>, %arg7: memref<9x16x16xf32, #tpu.memory_space<vmem>>, %arg8: memref<9x64x64xbf16, #tpu.memory_space<vmem>>, %arg9: memref<1x64xf32, #tpu.memory_space<vmem>>, %arg10: memref<4x64x256xf32, #tpu.memory_space<vmem>>, %arg11: memref<4x16x64xf32, #tpu.memory_space<vmem>>, %arg12: memref<4x4x16xf32, #tpu.memory_space<vmem>>, %arg13: memref<4x64x1024xbf16, #tpu.memory_space<vmem>>, %arg14: memref<1x1024xf32, #tpu.memory_space<vmem>>, %arg15: memref<1024x128xbf16, #tpu.memory_space<vmem>>, %arg16: memref<1x128xf32, #tpu.memory_space<vmem>>, %arg17: memref<1x1x128xf32, #tpu.memory_space<vmem>>) attributes {dimension_semantics = [#tpu.dimension_semantics<parallel>], iteration_bounds = array<i64: 2>, scalar_prefetch = 0 : i64, scratch_operands = 0 : i64, tpu.core_type = #tpu.core_type<tc>, window_params = [{transform_indices = @transform_0, window_bounds = array<i64: 1, 256, 16>}, {pipeline_mode = #tpu.pipeline_mode<synchronous>, transform_indices = @transform_1, window_bounds = array<i64: 16, 32>}, {pipeline_mode = #tpu.pipeline_mode<synchronous>, transform_indices = @transform_2, window_bounds = array<i64: 1, 32>}, {pipeline_mode = #tpu.pipeline_mode<synchronous>, transform_indices = @transform_3, window_bounds = array<i64: 9, 64, 64>}, {pipeline_mode = #tpu.pipeline_mode<synchronous>, transform_indices = @transform_4, window_bounds = array<i64: 9, 32, 64>}, {pipeline_mode = #tpu.pipeline_mode<synchronous>, transform_indices = @transform_5, window_bounds = array<i64: 1, 64>}, {pipeline_mode = #tpu.pipeline_mode<synchronous>, transform_indices = @transform_6, window_bounds = array<i64: 9, 16, 16>}, {pipeline_mode = #tpu.pipeline_mode<synchronous>, transform_indices = @transform_7, window_bounds = array<i64: 9, 64, 64>}, {pipeline_mode = #tpu.pipeline_mode<synchronous>, transform_indices = @transform_8, window_bounds = array<i64: 1, 64>}, {pipeline_mode = #tpu.pipeline_mode<synchronous>, transform_indices = @transform_9, window_bounds = array<i64: 4, 64, 256>}, {pipeline_mode = #tpu.pipeline_mode<synchronous>, transform_indices = @transform_10, window_bounds = array<i64: 4, 16, 64>}, {pipeline_mode = #tpu.pipeline_mode<synchronous>, transform_indices = @transform_11, window_bounds = array<i64: 4, 4, 16>}, {pipeline_mode = #tpu.pipeline_mode<synchronous>, transform_indices = @transform_12, window_bounds = array<i64: 4, 64, 1024>}, {pipeline_mode = #tpu.pipeline_mode<synchronous>, transform_indices = @transform_13, window_bounds = array<i64: 1, 1024>}, {pipeline_mode = #tpu.pipeline_mode<synchronous>, transform_indices = @transform_14, window_bounds = array<i64: 1024, 128>}, {pipeline_mode = #tpu.pipeline_mode<synchronous>, transform_indices = @transform_15, window_bounds = array<i64: 1, 128>}, {transform_indices = @transform_16, window_bounds = array<i64: 1, 1, 128>}]} {
    %c0 = arith.constant 0 : index
    %c0_0 = arith.constant 0 : index
    %c0_1 = arith.constant 0 : index
    %0 = vector.load %arg1[%c0, %c0_0, %c0_1] : memref<1x256x16xf32, #tpu.memory_space<vmem>>, vector<1x256x16xf32>
    %1 = vector.shape_cast %0 : vector<1x256x16xf32> to vector<256x16xf32>
    %c0_2 = arith.constant 0 : index
    %c0_3 = arith.constant 0 : index
    %2 = vector.load %arg2[%c0_2, %c0_3] : memref<16x32xf32, #tpu.memory_space<vmem>>, vector<16x32xf32>
    %cst = arith.constant dense<0.000000e+00> : vector<256x32xf32>
    %3 = tpu.matmul %1, %2, %cst {dimension_numbers = #tpu.dot_dimension_numbers<[1], [0], [0], [1], [0, 0, 1, 1], [], []>} : vector<256x16xf32>, vector<16x32xf32>, vector<256x32xf32> -> vector<256x32xf32>
    %c0_4 = arith.constant 0 : index
    %c0_5 = arith.constant 0 : index
    %4 = vector.load %arg3[%c0_4, %c0_5] : memref<1x32xf32, #tpu.memory_space<vmem>>, vector<1x32xf32>
    %5 = vector.broadcast %4 : vector<1x32xf32> to vector<256x32xf32>
    %6 = arith.addf %3, %5 : vector<256x32xf32>
    %cst_6 = arith.constant 0.000000e+00 : f32
    %7 = vector.broadcast %cst_6 : f32 to vector<256x32xf32>
    %8 = arith.maximumf %6, %7 : vector<256x32xf32>
    %c0_7 = arith.constant 0 : index
    %c0_8 = arith.constant 0 : index
    %c0_9 = arith.constant 0 : index
    %9 = vector.load %arg10[%c0_7, %c0_8, %c0_9] : memref<4x64x256xf32, #tpu.memory_space<vmem>>, vector<1x64x256xf32>
    %10 = vector.shape_cast %9 : vector<1x64x256xf32> to vector<64x256xf32>
    %cst_10 = arith.constant dense<0.000000e+00> : vector<64x32xf32>
    %11 = tpu.matmul %10, %8, %cst_10 {dimension_numbers = #tpu.dot_dimension_numbers<[1], [0], [0], [1], [0, 0, 1, 1], [], []>} : vector<64x256xf32>, vector<256x32xf32>, vector<64x32xf32> -> vector<64x32xf32>
    %c1 = arith.constant 1 : index
    %c0_11 = arith.constant 0 : index
    %c0_12 = arith.constant 0 : index
    %12 = vector.load %arg10[%c1, %c0_11, %c0_12] : memref<4x64x256xf32, #tpu.memory_space<vmem>>, vector<1x64x256xf32>
    %13 = vector.shape_cast %12 : vector<1x64x256xf32> to vector<64x256xf32>
    %cst_13 = arith.constant dense<0.000000e+00> : vector<64x32xf32>
    %14 = tpu.matmul %13, %8, %cst_13 {dimension_numbers = #tpu.dot_dimension_numbers<[1], [0], [0], [1], [0, 0, 1, 1], [], []>} : vector<64x256xf32>, vector<256x32xf32>, vector<64x32xf32> -> vector<64x32xf32>
    %15 = arith.maximumf %11, %14 : vector<64x32xf32>
    %c2 = arith.constant 2 : index
    %c0_14 = arith.constant 0 : index
    %c0_15 = arith.constant 0 : index
    %16 = vector.load %arg10[%c2, %c0_14, %c0_15] : memref<4x64x256xf32, #tpu.memory_space<vmem>>, vector<1x64x256xf32>
    %17 = vector.shape_cast %16 : vector<1x64x256xf32> to vector<64x256xf32>
    %cst_16 = arith.constant dense<0.000000e+00> : vector<64x32xf32>
    %18 = tpu.matmul %17, %8, %cst_16 {dimension_numbers = #tpu.dot_dimension_numbers<[1], [0], [0], [1], [0, 0, 1, 1], [], []>} : vector<64x256xf32>, vector<256x32xf32>, vector<64x32xf32> -> vector<64x32xf32>
    %19 = arith.maximumf %15, %18 : vector<64x32xf32>
    %c3 = arith.constant 3 : index
    %c0_17 = arith.constant 0 : index
    %c0_18 = arith.constant 0 : index
    %20 = vector.load %arg10[%c3, %c0_17, %c0_18] : memref<4x64x256xf32, #tpu.memory_space<vmem>>, vector<1x64x256xf32>
    %21 = vector.shape_cast %20 : vector<1x64x256xf32> to vector<64x256xf32>
    %cst_19 = arith.constant dense<0.000000e+00> : vector<64x32xf32>
    %22 = tpu.matmul %21, %8, %cst_19 {dimension_numbers = #tpu.dot_dimension_numbers<[1], [0], [0], [1], [0, 0, 1, 1], [], []>} : vector<64x256xf32>, vector<256x32xf32>, vector<64x32xf32> -> vector<64x32xf32>
    %23 = arith.maximumf %19, %22 : vector<64x32xf32>
    %c0_20 = arith.constant 0 : index
    %c0_21 = arith.constant 0 : index
    %c0_22 = arith.constant 0 : index
    %24 = vector.load %arg4[%c0_20, %c0_21, %c0_22] : memref<9x64x64xf32, #tpu.memory_space<vmem>>, vector<1x64x64xf32>
    %25 = vector.shape_cast %24 : vector<1x64x64xf32> to vector<64x64xf32>
    %cst_23 = arith.constant dense<0.000000e+00> : vector<64x32xf32>
    %26 = tpu.matmul %25, %23, %cst_23 {dimension_numbers = #tpu.dot_dimension_numbers<[1], [0], [0], [1], [0, 0, 1, 1], [], []>} : vector<64x64xf32>, vector<64x32xf32>, vector<64x32xf32> -> vector<64x32xf32>
    %27 = arith.truncf %26 : vector<64x32xf32> to vector<64x32xbf16>
    %c0_24 = arith.constant 0 : index
    %c0_25 = arith.constant 0 : index
    %c0_26 = arith.constant 0 : index
    %28 = vector.load %arg5[%c0_24, %c0_25, %c0_26] : memref<9x32x64xbf16, #tpu.memory_space<vmem>>, vector<1x32x64xbf16>
    %29 = vector.shape_cast %28 : vector<1x32x64xbf16> to vector<32x64xbf16>
    %cst_27 = arith.constant dense<0.000000e+00> : vector<64x64xf32>
    %30 = tpu.matmul %27, %29, %cst_27 {dimension_numbers = #tpu.dot_dimension_numbers<[1], [0], [0], [1], [0, 0, 1, 1], [], []>} : vector<64x32xbf16>, vector<32x64xbf16>, vector<64x64xf32> -> vector<64x64xf32>
    %c1_28 = arith.constant 1 : index
    %c0_29 = arith.constant 0 : index
    %c0_30 = arith.constant 0 : index
    %31 = vector.load %arg4[%c1_28, %c0_29, %c0_30] : memref<9x64x64xf32, #tpu.memory_space<vmem>>, vector<1x64x64xf32>
    %32 = vector.shape_cast %31 : vector<1x64x64xf32> to vector<64x64xf32>
    %cst_31 = arith.constant dense<0.000000e+00> : vector<64x32xf32>
    %33 = tpu.matmul %32, %23, %cst_31 {dimension_numbers = #tpu.dot_dimension_numbers<[1], [0], [0], [1], [0, 0, 1, 1], [], []>} : vector<64x64xf32>, vector<64x32xf32>, vector<64x32xf32> -> vector<64x32xf32>
    %34 = arith.truncf %33 : vector<64x32xf32> to vector<64x32xbf16>
    %c1_32 = arith.constant 1 : index
    %c0_33 = arith.constant 0 : index
    %c0_34 = arith.constant 0 : index
    %35 = vector.load %arg5[%c1_32, %c0_33, %c0_34] : memref<9x32x64xbf16, #tpu.memory_space<vmem>>, vector<1x32x64xbf16>
    %36 = vector.shape_cast %35 : vector<1x32x64xbf16> to vector<32x64xbf16>
    %cst_35 = arith.constant dense<0.000000e+00> : vector<64x64xf32>
    %37 = tpu.matmul %34, %36, %cst_35 {dimension_numbers = #tpu.dot_dimension_numbers<[1], [0], [0], [1], [0, 0, 1, 1], [], []>} : vector<64x32xbf16>, vector<32x64xbf16>, vector<64x64xf32> -> vector<64x64xf32>
    %38 = arith.addf %30, %37 : vector<64x64xf32>
    %c2_36 = arith.constant 2 : index
    %c0_37 = arith.constant 0 : index
    %c0_38 = arith.constant 0 : index
    %39 = vector.load %arg4[%c2_36, %c0_37, %c0_38] : memref<9x64x64xf32, #tpu.memory_space<vmem>>, vector<1x64x64xf32>
    %40 = vector.shape_cast %39 : vector<1x64x64xf32> to vector<64x64xf32>
    %cst_39 = arith.constant dense<0.000000e+00> : vector<64x32xf32>
    %41 = tpu.matmul %40, %23, %cst_39 {dimension_numbers = #tpu.dot_dimension_numbers<[1], [0], [0], [1], [0, 0, 1, 1], [], []>} : vector<64x64xf32>, vector<64x32xf32>, vector<64x32xf32> -> vector<64x32xf32>
    %42 = arith.truncf %41 : vector<64x32xf32> to vector<64x32xbf16>
    %c2_40 = arith.constant 2 : index
    %c0_41 = arith.constant 0 : index
    %c0_42 = arith.constant 0 : index
    %43 = vector.load %arg5[%c2_40, %c0_41, %c0_42] : memref<9x32x64xbf16, #tpu.memory_space<vmem>>, vector<1x32x64xbf16>
    %44 = vector.shape_cast %43 : vector<1x32x64xbf16> to vector<32x64xbf16>
    %cst_43 = arith.constant dense<0.000000e+00> : vector<64x64xf32>
    %45 = tpu.matmul %42, %44, %cst_43 {dimension_numbers = #tpu.dot_dimension_numbers<[1], [0], [0], [1], [0, 0, 1, 1], [], []>} : vector<64x32xbf16>, vector<32x64xbf16>, vector<64x64xf32> -> vector<64x64xf32>
    %46 = arith.addf %38, %45 : vector<64x64xf32>
    %c3_44 = arith.constant 3 : index
    %c0_45 = arith.constant 0 : index
    %c0_46 = arith.constant 0 : index
    %47 = vector.load %arg4[%c3_44, %c0_45, %c0_46] : memref<9x64x64xf32, #tpu.memory_space<vmem>>, vector<1x64x64xf32>
    %48 = vector.shape_cast %47 : vector<1x64x64xf32> to vector<64x64xf32>
    %cst_47 = arith.constant dense<0.000000e+00> : vector<64x32xf32>
    %49 = tpu.matmul %48, %23, %cst_47 {dimension_numbers = #tpu.dot_dimension_numbers<[1], [0], [0], [1], [0, 0, 1, 1], [], []>} : vector<64x64xf32>, vector<64x32xf32>, vector<64x32xf32> -> vector<64x32xf32>
    %50 = arith.truncf %49 : vector<64x32xf32> to vector<64x32xbf16>
    %c3_48 = arith.constant 3 : index
    %c0_49 = arith.constant 0 : index
    %c0_50 = arith.constant 0 : index
    %51 = vector.load %arg5[%c3_48, %c0_49, %c0_50] : memref<9x32x64xbf16, #tpu.memory_space<vmem>>, vector<1x32x64xbf16>
    %52 = vector.shape_cast %51 : vector<1x32x64xbf16> to vector<32x64xbf16>
    %cst_51 = arith.constant dense<0.000000e+00> : vector<64x64xf32>
    %53 = tpu.matmul %50, %52, %cst_51 {dimension_numbers = #tpu.dot_dimension_numbers<[1], [0], [0], [1], [0, 0, 1, 1], [], []>} : vector<64x32xbf16>, vector<32x64xbf16>, vector<64x64xf32> -> vector<64x64xf32>
    %54 = arith.addf %46, %53 : vector<64x64xf32>
    %c4 = arith.constant 4 : index
    %c0_52 = arith.constant 0 : index
    %c0_53 = arith.constant 0 : index
    %55 = vector.load %arg4[%c4, %c0_52, %c0_53] : memref<9x64x64xf32, #tpu.memory_space<vmem>>, vector<1x64x64xf32>
    %56 = vector.shape_cast %55 : vector<1x64x64xf32> to vector<64x64xf32>
    %cst_54 = arith.constant dense<0.000000e+00> : vector<64x32xf32>
    %57 = tpu.matmul %56, %23, %cst_54 {dimension_numbers = #tpu.dot_dimension_numbers<[1], [0], [0], [1], [0, 0, 1, 1], [], []>} : vector<64x64xf32>, vector<64x32xf32>, vector<64x32xf32> -> vector<64x32xf32>
    %58 = arith.truncf %57 : vector<64x32xf32> to vector<64x32xbf16>
    %c4_55 = arith.constant 4 : index
    %c0_56 = arith.constant 0 : index
    %c0_57 = arith.constant 0 : index
    %59 = vector.load %arg5[%c4_55, %c0_56, %c0_57] : memref<9x32x64xbf16, #tpu.memory_space<vmem>>, vector<1x32x64xbf16>
    %60 = vector.shape_cast %59 : vector<1x32x64xbf16> to vector<32x64xbf16>
    %cst_58 = arith.constant dense<0.000000e+00> : vector<64x64xf32>
    %61 = tpu.matmul %58, %60, %cst_58 {dimension_numbers = #tpu.dot_dimension_numbers<[1], [0], [0], [1], [0, 0, 1, 1], [], []>} : vector<64x32xbf16>, vector<32x64xbf16>, vector<64x64xf32> -> vector<64x64xf32>
    %62 = arith.addf %54, %61 : vector<64x64xf32>
    %c5 = arith.constant 5 : index
    %c0_59 = arith.constant 0 : index
    %c0_60 = arith.constant 0 : index
    %63 = vector.load %arg4[%c5, %c0_59, %c0_60] : memref<9x64x64xf32, #tpu.memory_space<vmem>>, vector<1x64x64xf32>
    %64 = vector.shape_cast %63 : vector<1x64x64xf32> to vector<64x64xf32>
    %cst_61 = arith.constant dense<0.000000e+00> : vector<64x32xf32>
    %65 = tpu.matmul %64, %23, %cst_61 {dimension_numbers = #tpu.dot_dimension_numbers<[1], [0], [0], [1], [0, 0, 1, 1], [], []>} : vector<64x64xf32>, vector<64x32xf32>, vector<64x32xf32> -> vector<64x32xf32>
    %66 = arith.truncf %65 : vector<64x32xf32> to vector<64x32xbf16>
    %c5_62 = arith.constant 5 : index
    %c0_63 = arith.constant 0 : index
    %c0_64 = arith.constant 0 : index
    %67 = vector.load %arg5[%c5_62, %c0_63, %c0_64] : memref<9x32x64xbf16, #tpu.memory_space<vmem>>, vector<1x32x64xbf16>
    %68 = vector.shape_cast %67 : vector<1x32x64xbf16> to vector<32x64xbf16>
    %cst_65 = arith.constant dense<0.000000e+00> : vector<64x64xf32>
    %69 = tpu.matmul %66, %68, %cst_65 {dimension_numbers = #tpu.dot_dimension_numbers<[1], [0], [0], [1], [0, 0, 1, 1], [], []>} : vector<64x32xbf16>, vector<32x64xbf16>, vector<64x64xf32> -> vector<64x64xf32>
    %70 = arith.addf %62, %69 : vector<64x64xf32>
    %c6 = arith.constant 6 : index
    %c0_66 = arith.constant 0 : index
    %c0_67 = arith.constant 0 : index
    %71 = vector.load %arg4[%c6, %c0_66, %c0_67] : memref<9x64x64xf32, #tpu.memory_space<vmem>>, vector<1x64x64xf32>
    %72 = vector.shape_cast %71 : vector<1x64x64xf32> to vector<64x64xf32>
    %cst_68 = arith.constant dense<0.000000e+00> : vector<64x32xf32>
    %73 = tpu.matmul %72, %23, %cst_68 {dimension_numbers = #tpu.dot_dimension_numbers<[1], [0], [0], [1], [0, 0, 1, 1], [], []>} : vector<64x64xf32>, vector<64x32xf32>, vector<64x32xf32> -> vector<64x32xf32>
    %74 = arith.truncf %73 : vector<64x32xf32> to vector<64x32xbf16>
    %c6_69 = arith.constant 6 : index
    %c0_70 = arith.constant 0 : index
    %c0_71 = arith.constant 0 : index
    %75 = vector.load %arg5[%c6_69, %c0_70, %c0_71] : memref<9x32x64xbf16, #tpu.memory_space<vmem>>, vector<1x32x64xbf16>
    %76 = vector.shape_cast %75 : vector<1x32x64xbf16> to vector<32x64xbf16>
    %cst_72 = arith.constant dense<0.000000e+00> : vector<64x64xf32>
    %77 = tpu.matmul %74, %76, %cst_72 {dimension_numbers = #tpu.dot_dimension_numbers<[1], [0], [0], [1], [0, 0, 1, 1], [], []>} : vector<64x32xbf16>, vector<32x64xbf16>, vector<64x64xf32> -> vector<64x64xf32>
    %78 = arith.addf %70, %77 : vector<64x64xf32>
    %c7 = arith.constant 7 : index
    %c0_73 = arith.constant 0 : index
    %c0_74 = arith.constant 0 : index
    %79 = vector.load %arg4[%c7, %c0_73, %c0_74] : memref<9x64x64xf32, #tpu.memory_space<vmem>>, vector<1x64x64xf32>
    %80 = vector.shape_cast %79 : vector<1x64x64xf32> to vector<64x64xf32>
    %cst_75 = arith.constant dense<0.000000e+00> : vector<64x32xf32>
    %81 = tpu.matmul %80, %23, %cst_75 {dimension_numbers = #tpu.dot_dimension_numbers<[1], [0], [0], [1], [0, 0, 1, 1], [], []>} : vector<64x64xf32>, vector<64x32xf32>, vector<64x32xf32> -> vector<64x32xf32>
    %82 = arith.truncf %81 : vector<64x32xf32> to vector<64x32xbf16>
    %c7_76 = arith.constant 7 : index
    %c0_77 = arith.constant 0 : index
    %c0_78 = arith.constant 0 : index
    %83 = vector.load %arg5[%c7_76, %c0_77, %c0_78] : memref<9x32x64xbf16, #tpu.memory_space<vmem>>, vector<1x32x64xbf16>
    %84 = vector.shape_cast %83 : vector<1x32x64xbf16> to vector<32x64xbf16>
    %cst_79 = arith.constant dense<0.000000e+00> : vector<64x64xf32>
    %85 = tpu.matmul %82, %84, %cst_79 {dimension_numbers = #tpu.dot_dimension_numbers<[1], [0], [0], [1], [0, 0, 1, 1], [], []>} : vector<64x32xbf16>, vector<32x64xbf16>, vector<64x64xf32> -> vector<64x64xf32>
    %86 = arith.addf %78, %85 : vector<64x64xf32>
    %c8 = arith.constant 8 : index
    %c0_80 = arith.constant 0 : index
    %c0_81 = arith.constant 0 : index
    %87 = vector.load %arg4[%c8, %c0_80, %c0_81] : memref<9x64x64xf32, #tpu.memory_space<vmem>>, vector<1x64x64xf32>
    %88 = vector.shape_cast %87 : vector<1x64x64xf32> to vector<64x64xf32>
    %cst_82 = arith.constant dense<0.000000e+00> : vector<64x32xf32>
    %89 = tpu.matmul %88, %23, %cst_82 {dimension_numbers = #tpu.dot_dimension_numbers<[1], [0], [0], [1], [0, 0, 1, 1], [], []>} : vector<64x64xf32>, vector<64x32xf32>, vector<64x32xf32> -> vector<64x32xf32>
    %90 = arith.truncf %89 : vector<64x32xf32> to vector<64x32xbf16>
    %c8_83 = arith.constant 8 : index
    %c0_84 = arith.constant 0 : index
    %c0_85 = arith.constant 0 : index
    %91 = vector.load %arg5[%c8_83, %c0_84, %c0_85] : memref<9x32x64xbf16, #tpu.memory_space<vmem>>, vector<1x32x64xbf16>
    %92 = vector.shape_cast %91 : vector<1x32x64xbf16> to vector<32x64xbf16>
    %cst_86 = arith.constant dense<0.000000e+00> : vector<64x64xf32>
    %93 = tpu.matmul %90, %92, %cst_86 {dimension_numbers = #tpu.dot_dimension_numbers<[1], [0], [0], [1], [0, 0, 1, 1], [], []>} : vector<64x32xbf16>, vector<32x64xbf16>, vector<64x64xf32> -> vector<64x64xf32>
    %94 = arith.addf %86, %93 : vector<64x64xf32>
    %c0_87 = arith.constant 0 : index
    %c0_88 = arith.constant 0 : index
    %95 = vector.load %arg6[%c0_87, %c0_88] : memref<1x64xf32, #tpu.memory_space<vmem>>, vector<1x64xf32>
    %96 = vector.broadcast %95 : vector<1x64xf32> to vector<64x64xf32>
    %97 = arith.addf %94, %96 : vector<64x64xf32>
    %cst_89 = arith.constant 0.000000e+00 : f32
    %98 = vector.broadcast %cst_89 : f32 to vector<64x64xf32>
    %99 = arith.maximumf %97, %98 : vector<64x64xf32>
    %c0_90 = arith.constant 0 : index
    %c0_91 = arith.constant 0 : index
    %c0_92 = arith.constant 0 : index
    %100 = vector.load %arg11[%c0_90, %c0_91, %c0_92] : memref<4x16x64xf32, #tpu.memory_space<vmem>>, vector<1x16x64xf32>
    %101 = vector.shape_cast %100 : vector<1x16x64xf32> to vector<16x64xf32>
    %cst_93 = arith.constant dense<0.000000e+00> : vector<16x64xf32>
    %102 = tpu.matmul %101, %99, %cst_93 {dimension_numbers = #tpu.dot_dimension_numbers<[1], [0], [0], [1], [0, 0, 1, 1], [], []>} : vector<16x64xf32>, vector<64x64xf32>, vector<16x64xf32> -> vector<16x64xf32>
    %c1_94 = arith.constant 1 : index
    %c0_95 = arith.constant 0 : index
    %c0_96 = arith.constant 0 : index
    %103 = vector.load %arg11[%c1_94, %c0_95, %c0_96] : memref<4x16x64xf32, #tpu.memory_space<vmem>>, vector<1x16x64xf32>
    %104 = vector.shape_cast %103 : vector<1x16x64xf32> to vector<16x64xf32>
    %cst_97 = arith.constant dense<0.000000e+00> : vector<16x64xf32>
    %105 = tpu.matmul %104, %99, %cst_97 {dimension_numbers = #tpu.dot_dimension_numbers<[1], [0], [0], [1], [0, 0, 1, 1], [], []>} : vector<16x64xf32>, vector<64x64xf32>, vector<16x64xf32> -> vector<16x64xf32>
    %106 = arith.maximumf %102, %105 : vector<16x64xf32>
    %c2_98 = arith.constant 2 : index
    %c0_99 = arith.constant 0 : index
    %c0_100 = arith.constant 0 : index
    %107 = vector.load %arg11[%c2_98, %c0_99, %c0_100] : memref<4x16x64xf32, #tpu.memory_space<vmem>>, vector<1x16x64xf32>
    %108 = vector.shape_cast %107 : vector<1x16x64xf32> to vector<16x64xf32>
    %cst_101 = arith.constant dense<0.000000e+00> : vector<16x64xf32>
    %109 = tpu.matmul %108, %99, %cst_101 {dimension_numbers = #tpu.dot_dimension_numbers<[1], [0], [0], [1], [0, 0, 1, 1], [], []>} : vector<16x64xf32>, vector<64x64xf32>, vector<16x64xf32> -> vector<16x64xf32>
    %110 = arith.maximumf %106, %109 : vector<16x64xf32>
    %c3_102 = arith.constant 3 : index
    %c0_103 = arith.constant 0 : index
    %c0_104 = arith.constant 0 : index
    %111 = vector.load %arg11[%c3_102, %c0_103, %c0_104] : memref<4x16x64xf32, #tpu.memory_space<vmem>>, vector<1x16x64xf32>
    %112 = vector.shape_cast %111 : vector<1x16x64xf32> to vector<16x64xf32>
    %cst_105 = arith.constant dense<0.000000e+00> : vector<16x64xf32>
    %113 = tpu.matmul %112, %99, %cst_105 {dimension_numbers = #tpu.dot_dimension_numbers<[1], [0], [0], [1], [0, 0, 1, 1], [], []>} : vector<16x64xf32>, vector<64x64xf32>, vector<16x64xf32> -> vector<16x64xf32>
    %114 = arith.maximumf %110, %113 : vector<16x64xf32>
    %c0_106 = arith.constant 0 : index
    %c0_107 = arith.constant 0 : index
    %c0_108 = arith.constant 0 : index
    %115 = vector.load %arg7[%c0_106, %c0_107, %c0_108] : memref<9x16x16xf32, #tpu.memory_space<vmem>>, vector<1x16x16xf32>
    %116 = vector.shape_cast %115 : vector<1x16x16xf32> to vector<16x16xf32>
    %cst_109 = arith.constant dense<0.000000e+00> : vector<16x64xf32>
    %117 = tpu.matmul %116, %114, %cst_109 {dimension_numbers = #tpu.dot_dimension_numbers<[1], [0], [0], [1], [0, 0, 1, 1], [], []>} : vector<16x16xf32>, vector<16x64xf32>, vector<16x64xf32> -> vector<16x64xf32>
    %118 = arith.truncf %117 : vector<16x64xf32> to vector<16x64xbf16>
    %c0_110 = arith.constant 0 : index
    %c0_111 = arith.constant 0 : index
    %c0_112 = arith.constant 0 : index
    %119 = vector.load %arg8[%c0_110, %c0_111, %c0_112] : memref<9x64x64xbf16, #tpu.memory_space<vmem>>, vector<1x64x64xbf16>
    %120 = vector.shape_cast %119 : vector<1x64x64xbf16> to vector<64x64xbf16>
    %cst_113 = arith.constant dense<0.000000e+00> : vector<16x64xf32>
    %121 = tpu.matmul %118, %120, %cst_113 {dimension_numbers = #tpu.dot_dimension_numbers<[1], [0], [0], [1], [0, 0, 1, 1], [], []>} : vector<16x64xbf16>, vector<64x64xbf16>, vector<16x64xf32> -> vector<16x64xf32>
    %c1_114 = arith.constant 1 : index
    %c0_115 = arith.constant 0 : index
    %c0_116 = arith.constant 0 : index
    %122 = vector.load %arg7[%c1_114, %c0_115, %c0_116] : memref<9x16x16xf32, #tpu.memory_space<vmem>>, vector<1x16x16xf32>
    %123 = vector.shape_cast %122 : vector<1x16x16xf32> to vector<16x16xf32>
    %cst_117 = arith.constant dense<0.000000e+00> : vector<16x64xf32>
    %124 = tpu.matmul %123, %114, %cst_117 {dimension_numbers = #tpu.dot_dimension_numbers<[1], [0], [0], [1], [0, 0, 1, 1], [], []>} : vector<16x16xf32>, vector<16x64xf32>, vector<16x64xf32> -> vector<16x64xf32>
    %125 = arith.truncf %124 : vector<16x64xf32> to vector<16x64xbf16>
    %c1_118 = arith.constant 1 : index
    %c0_119 = arith.constant 0 : index
    %c0_120 = arith.constant 0 : index
    %126 = vector.load %arg8[%c1_118, %c0_119, %c0_120] : memref<9x64x64xbf16, #tpu.memory_space<vmem>>, vector<1x64x64xbf16>
    %127 = vector.shape_cast %126 : vector<1x64x64xbf16> to vector<64x64xbf16>
    %cst_121 = arith.constant dense<0.000000e+00> : vector<16x64xf32>
    %128 = tpu.matmul %125, %127, %cst_121 {dimension_numbers = #tpu.dot_dimension_numbers<[1], [0], [0], [1], [0, 0, 1, 1], [], []>} : vector<16x64xbf16>, vector<64x64xbf16>, vector<16x64xf32> -> vector<16x64xf32>
    %129 = arith.addf %121, %128 : vector<16x64xf32>
    %c2_122 = arith.constant 2 : index
    %c0_123 = arith.constant 0 : index
    %c0_124 = arith.constant 0 : index
    %130 = vector.load %arg7[%c2_122, %c0_123, %c0_124] : memref<9x16x16xf32, #tpu.memory_space<vmem>>, vector<1x16x16xf32>
    %131 = vector.shape_cast %130 : vector<1x16x16xf32> to vector<16x16xf32>
    %cst_125 = arith.constant dense<0.000000e+00> : vector<16x64xf32>
    %132 = tpu.matmul %131, %114, %cst_125 {dimension_numbers = #tpu.dot_dimension_numbers<[1], [0], [0], [1], [0, 0, 1, 1], [], []>} : vector<16x16xf32>, vector<16x64xf32>, vector<16x64xf32> -> vector<16x64xf32>
    %133 = arith.truncf %132 : vector<16x64xf32> to vector<16x64xbf16>
    %c2_126 = arith.constant 2 : index
    %c0_127 = arith.constant 0 : index
    %c0_128 = arith.constant 0 : index
    %134 = vector.load %arg8[%c2_126, %c0_127, %c0_128] : memref<9x64x64xbf16, #tpu.memory_space<vmem>>, vector<1x64x64xbf16>
    %135 = vector.shape_cast %134 : vector<1x64x64xbf16> to vector<64x64xbf16>
    %cst_129 = arith.constant dense<0.000000e+00> : vector<16x64xf32>
    %136 = tpu.matmul %133, %135, %cst_129 {dimension_numbers = #tpu.dot_dimension_numbers<[1], [0], [0], [1], [0, 0, 1, 1], [], []>} : vector<16x64xbf16>, vector<64x64xbf16>, vector<16x64xf32> -> vector<16x64xf32>
    %137 = arith.addf %129, %136 : vector<16x64xf32>
    %c3_130 = arith.constant 3 : index
    %c0_131 = arith.constant 0 : index
    %c0_132 = arith.constant 0 : index
    %138 = vector.load %arg7[%c3_130, %c0_131, %c0_132] : memref<9x16x16xf32, #tpu.memory_space<vmem>>, vector<1x16x16xf32>
    %139 = vector.shape_cast %138 : vector<1x16x16xf32> to vector<16x16xf32>
    %cst_133 = arith.constant dense<0.000000e+00> : vector<16x64xf32>
    %140 = tpu.matmul %139, %114, %cst_133 {dimension_numbers = #tpu.dot_dimension_numbers<[1], [0], [0], [1], [0, 0, 1, 1], [], []>} : vector<16x16xf32>, vector<16x64xf32>, vector<16x64xf32> -> vector<16x64xf32>
    %141 = arith.truncf %140 : vector<16x64xf32> to vector<16x64xbf16>
    %c3_134 = arith.constant 3 : index
    %c0_135 = arith.constant 0 : index
    %c0_136 = arith.constant 0 : index
    %142 = vector.load %arg8[%c3_134, %c0_135, %c0_136] : memref<9x64x64xbf16, #tpu.memory_space<vmem>>, vector<1x64x64xbf16>
    %143 = vector.shape_cast %142 : vector<1x64x64xbf16> to vector<64x64xbf16>
    %cst_137 = arith.constant dense<0.000000e+00> : vector<16x64xf32>
    %144 = tpu.matmul %141, %143, %cst_137 {dimension_numbers = #tpu.dot_dimension_numbers<[1], [0], [0], [1], [0, 0, 1, 1], [], []>} : vector<16x64xbf16>, vector<64x64xbf16>, vector<16x64xf32> -> vector<16x64xf32>
    %145 = arith.addf %137, %144 : vector<16x64xf32>
    %c4_138 = arith.constant 4 : index
    %c0_139 = arith.constant 0 : index
    %c0_140 = arith.constant 0 : index
    %146 = vector.load %arg7[%c4_138, %c0_139, %c0_140] : memref<9x16x16xf32, #tpu.memory_space<vmem>>, vector<1x16x16xf32>
    %147 = vector.shape_cast %146 : vector<1x16x16xf32> to vector<16x16xf32>
    %cst_141 = arith.constant dense<0.000000e+00> : vector<16x64xf32>
    %148 = tpu.matmul %147, %114, %cst_141 {dimension_numbers = #tpu.dot_dimension_numbers<[1], [0], [0], [1], [0, 0, 1, 1], [], []>} : vector<16x16xf32>, vector<16x64xf32>, vector<16x64xf32> -> vector<16x64xf32>
    %149 = arith.truncf %148 : vector<16x64xf32> to vector<16x64xbf16>
    %c4_142 = arith.constant 4 : index
    %c0_143 = arith.constant 0 : index
    %c0_144 = arith.constant 0 : index
    %150 = vector.load %arg8[%c4_142, %c0_143, %c0_144] : memref<9x64x64xbf16, #tpu.memory_space<vmem>>, vector<1x64x64xbf16>
    %151 = vector.shape_cast %150 : vector<1x64x64xbf16> to vector<64x64xbf16>
    %cst_145 = arith.constant dense<0.000000e+00> : vector<16x64xf32>
    %152 = tpu.matmul %149, %151, %cst_145 {dimension_numbers = #tpu.dot_dimension_numbers<[1], [0], [0], [1], [0, 0, 1, 1], [], []>} : vector<16x64xbf16>, vector<64x64xbf16>, vector<16x64xf32> -> vector<16x64xf32>
    %153 = arith.addf %145, %152 : vector<16x64xf32>
    %c5_146 = arith.constant 5 : index
    %c0_147 = arith.constant 0 : index
    %c0_148 = arith.constant 0 : index
    %154 = vector.load %arg7[%c5_146, %c0_147, %c0_148] : memref<9x16x16xf32, #tpu.memory_space<vmem>>, vector<1x16x16xf32>
    %155 = vector.shape_cast %154 : vector<1x16x16xf32> to vector<16x16xf32>
    %cst_149 = arith.constant dense<0.000000e+00> : vector<16x64xf32>
    %156 = tpu.matmul %155, %114, %cst_149 {dimension_numbers = #tpu.dot_dimension_numbers<[1], [0], [0], [1], [0, 0, 1, 1], [], []>} : vector<16x16xf32>, vector<16x64xf32>, vector<16x64xf32> -> vector<16x64xf32>
    %157 = arith.truncf %156 : vector<16x64xf32> to vector<16x64xbf16>
    %c5_150 = arith.constant 5 : index
    %c0_151 = arith.constant 0 : index
    %c0_152 = arith.constant 0 : index
    %158 = vector.load %arg8[%c5_150, %c0_151, %c0_152] : memref<9x64x64xbf16, #tpu.memory_space<vmem>>, vector<1x64x64xbf16>
    %159 = vector.shape_cast %158 : vector<1x64x64xbf16> to vector<64x64xbf16>
    %cst_153 = arith.constant dense<0.000000e+00> : vector<16x64xf32>
    %160 = tpu.matmul %157, %159, %cst_153 {dimension_numbers = #tpu.dot_dimension_numbers<[1], [0], [0], [1], [0, 0, 1, 1], [], []>} : vector<16x64xbf16>, vector<64x64xbf16>, vector<16x64xf32> -> vector<16x64xf32>
    %161 = arith.addf %153, %160 : vector<16x64xf32>
    %c6_154 = arith.constant 6 : index
    %c0_155 = arith.constant 0 : index
    %c0_156 = arith.constant 0 : index
    %162 = vector.load %arg7[%c6_154, %c0_155, %c0_156] : memref<9x16x16xf32, #tpu.memory_space<vmem>>, vector<1x16x16xf32>
    %163 = vector.shape_cast %162 : vector<1x16x16xf32> to vector<16x16xf32>
    %cst_157 = arith.constant dense<0.000000e+00> : vector<16x64xf32>
    %164 = tpu.matmul %163, %114, %cst_157 {dimension_numbers = #tpu.dot_dimension_numbers<[1], [0], [0], [1], [0, 0, 1, 1], [], []>} : vector<16x16xf32>, vector<16x64xf32>, vector<16x64xf32> -> vector<16x64xf32>
    %165 = arith.truncf %164 : vector<16x64xf32> to vector<16x64xbf16>
    %c6_158 = arith.constant 6 : index
    %c0_159 = arith.constant 0 : index
    %c0_160 = arith.constant 0 : index
    %166 = vector.load %arg8[%c6_158, %c0_159, %c0_160] : memref<9x64x64xbf16, #tpu.memory_space<vmem>>, vector<1x64x64xbf16>
    %167 = vector.shape_cast %166 : vector<1x64x64xbf16> to vector<64x64xbf16>
    %cst_161 = arith.constant dense<0.000000e+00> : vector<16x64xf32>
    %168 = tpu.matmul %165, %167, %cst_161 {dimension_numbers = #tpu.dot_dimension_numbers<[1], [0], [0], [1], [0, 0, 1, 1], [], []>} : vector<16x64xbf16>, vector<64x64xbf16>, vector<16x64xf32> -> vector<16x64xf32>
    %169 = arith.addf %161, %168 : vector<16x64xf32>
    %c7_162 = arith.constant 7 : index
    %c0_163 = arith.constant 0 : index
    %c0_164 = arith.constant 0 : index
    %170 = vector.load %arg7[%c7_162, %c0_163, %c0_164] : memref<9x16x16xf32, #tpu.memory_space<vmem>>, vector<1x16x16xf32>
    %171 = vector.shape_cast %170 : vector<1x16x16xf32> to vector<16x16xf32>
    %cst_165 = arith.constant dense<0.000000e+00> : vector<16x64xf32>
    %172 = tpu.matmul %171, %114, %cst_165 {dimension_numbers = #tpu.dot_dimension_numbers<[1], [0], [0], [1], [0, 0, 1, 1], [], []>} : vector<16x16xf32>, vector<16x64xf32>, vector<16x64xf32> -> vector<16x64xf32>
    %173 = arith.truncf %172 : vector<16x64xf32> to vector<16x64xbf16>
    %c7_166 = arith.constant 7 : index
    %c0_167 = arith.constant 0 : index
    %c0_168 = arith.constant 0 : index
    %174 = vector.load %arg8[%c7_166, %c0_167, %c0_168] : memref<9x64x64xbf16, #tpu.memory_space<vmem>>, vector<1x64x64xbf16>
    %175 = vector.shape_cast %174 : vector<1x64x64xbf16> to vector<64x64xbf16>
    %cst_169 = arith.constant dense<0.000000e+00> : vector<16x64xf32>
    %176 = tpu.matmul %173, %175, %cst_169 {dimension_numbers = #tpu.dot_dimension_numbers<[1], [0], [0], [1], [0, 0, 1, 1], [], []>} : vector<16x64xbf16>, vector<64x64xbf16>, vector<16x64xf32> -> vector<16x64xf32>
    %177 = arith.addf %169, %176 : vector<16x64xf32>
    %c8_170 = arith.constant 8 : index
    %c0_171 = arith.constant 0 : index
    %c0_172 = arith.constant 0 : index
    %178 = vector.load %arg7[%c8_170, %c0_171, %c0_172] : memref<9x16x16xf32, #tpu.memory_space<vmem>>, vector<1x16x16xf32>
    %179 = vector.shape_cast %178 : vector<1x16x16xf32> to vector<16x16xf32>
    %cst_173 = arith.constant dense<0.000000e+00> : vector<16x64xf32>
    %180 = tpu.matmul %179, %114, %cst_173 {dimension_numbers = #tpu.dot_dimension_numbers<[1], [0], [0], [1], [0, 0, 1, 1], [], []>} : vector<16x16xf32>, vector<16x64xf32>, vector<16x64xf32> -> vector<16x64xf32>
    %181 = arith.truncf %180 : vector<16x64xf32> to vector<16x64xbf16>
    %c8_174 = arith.constant 8 : index
    %c0_175 = arith.constant 0 : index
    %c0_176 = arith.constant 0 : index
    %182 = vector.load %arg8[%c8_174, %c0_175, %c0_176] : memref<9x64x64xbf16, #tpu.memory_space<vmem>>, vector<1x64x64xbf16>
    %183 = vector.shape_cast %182 : vector<1x64x64xbf16> to vector<64x64xbf16>
    %cst_177 = arith.constant dense<0.000000e+00> : vector<16x64xf32>
    %184 = tpu.matmul %181, %183, %cst_177 {dimension_numbers = #tpu.dot_dimension_numbers<[1], [0], [0], [1], [0, 0, 1, 1], [], []>} : vector<16x64xbf16>, vector<64x64xbf16>, vector<16x64xf32> -> vector<16x64xf32>
    %185 = arith.addf %177, %184 : vector<16x64xf32>
    %c0_178 = arith.constant 0 : index
    %c0_179 = arith.constant 0 : index
    %186 = vector.load %arg9[%c0_178, %c0_179] : memref<1x64xf32, #tpu.memory_space<vmem>>, vector<1x64xf32>
    %187 = vector.broadcast %186 : vector<1x64xf32> to vector<16x64xf32>
    %188 = arith.addf %185, %187 : vector<16x64xf32>
    %cst_180 = arith.constant 0.000000e+00 : f32
    %189 = vector.broadcast %cst_180 : f32 to vector<16x64xf32>
    %190 = arith.maximumf %188, %189 : vector<16x64xf32>
    %c0_181 = arith.constant 0 : index
    %c0_182 = arith.constant 0 : index
    %c0_183 = arith.constant 0 : index
    %191 = vector.load %arg12[%c0_181, %c0_182, %c0_183] : memref<4x4x16xf32, #tpu.memory_space<vmem>>, vector<1x4x16xf32>
    %192 = vector.shape_cast %191 : vector<1x4x16xf32> to vector<4x16xf32>
    %cst_184 = arith.constant dense<0.000000e+00> : vector<4x64xf32>
    %193 = tpu.matmul %192, %190, %cst_184 {dimension_numbers = #tpu.dot_dimension_numbers<[1], [0], [0], [1], [0, 0, 1, 1], [], []>} : vector<4x16xf32>, vector<16x64xf32>, vector<4x64xf32> -> vector<4x64xf32>
    %c1_185 = arith.constant 1 : index
    %c0_186 = arith.constant 0 : index
    %c0_187 = arith.constant 0 : index
    %194 = vector.load %arg12[%c1_185, %c0_186, %c0_187] : memref<4x4x16xf32, #tpu.memory_space<vmem>>, vector<1x4x16xf32>
    %195 = vector.shape_cast %194 : vector<1x4x16xf32> to vector<4x16xf32>
    %cst_188 = arith.constant dense<0.000000e+00> : vector<4x64xf32>
    %196 = tpu.matmul %195, %190, %cst_188 {dimension_numbers = #tpu.dot_dimension_numbers<[1], [0], [0], [1], [0, 0, 1, 1], [], []>} : vector<4x16xf32>, vector<16x64xf32>, vector<4x64xf32> -> vector<4x64xf32>
    %197 = arith.maximumf %193, %196 : vector<4x64xf32>
    %c2_189 = arith.constant 2 : index
    %c0_190 = arith.constant 0 : index
    %c0_191 = arith.constant 0 : index
    %198 = vector.load %arg12[%c2_189, %c0_190, %c0_191] : memref<4x4x16xf32, #tpu.memory_space<vmem>>, vector<1x4x16xf32>
    %199 = vector.shape_cast %198 : vector<1x4x16xf32> to vector<4x16xf32>
    %cst_192 = arith.constant dense<0.000000e+00> : vector<4x64xf32>
    %200 = tpu.matmul %199, %190, %cst_192 {dimension_numbers = #tpu.dot_dimension_numbers<[1], [0], [0], [1], [0, 0, 1, 1], [], []>} : vector<4x16xf32>, vector<16x64xf32>, vector<4x64xf32> -> vector<4x64xf32>
    %201 = arith.maximumf %197, %200 : vector<4x64xf32>
    %c3_193 = arith.constant 3 : index
    %c0_194 = arith.constant 0 : index
    %c0_195 = arith.constant 0 : index
    %202 = vector.load %arg12[%c3_193, %c0_194, %c0_195] : memref<4x4x16xf32, #tpu.memory_space<vmem>>, vector<1x4x16xf32>
    %203 = vector.shape_cast %202 : vector<1x4x16xf32> to vector<4x16xf32>
    %cst_196 = arith.constant dense<0.000000e+00> : vector<4x64xf32>
    %204 = tpu.matmul %203, %190, %cst_196 {dimension_numbers = #tpu.dot_dimension_numbers<[1], [0], [0], [1], [0, 0, 1, 1], [], []>} : vector<4x16xf32>, vector<16x64xf32>, vector<4x64xf32> -> vector<4x64xf32>
    %205 = arith.maximumf %201, %204 : vector<4x64xf32>
    %c0_197 = arith.constant 0 : index
    %c0_198 = arith.constant 0 : index
    %206 = vector.load %arg14[%c0_197, %c0_198] : memref<1x1024xf32, #tpu.memory_space<vmem>>, vector<1x1024xf32>
    %207 = vector.extract_strided_slice %205 {offsets = [0, 0], sizes = [1, 64], strides = [1, 1]} : vector<4x64xf32> to vector<1x64xf32>
    %208 = arith.truncf %207 : vector<1x64xf32> to vector<1x64xbf16>
    %c0_199 = arith.constant 0 : index
    %c0_200 = arith.constant 0 : index
    %c0_201 = arith.constant 0 : index
    %209 = vector.load %arg13[%c0_199, %c0_200, %c0_201] : memref<4x64x1024xbf16, #tpu.memory_space<vmem>>, vector<1x64x1024xbf16>
    %210 = vector.shape_cast %209 : vector<1x64x1024xbf16> to vector<64x1024xbf16>
    %cst_202 = arith.constant dense<0.000000e+00> : vector<1x1024xf32>
    %211 = tpu.matmul %208, %210, %cst_202 {dimension_numbers = #tpu.dot_dimension_numbers<[1], [0], [0], [1], [0, 0, 1, 1], [], []>} : vector<1x64xbf16>, vector<64x1024xbf16>, vector<1x1024xf32> -> vector<1x1024xf32>
    %212 = arith.addf %206, %211 : vector<1x1024xf32>
    %213 = vector.extract_strided_slice %205 {offsets = [1, 0], sizes = [1, 64], strides = [1, 1]} : vector<4x64xf32> to vector<1x64xf32>
    %214 = arith.truncf %213 : vector<1x64xf32> to vector<1x64xbf16>
    %c1_203 = arith.constant 1 : index
    %c0_204 = arith.constant 0 : index
    %c0_205 = arith.constant 0 : index
    %215 = vector.load %arg13[%c1_203, %c0_204, %c0_205] : memref<4x64x1024xbf16, #tpu.memory_space<vmem>>, vector<1x64x1024xbf16>
    %216 = vector.shape_cast %215 : vector<1x64x1024xbf16> to vector<64x1024xbf16>
    %cst_206 = arith.constant dense<0.000000e+00> : vector<1x1024xf32>
    %217 = tpu.matmul %214, %216, %cst_206 {dimension_numbers = #tpu.dot_dimension_numbers<[1], [0], [0], [1], [0, 0, 1, 1], [], []>} : vector<1x64xbf16>, vector<64x1024xbf16>, vector<1x1024xf32> -> vector<1x1024xf32>
    %218 = arith.addf %212, %217 : vector<1x1024xf32>
    %219 = vector.extract_strided_slice %205 {offsets = [2, 0], sizes = [1, 64], strides = [1, 1]} : vector<4x64xf32> to vector<1x64xf32>
    %220 = arith.truncf %219 : vector<1x64xf32> to vector<1x64xbf16>
    %c2_207 = arith.constant 2 : index
    %c0_208 = arith.constant 0 : index
    %c0_209 = arith.constant 0 : index
    %221 = vector.load %arg13[%c2_207, %c0_208, %c0_209] : memref<4x64x1024xbf16, #tpu.memory_space<vmem>>, vector<1x64x1024xbf16>
    %222 = vector.shape_cast %221 : vector<1x64x1024xbf16> to vector<64x1024xbf16>
    %cst_210 = arith.constant dense<0.000000e+00> : vector<1x1024xf32>
    %223 = tpu.matmul %220, %222, %cst_210 {dimension_numbers = #tpu.dot_dimension_numbers<[1], [0], [0], [1], [0, 0, 1, 1], [], []>} : vector<1x64xbf16>, vector<64x1024xbf16>, vector<1x1024xf32> -> vector<1x1024xf32>
    %224 = arith.addf %218, %223 : vector<1x1024xf32>
    %225 = vector.extract_strided_slice %205 {offsets = [3, 0], sizes = [1, 64], strides = [1, 1]} : vector<4x64xf32> to vector<1x64xf32>
    %226 = arith.truncf %225 : vector<1x64xf32> to vector<1x64xbf16>
    %c3_211 = arith.constant 3 : index
    %c0_212 = arith.constant 0 : index
    %c0_213 = arith.constant 0 : index
    %227 = vector.load %arg13[%c3_211, %c0_212, %c0_213] : memref<4x64x1024xbf16, #tpu.memory_space<vmem>>, vector<1x64x1024xbf16>
    %228 = vector.shape_cast %227 : vector<1x64x1024xbf16> to vector<64x1024xbf16>
    %cst_214 = arith.constant dense<0.000000e+00> : vector<1x1024xf32>
    %229 = tpu.matmul %226, %228, %cst_214 {dimension_numbers = #tpu.dot_dimension_numbers<[1], [0], [0], [1], [0, 0, 1, 1], [], []>} : vector<1x64xbf16>, vector<64x1024xbf16>, vector<1x1024xf32> -> vector<1x1024xf32>
    %230 = arith.addf %224, %229 : vector<1x1024xf32>
    %cst_215 = arith.constant 0.000000e+00 : f32
    %231 = vector.broadcast %cst_215 : f32 to vector<1x1024xf32>
    %232 = arith.maximumf %230, %231 : vector<1x1024xf32>
    %233 = arith.truncf %232 : vector<1x1024xf32> to vector<1x1024xbf16>
    %c0_216 = arith.constant 0 : index
    %c0_217 = arith.constant 0 : index
    %234 = vector.load %arg15[%c0_216, %c0_217] : memref<1024x128xbf16, #tpu.memory_space<vmem>>, vector<1024x128xbf16>
    %cst_218 = arith.constant dense<0.000000e+00> : vector<1x128xf32>
    %235 = tpu.matmul %233, %234, %cst_218 {dimension_numbers = #tpu.dot_dimension_numbers<[1], [0], [0], [1], [0, 0, 1, 1], [], []>} : vector<1x1024xbf16>, vector<1024x128xbf16>, vector<1x128xf32> -> vector<1x128xf32>
    %c0_219 = arith.constant 0 : index
    %c0_220 = arith.constant 0 : index
    %236 = vector.load %arg16[%c0_219, %c0_220] : memref<1x128xf32, #tpu.memory_space<vmem>>, vector<1x128xf32>
    %237 = arith.addf %235, %236 : vector<1x128xf32>
    %c0_221 = arith.constant 0 : index
    %c0_222 = arith.constant 0 : index
    %c0_223 = arith.constant 0 : index
    %238 = vector.load %arg17[%c0_221, %c0_222, %c0_223] : memref<1x1x128xf32, #tpu.memory_space<vmem>>, vector<1x1x128xf32>
    %239 = vector.shape_cast %238 : vector<1x1x128xf32> to vector<1x128xf32>
    %240 = vector.shape_cast %237 : vector<1x128xf32> to vector<1x1x128xf32>
    tpu.vector_store %arg17[%c0_221, %c0_222, %c0_223], %240 {strides = array<i32>} : memref<1x1x128xf32, #tpu.memory_space<vmem>>, vector<1x1x128xf32>,
    return
  }
  func.func @transform_0(%arg0: i32) -> (i32, i32, i32) {
    %c0_i32 = arith.constant 0 : i32
    %c0_i32_0 = arith.constant 0 : i32
    %c0_i32_1 = arith.constant 0 : i32
    return %arg0, %c0_i32, %c0_i32_0 : i32, i32, i32
  }
  func.func @transform_1(%arg0: i32) -> (i32, i32) {
    %c0_i32 = arith.constant 0 : i32
    %c0_i32_0 = arith.constant 0 : i32
    %c0_i32_1 = arith.constant 0 : i32
    return %c0_i32, %c0_i32_0 : i32, i32
  }
  func.func @transform_2(%arg0: i32) -> (i32, i32) {
    %c0_i32 = arith.constant 0 : i32
    %c0_i32_0 = arith.constant 0 : i32
    %c0_i32_1 = arith.constant 0 : i32
    return %c0_i32, %c0_i32_0 : i32, i32
  }
  func.func @transform_3(%arg0: i32) -> (i32, i32, i32) {
    %c0_i32 = arith.constant 0 : i32
    %c0_i32_0 = arith.constant 0 : i32
    %c0_i32_1 = arith.constant 0 : i32
    %c0_i32_2 = arith.constant 0 : i32
    return %c0_i32, %c0_i32_0, %c0_i32_1 : i32, i32, i32
  }
  func.func @transform_4(%arg0: i32) -> (i32, i32, i32) {
    %c0_i32 = arith.constant 0 : i32
    %c0_i32_0 = arith.constant 0 : i32
    %c0_i32_1 = arith.constant 0 : i32
    %c0_i32_2 = arith.constant 0 : i32
    return %c0_i32, %c0_i32_0, %c0_i32_1 : i32, i32, i32
  }
  func.func @transform_5(%arg0: i32) -> (i32, i32) {
    %c0_i32 = arith.constant 0 : i32
    %c0_i32_0 = arith.constant 0 : i32
    %c0_i32_1 = arith.constant 0 : i32
    return %c0_i32, %c0_i32_0 : i32, i32
  }
  func.func @transform_6(%arg0: i32) -> (i32, i32, i32) {
    %c0_i32 = arith.constant 0 : i32
    %c0_i32_0 = arith.constant 0 : i32
    %c0_i32_1 = arith.constant 0 : i32
    %c0_i32_2 = arith.constant 0 : i32
    return %c0_i32, %c0_i32_0, %c0_i32_1 : i32, i32, i32
  }
  func.func @transform_7(%arg0: i32) -> (i32, i32, i32) {
    %c0_i32 = arith.constant 0 : i32
    %c0_i32_0 = arith.constant 0 : i32
    %c0_i32_1 = arith.constant 0 : i32
    %c0_i32_2 = arith.constant 0 : i32
    return %c0_i32, %c0_i32_0, %c0_i32_1 : i32, i32, i32
  }
  func.func @transform_8(%arg0: i32) -> (i32, i32) {
    %c0_i32 = arith.constant 0 : i32
    %c0_i32_0 = arith.constant 0 : i32
    %c0_i32_1 = arith.constant 0 : i32
    return %c0_i32, %c0_i32_0 : i32, i32
  }
  func.func @transform_9(%arg0: i32) -> (i32, i32, i32) {
    %c0_i32 = arith.constant 0 : i32
    %c0_i32_0 = arith.constant 0 : i32
    %c0_i32_1 = arith.constant 0 : i32
    %c0_i32_2 = arith.constant 0 : i32
    return %c0_i32, %c0_i32_0, %c0_i32_1 : i32, i32, i32
  }
  func.func @transform_10(%arg0: i32) -> (i32, i32, i32) {
    %c0_i32 = arith.constant 0 : i32
    %c0_i32_0 = arith.constant 0 : i32
    %c0_i32_1 = arith.constant 0 : i32
    %c0_i32_2 = arith.constant 0 : i32
    return %c0_i32, %c0_i32_0, %c0_i32_1 : i32, i32, i32
  }
  func.func @transform_11(%arg0: i32) -> (i32, i32, i32) {
    %c0_i32 = arith.constant 0 : i32
    %c0_i32_0 = arith.constant 0 : i32
    %c0_i32_1 = arith.constant 0 : i32
    %c0_i32_2 = arith.constant 0 : i32
    return %c0_i32, %c0_i32_0, %c0_i32_1 : i32, i32, i32
  }
  func.func @transform_12(%arg0: i32) -> (i32, i32, i32) {
    %c0_i32 = arith.constant 0 : i32
    %c0_i32_0 = arith.constant 0 : i32
    %c0_i32_1 = arith.constant 0 : i32
    %c0_i32_2 = arith.constant 0 : i32
    return %c0_i32, %c0_i32_0, %c0_i32_1 : i32, i32, i32
  }
  func.func @transform_13(%arg0: i32) -> (i32, i32) {
    %c0_i32 = arith.constant 0 : i32
    %c0_i32_0 = arith.constant 0 : i32
    %c0_i32_1 = arith.constant 0 : i32
    return %c0_i32, %c0_i32_0 : i32, i32
  }
  func.func @transform_14(%arg0: i32) -> (i32, i32) {
    %c0_i32 = arith.constant 0 : i32
    %c0_i32_0 = arith.constant 0 : i32
    %c0_i32_1 = arith.constant 0 : i32
    return %c0_i32, %c0_i32_0 : i32, i32
  }
  func.func @transform_15(%arg0: i32) -> (i32, i32) {
    %c0_i32 = arith.constant 0 : i32
    %c0_i32_0 = arith.constant 0 : i32
    %c0_i32_1 = arith.constant 0 : i32
    return %c0_i32, %c0_i32_0 : i32, i32
  }
  func.func @transform_16(%arg0: i32) -> (i32, i32, i32) {
    %c0_i32 = arith.constant 0 : i32
    %c0_i32_0 = arith.constant 0 : i32
    %c0_i32_1 = arith.constant 0 : i32
    return %arg0, %c0_i32, %c0_i32_0 : i32, i32, i32
  }
}

</mosaic_0001>

<bundles_post_ra>
// kernel: squeeze.3
= control target key start
LH: loop header
LB: loop body
LE: loop exit
PB: predicated region body
PF: predicated region fallthrough
CT: control target
= control target key end

     0   :  { %s106_s0 = inlined_call_operand.vmem [shape: f32[2,40], index: 0, kind: input, shape index: {}]   ;;  %s107_s1 = inlined_call_operand.hbm [shape: f32[2,4,10], index: 1, kind: output, shape index: {}]  }
   0x1   :  { %v5_v0 = vld [vmem:[%s106_s0] sm:$0x3] }
   0x2   :  { %6 = vst [vmem:[#allocation3] sm:$0x3] %v5_v0 }
   0x3   :  { %2 = vsyncpa [#allocation1], 0  ;;  %s77_s0 = smov 118   ;;  %s78_s8 = smov 98   ;;  %vm8_vm0 = vcmask 80896  }
   0x4   :  { %s79_s9 = smov 108   ;;  %s80_s10 = smov [#allocation0]  }
   0x5   :  { %s43_s11 = sshll.u32 %s80_s10, 4  ;;  %s44_s11 = int_to_ptr.vmem [resolvable:$true] %s43_s11 }
   0x6   :  { %s53_s12 = scalar_lea.vmem %s44_s11, 128  ;;  %p58_p1 = scmp.lt.s32.totalorder %s44_s11, %s44_s11 }
   0x7   :  { %p54_p0 = scmp.ne.s32.totalorder %s44_s11, %s53_s12  ;;  %p59_p2 = scmp.lt.s32.totalorder %s53_s12, %s53_s12 }
   0x9   :  { %v10_v1 = vld [vmem:[#allocation3] sm:$0x3]   ;;  %p60_p3 = por %p59_p2, %p58_p1 }
   0xa   :  { %v22_v2 = vld [vmem:[#allocation3] sm:$0x3]   ;;  %11 = vrot.lane.b32.xlu0 %v10_v1, %s77_s0 }
   0xb   :  { %23 = vrot.lane.b32.xlu1 %v22_v2, %s78_s8  ;;  %v7_v3 = vld [vmem:[#allocation3] sm:$0x3]   ;;  %p61_p4 = pnand %p60_p3, %p54_p0 }
   0xc   :  { %v16_v4 = vld [vmem:[#allocation3] sm:$0x3]   ;;  %9 = vst.msk [vmem:[#allocation2] ss:$8 sm:$0x3] %vm8_vm0, %v7_v3  }
   0xe   :  { %17 = vrot.lane.b32.xlu0 %v16_v4, %s79_s9 }
  0x7c   :  { %v12_v5 = vpop.permute.xlu0 %11  }
  0x7d   :  { %v24_v6 = vpop.permute.xlu1 %23   ;;  %15 = vst.msk [vmem:[#allocation2 + $0x1] ss:$8 sm:$0x3] %vm8_vm0, %v12_v5  }
  0x7e   :  { %27 = vst.msk [vmem:[#allocation2 + $0x3] ss:$8 sm:$0x3] %vm8_vm0, %v24_v6  }
  0x80   :  { %v18_v7 = vpop.permute.xlu0 %17  }
  0x81   :  { %21 = vst.msk [vmem:[#allocation2 + $0x2] ss:$8 sm:$0x3] %vm8_vm0, %v18_v7  }
  0x88   :  { %v31_v8 = vld [vmem:[#allocation2] sm:$0xf]  ;;  %v35_v9 = vld [vmem:[#allocation2 + $0x8] sm:$0xf] }
  0x89   :  { %33 = vst [vmem:[#allocation0] sm:$0xf] %v31_v8  ;;  %38 = vst [vmem:[#allocation0 + $0x4] sm:$0xf] %v35_v9 }
  0x8a   :  { %64 = shalt.err (!%p61_p4)
}
  0x8b   :  { %s65_s15 = scalar_lea.hbm %s107_s1, 128 }
  0x8c   :  { %p66_p5 = scmp.ne.s32.totalorder %s107_s1, %s65_s15  ;;  %p69_p6 = scmp.lt.u32.totalorder %s65_s15, %s107_s1 }
  0x8e   :  { %p71_p7 = pnand %p69_p6, %p66_p5 }
  0x90   :  { %74 = shalt.err (!%p71_p7)
}
  0x91   :  { %46 = dma.vmem_to_hbm [thread:$0]  %s44_s11, 128, %s107_s1, [#allocation1]  }
  0x92   :  { %75 = dma.done.wait [#allocation1], 128  }
  0x93   :  { %76 = vsyncadd [#allocation1], 4294967168 }
  0x94   :  { %48 = vsyncpa [#allocation1], 1 }

// kernel: cnn_forward.1
= control target key start
LH: loop header
LB: loop body
LE: loop exit
PB: predicated region body
PF: predicated region fallthrough
CT: control target
= control target key end

     0   :  { %s11033_s21 = smov 0   ;;  %s12910_s0 = inlined_call_operand.vmem [shape: f32[2,256,16], index: 0, kind: input, shape index: {}]   ;;  %s12911_s1 = inlined_call_operand.vmem [shape: f32[16,32], index: 1, kind: input, shape index: {}]   ;;  %s12912_s2 = inlined_call_operand.vmem [shape: f32[1,32], index: 2, kind: input, shape index: {}]   ;;  %s12913_s3 = inlined_call_operand.vmem [shape: f32[9,64,64], index: 3, kind: input, shape index: {}]   ;;  %s12914_s4 = inlined_call_operand.vmem [shape: bf16[9,32,64], index: 4, kind: input, shape index: {}]   ;;  %s12915_s5 = inlined_call_operand.vmem [shape: f32[1,64], index: 5, kind: input, shape index: {}]   ;;  %s12916_s6 = inlined_call_operand.vmem [shape: f32[9,16,16], index: 6, kind: input, shape index: {}]   ;;  %s12917_s7 = inlined_call_operand.vmem [shape: bf16[9,64,64], index: 7, kind: input, shape index: {}]   ;;  %s12918_s8 = inlined_call_operand.vmem [shape: f32[1,64], index: 8, kind: input, shape index: {}]   ;;  %s12919_s9 = inlined_call_operand.vmem [shape: f32[4,64,256], index: 9, kind: input, shape index: {}]   ;;  %s12920_s10 = inlined_call_operand.vmem [shape: f32[4,16,64], index: 10, kind: input, shape index: {}]   ;;  %s12921_s11 = inlined_call_operand.vmem [shape: f32[4,4,16], index: 11, kind: input, shape index: {}]   ;;  %s12922_s12 = inlined_call_operand.vmem [shape: bf16[4,64,1024], index: 12, kind: input, shape index: {}]   ;;  %s12923_s13 = inlined_call_operand.vmem [shape: f32[1,1024], index: 13, kind: input, shape index: {}]   ;;  %s12924_s14 = inlined_call_operand.vmem [shape: bf16[1024,128], index: 14, kind: input, shape index: {}]   ;;  %s12925_s15 = inlined_call_operand.vmem [shape: f32[1,128], index: 15, kind: input, shape index: {}]   ;;  %s12926_s16 = inlined_call_operand.vmem [shape: f32[2,1,128], index: 16, kind: output, shape index: {}]  }
   0x1   :  { %12927 = sst [smem:[#allocation2_spill]] %s12910_s0 }
   0x2 LB: > { %s8205_s22 = sadd.s32 4294967295, %s10941_s21   ;;  %p8209_p0 = scmp.ge.s32.totalorder %s10941_s21, 1  ;;  %s10941_s21 = sphi %s11033_s21, %s26_s21  }
   0x3   : > { %p462_p1 = scmp.lt.s32.totalorder %s10941_s21, 3 }
   0x5   : > { %p463_p2 = pnand %p8209_p0, %p462_p1 }
   0x6   : > { %v551_v0 = vld [vmem:[%s12911_s1] sm:$0xff] (!%p463_p2)  ;;  %v552_v1 = vld [vmem:[%s12911_s1 + $0x8] sm:$0xff] (!%p463_p2)  ;;  %p510_p3 = scmp.lt.s32.totalorder (!%p463_p2), %s8205_s22, 1  ;;  %vm560_vm0 = vcmask (!%p463_p2), 130048   ;;  %s12928_s30 = sld [smem:[#allocation2_spill]] (!%p463_p2)  ;;  %vm1433_vm1 = vcmask (!%p463_p2), 523264  }
   0x7   : > { %466 = sbr.rel (%p463_p2) target bundleno = 3626 (0xe2a), region = 84  ;;  %v10352_v2 = vpack.c.bf16 (!%p463_p2), %v552_v1, %v551_v0  ;;  %v915_v35 = vld [vmem:[%s12919_s9 + $0x8] sm:$0xff] (!%p463_p2)  ;;  %v11128_v37 = vld [vmem:[%s12912_s2] ss:$0 sm:$0xff] (!%p463_p2)  ;;  %vm1730_vm2 = vcmask (!%p463_p2), 261120   ;;  %vm10944_vm3 = vmmov (!%p463_p2), 0  }
   0x8   : > { %994 = vmatprep.mubr.f32.mxu1 (!%p463_p2), %v915_v35  ;;  %v8262_v36 = vld [vmem:[%s12919_s9 + $0x108] sm:$0xff] (!%p463_p2) }
   0x9   : > { %10353 = vmatprep.subr.bf16.mxu0 (!%p463_p2), %v10352_v2 }
   0xa   : > { %10355 = vmatpush3.bf16.msra.mxu0 (!%p463_p2), %v10352_v2 }
   0xe   : > { %s12930_s22 = smov (!%p510_p3, %s8205_s22), 1 }
   0xf   : > { %s8987_s27 = sshll.u32 %s12930_s22, 8  ;;  %s517_s23 = scalar_lea.vmem %s12926_s16, %s12930_s22 }
  0x10   : > { %s11053_s0 = scalar_lea.vmem %s12928_s30, %s8987_s27 }
  0x11   : > { %v519_v3 = vld [vmem:[%s11053_s0] sm:$0xff]  ;;  %v520_v4 = vld [vmem:[%s11053_s0 + $0x8] sm:$0xff]  ;;  %v521_v5 = vld [vmem:[%s11053_s0 + $0x10] sm:$0xff] }
  0x12   : > { %9669 = vmatprep.mubr.msk.f32.mxu0 %vm560_vm0, %v519_v3  ;;  %v522_v6 = vld [vmem:[%s11053_s0 + $0x18] sm:$0xff]  ;;  %v523_v7 = vld [vmem:[%s11053_s0 + $0x20] sm:$0xff]  ;;  %v524_v8 = vld [vmem:[%s11053_s0 + $0x28] sm:$0xff] }
  0x13   : > { %9670 = vmatmul.mubr.msk.f32.vlgmr.msra.gmra.mrb[0].mxu0 %vm560_vm0, %v520_v4  ;;  %v525_v9 = vld [vmem:[%s11053_s0 + $0x30] sm:$0xff]  ;;  %v526_v10 = vld [vmem:[%s11053_s0 + $0x38] sm:$0xff]  ;;  %v527_v11 = vld [vmem:[%s11053_s0 + $0x40] sm:$0xff] }
  0x14   : > { %9672 = vmatprep.mubr.msk.f32.mxu0 %vm560_vm0, %v521_v5  ;;  %v528_v12 = vld [vmem:[%s11053_s0 + $0x48] sm:$0xff]  ;;  %v529_v13 = vld [vmem:[%s11053_s0 + $0x50] sm:$0xff]  ;;  %v530_v14 = vld [vmem:[%s11053_s0 + $0x58] sm:$0xff] }
  0x15   : > { %v531_v15 = vld [vmem:[%s11053_s0 + $0x60] sm:$0xff]  ;;  %v532_v16 = vld [vmem:[%s11053_s0 + $0x68] sm:$0xff]  ;;  %v533_v17 = vld [vmem:[%s11053_s0 + $0x70] sm:$0xff] }
  0x16   : > { %v534_v18 = vld [vmem:[%s11053_s0 + $0x78] sm:$0xff]  ;;  %v535_v19 = vld [vmem:[%s11053_s0 + $0x80] sm:$0xff]  ;;  %v536_v20 = vld [vmem:[%s11053_s0 + $0x88] sm:$0xff] }
  0x17   : > { %9673 = vmatmul.mubr.msk.f32.gmra.mrb[2].mxu0 %vm560_vm0, %v522_v6  ;;  %v537_v21 = vld [vmem:[%s11053_s0 + $0x90] sm:$0xff]  ;;  %v538_v22 = vld [vmem:[%s11053_s0 + $0x98] sm:$0xff]  ;;  %v539_v23 = vld [vmem:[%s11053_s0 + $0xa0] sm:$0xff] }
  0x18   : > { %9675 = vmatprep.mubr.msk.f32.mxu0 %vm560_vm0, %v523_v7  ;;  %v540_v24 = vld [vmem:[%s11053_s0 + $0xa8] sm:$0xff]  ;;  %v541_v25 = vld [vmem:[%s11053_s0 + $0xb0] sm:$0xff]  ;;  %v542_v26 = vld [vmem:[%s11053_s0 + $0xb8] sm:$0xff] }
  0x19   : > { %v543_v27 = vld [vmem:[%s11053_s0 + $0xc0] sm:$0xff]  ;;  %v544_v28 = vld [vmem:[%s11053_s0 + $0xc8] sm:$0xff]  ;;  %v545_v29 = vld [vmem:[%s11053_s0 + $0xd0] sm:$0xff] }
  0x1a   : > { %v546_v30 = vld [vmem:[%s11053_s0 + $0xd8] sm:$0xff]  ;;  %v547_v31 = vld [vmem:[%s11053_s0 + $0xe0] sm:$0xff]  ;;  %v548_v32 = vld [vmem:[%s11053_s0 + $0xe8] sm:$0xff] }
  0x1b   : > { %9676 = vmatmul.mubr.msk.f32.gmra.mrb[4].mxu0 %vm560_vm0, %v524_v8  ;;  %v549_v33 = vld [vmem:[%s11053_s0 + $0xf0] sm:$0xff]  ;;  %v550_v34 = vld [vmem:[%s11053_s0 + $0xf8] sm:$0xff] }
  0x1c   : > { %9678 = vmatprep.mubr.msk.f32.mxu0 %vm560_vm0, %v525_v9 }
  0x1f   : > { %9679 = vmatmul.mubr.msk.f32.gmra.mrb[6].mxu0 %vm560_vm0, %v526_v10 }
  0x20   : > { %9681 = vmatprep.mubr.msk.f32.mxu0 %vm560_vm0, %v527_v11 }
  0x23   : > { %9682 = vmatmul.mubr.msk.f32.gmra.mrb[8].mxu0 %vm560_vm0, %v528_v12 }
  0x24   : > { %9684 = vmatprep.mubr.msk.f32.mxu0 %vm560_vm0, %v529_v13 }
  0x27   : > { %9685 = vmatmul.mubr.msk.f32.gmra.mrb[10].mxu0 %vm560_vm0, %v530_v14 }
  0x28   : > { %9687 = vmatprep.mubr.msk.f32.mxu0 %vm560_vm0, %v531_v15 }
  0x2b   : > { %9688 = vmatmul.mubr.msk.f32.gmra.mrb[12].mxu0 %vm560_vm0, %v532_v16 }
  0x2c   : > { %9690 = vmatprep.mubr.msk.f32.mxu0 %vm560_vm0, %v533_v17 }
  0x2f   : > { %9691 = vmatmul.mubr.msk.f32.gmra.mrb[14].mxu0 %vm560_vm0, %v534_v18 }
  0x30   : > { %9693 = vmatprep.mubr.msk.f32.mxu0 %vm560_vm0, %v535_v19 }
  0x33   : > { %9694 = vmatmul.mubr.msk.f32.gmra.mrb[16].mxu0 %vm560_vm0, %v536_v20 }
  0x34   : > { %9696 = vmatprep.mubr.msk.f32.mxu0 %vm560_vm0, %v537_v21 }
  0x37   : > { %9697 = vmatmul.mubr.msk.f32.gmra.mrb[18].mxu0 %vm560_vm0, %v538_v22 }
  0x38   : > { %9699 = vmatprep.mubr.msk.f32.mxu0 %vm560_vm0, %v539_v23 }
  0x3b   : > { %9700 = vmatmul.mubr.msk.f32.gmra.mrb[20].mxu0 %vm560_vm0, %v540_v24 }
  0x3c   : > { %9702 = vmatprep.mubr.msk.f32.mxu0 %vm560_vm0, %v541_v25 }
  0x3f   : > { %9703 = vmatmul.mubr.msk.f32.gmra.mrb[22].mxu0 %vm560_vm0, %v542_v26 }
  0x40   : > { %9705 = vmatprep.mubr.msk.f32.mxu0 %vm560_vm0, %v543_v27 }
  0x43   : > { %9706 = vmatmul.mubr.msk.f32.gmra.mrb[24].mxu0 %vm560_vm0, %v544_v28 }
  0x44   : > { %9708 = vmatprep.mubr.msk.f32.mxu0 %vm560_vm0, %v545_v29 }
  0x47   : > { %9709 = vmatmul.mubr.msk.f32.gmra.mrb[26].mxu0 %vm560_vm0, %v546_v30 }
  0x48   : > { %9711 = vmatprep.mubr.msk.f32.mxu0 %vm560_vm0, %v547_v31 }
  0x4b   : > { %9712 = vmatmul.mubr.msk.f32.gmra.mrb[28].mxu0 %vm560_vm0, %v548_v32 }
  0x4c   : > { %9714 = vmatprep.mubr.msk.f32.mxu0 %vm560_vm0, %v549_v33 }
  0x4f   : > { %9715 = vmatmul.mubr.msk.f32.gmra.mrb[30].mxu0 %vm560_vm0, %v550_v34 }
  0x50   : > { %1246 = vmatprep.mubr.f32.mxu0 %v8262_v36 }
  0xe6   : > { %v9671_v38 = vpop.f32.mrb[0].mxu0 }
  0xe7   : > { %v729_v39 = vadd.f32 %v9671_v38, %v11128_v37  ;;  %v723_v40 = vpop.f32.mrb[1].mxu0 }
  0xe8   : > { %v724_v41 = vadd.f32 %v11128_v37, %v723_v40 }
  0xe9   : > { %v883_v42 = vmax.f32 %v729_v39, 0.0 }
  0xea   : > { %v882_v43 = vmax.f32 %v724_v41, 0.0  ;;  %v9674_v44 = vpop.f32.mrb[2].mxu0 }
  0xeb   : > { %v739_v45 = vadd.f32 %v9674_v44, %v11128_v37  ;;  %v733_v46 = vpop.f32.mrb[3].mxu0 }
  0xec   : > { %v11133_v47 = vpack.c.bf16 %v883_v42, %v882_v43  ;;  %v734_v48 = vadd.f32 %v11128_v37, %v733_v46 }
  0xed   : > { %v885_v49 = vmax.f32 %v739_v45, 0.0 }
  0xee   : > { %v884_v50 = vmax.f32 %v734_v48, 0.0  ;;  %v9677_v51 = vpop.f32.mrb[4].mxu0 }
  0xef   : > { %v749_v52 = vadd.f32 %v9677_v51, %v11128_v37  ;;  %v743_v53 = vpop.f32.mrb[5].mxu0 }
  0xf0   : > { %v11137_v54 = vpack.c.bf16 %v885_v49, %v884_v50  ;;  %v744_v55 = vadd.f32 %v11128_v37, %v743_v53 }
  0xf1   : > { %v887_v56 = vmax.f32 %v749_v52, 0.0 }
  0xf2   : > { %v886_v57 = vmax.f32 %v744_v55, 0.0  ;;  %v9680_v58 = vpop.f32.mrb[6].mxu0 }
  0xf3   : > { %v759_v59 = vadd.f32 %v9680_v58, %v11128_v37  ;;  %v753_v60 = vpop.f32.mrb[7].mxu0 }
  0xf4   : > { %v11141_v61 = vpack.c.bf16 %v887_v56, %v886_v57  ;;  %v754_v62 = vadd.f32 %v11128_v37, %v753_v60 }
  0xf5   : > { %v889_v63 = vmax.f32 %v759_v59, 0.0 }
  0xf6   : > { %v888_v0 = vmax.f32 %v754_v62, 0.0  ;;  %v9683_v1 = vpop.f32.mrb[8].mxu0 }
  0xf7   : > { %v769_v2 = vadd.f32 %v9683_v1, %v11128_v37  ;;  %v763_v3 = vpop.f32.mrb[9].mxu0 }
  0xf8   : > { %v11145_v4 = vpack.c.bf16 %v889_v63, %v888_v0  ;;  %v764_v5 = vadd.f32 %v11128_v37, %v763_v3 }
  0xf9   : > { %v891_v6 = vmax.f32 %v769_v2, 0.0 }
  0xfa   : > { %v890_v7 = vmax.f32 %v764_v5, 0.0  ;;  %v9686_v8 = vpop.f32.mrb[10].mxu0 }
  0xfb   : > { %v779_v9 = vadd.f32 %v9686_v8, %v11128_v37  ;;  %v773_v10 = vpop.f32.mrb[11].mxu0 }
  0xfc   : > { %v11149_v11 = vpack.c.bf16 %v891_v6, %v890_v7  ;;  %v774_v12 = vadd.f32 %v11128_v37, %v773_v10 }
  0xfd   : > { %v893_v13 = vmax.f32 %v779_v9, 0.0 }
  0xfe   : > { %v892_v14 = vmax.f32 %v774_v12, 0.0  ;;  %v9689_v15 = vpop.f32.mrb[12].mxu0 }
  0xff   : > { %v789_v16 = vadd.f32 %v9689_v15, %v11128_v37  ;;  %v783_v17 = vpop.f32.mrb[13].mxu0 }
 0x100   : > { %v11153_v18 = vpack.c.bf16 %v893_v13, %v892_v14  ;;  %v784_v19 = vadd.f32 %v11128_v37, %v783_v17 }
 0x101   : > { %v895_v20 = vmax.f32 %v789_v16, 0.0 }
 0x102   : > { %v894_v21 = vmax.f32 %v784_v19, 0.0  ;;  %v9692_v22 = vpop.f32.mrb[14].mxu0 }
 0x103   : > { %v799_v23 = vadd.f32 %v9692_v22, %v11128_v37  ;;  %v793_v24 = vpop.f32.mrb[15].mxu0 }
 0x104   : > { %v11157_v25 = vpack.c.bf16 %v895_v20, %v894_v21  ;;  %v794_v26 = vadd.f32 %v11128_v37, %v793_v24 }
 0x105   : > { %v897_v27 = vmax.f32 %v799_v23, 0.0 }
 0x106   : > { %v896_v28 = vmax.f32 %v794_v26, 0.0  ;;  %v9695_v29 = vpop.f32.mrb[16].mxu0 }
 0x107   : > { %v809_v30 = vadd.f32 %v9695_v29, %v11128_v37  ;;  %v803_v31 = vpop.f32.mrb[17].mxu0 }
 0x108   : > { %v11161_v32 = vpack.c.bf16 %v897_v27, %v896_v28  ;;  %v804_v33 = vadd.f32 %v11128_v37, %v803_v31  ;;  %v917_v31 = vld [vmem:[%s12919_s9 + $0x18] sm:$0xff] }
 0x109   : > { %v899_v34 = vmax.f32 %v809_v30, 0.0  ;;  %v8261_v30 = vld [vmem:[%s12919_s9 + $0x100] sm:$0xff] }
 0x10a   : > { %v898_v35 = vmax.f32 %v804_v33, 0.0  ;;  %v9698_v36 = vpop.f32.mrb[18].mxu0  ;;  %v8264_v33 = vld [vmem:[%s12919_s9 + $0x118] sm:$0xff] }
 0x10b   : > { %v819_v38 = vadd.f32 %v9698_v36, %v11128_v37  ;;  %v813_v39 = vpop.f32.mrb[19].mxu0  ;;  %v919_v36 = vld [vmem:[%s12919_s9 + $0x28] sm:$0xff] }
 0x10c   : > { %v11165_v40 = vpack.c.bf16 %v899_v34, %v898_v35  ;;  %v814_v41 = vadd.f32 %v11128_v37, %v813_v39  ;;  %v916_v34 = vld [vmem:[%s12919_s9 + $0x10] sm:$0xff]  ;;  %v918_v39 = vld [vmem:[%s12919_s9 + $0x20] sm:$0xff] }
 0x10d   : > { %v901_v42 = vmax.f32 %v819_v38, 0.0  ;;  %v8263_v35 = vld [vmem:[%s12919_s9 + $0x110] sm:$0xff]  ;;  %v8266_v38 = vld [vmem:[%s12919_s9 + $0x128] sm:$0xff] }
 0x10e   : > { %v900_v43 = vmax.f32 %v814_v41, 0.0  ;;  %v9701_v44 = vpop.f32.mrb[20].mxu0  ;;  %10357 = vmatprep.subr.bf16.mxu1 %v11165_v40  ;;  %10421 = vmatprep.subr.bf16.mxu0 %v11165_v40  ;;  %v8265_v41 = vld [vmem:[%s12919_s9 + $0x120] sm:$0xff] }
 0x10f   : > { %v829_v45 = vadd.f32 %v9701_v44, %v11128_v37  ;;  %v823_v46 = vpop.f32.mrb[21].mxu0  ;;  %10359 = vmatpush3.bf16.msra.mxu1 %v11133_v47  ;;  %10423 = vmatpush3.bf16.msra.mxu0 %v11133_v47  ;;  %v920_v44 = vld [vmem:[%s12919_s9 + $0x30] sm:$0xff] }
 0x110   : > { %v11173_v48 = vpack.c.bf16 %v901_v42, %v900_v43  ;;  %v824_v49 = vadd.f32 %v11128_v37, %v823_v46  ;;  %v921_v42 = vld [vmem:[%s12919_s9 + $0x38] sm:$0xff]  ;;  %v923_v46 = vld [vmem:[%s12919_s9 + $0x48] sm:$0xff] }
 0x111   : > { %v903_v50 = vmax.f32 %v829_v45, 0.0  ;;  %v8268_v43 = vld [vmem:[%s12919_s9 + $0x138] sm:$0xff]  ;;  %v8267_v45 = vld [vmem:[%s12919_s9 + $0x130] sm:$0xff] }
 0x112   : > { %v902_v51 = vmax.f32 %v824_v49, 0.0  ;;  %v9704_v52 = vpop.f32.mrb[22].mxu0  ;;  %10361 = vmatprep.subr.bf16.mxu1 %v11173_v48  ;;  %10425 = vmatprep.subr.bf16.mxu0 %v11173_v48  ;;  %v8270_v49 = vld [vmem:[%s12919_s9 + $0x148] sm:$0xff] }
 0x113   : > { %v839_v53 = vadd.f32 %v9704_v52, %v11128_v37  ;;  %v833_v55 = vpop.f32.mrb[23].mxu0  ;;  %10363 = vmatpush3.bf16.msra.mxu1 %v11137_v54  ;;  %10427 = vmatpush3.bf16.msra.mxu0 %v11137_v54  ;;  %v925_v52 = vld [vmem:[%s12919_s9 + $0x58] sm:$0xff] }
 0x114   : > { %v11181_v56 = vpack.c.bf16 %v903_v50, %v902_v51  ;;  %v834_v57 = vadd.f32 %v11128_v37, %v833_v55  ;;  %v922_v50 = vld [vmem:[%s12919_s9 + $0x40] sm:$0xff]  ;;  %v924_v55 = vld [vmem:[%s12919_s9 + $0x50] sm:$0xff] }
 0x115   : > { %v905_v58 = vmax.f32 %v839_v53, 0.0  ;;  %v8269_v51 = vld [vmem:[%s12919_s9 + $0x140] sm:$0xff]  ;;  %v8272_v53 = vld [vmem:[%s12919_s9 + $0x158] sm:$0xff] }
 0x116   : > { %v904_v59 = vmax.f32 %v834_v57, 0.0  ;;  %v9707_v60 = vpop.f32.mrb[24].mxu0  ;;  %10365 = vmatprep.subr.bf16.mxu1 %v11181_v56  ;;  %10429 = vmatprep.subr.bf16.mxu0 %v11181_v56  ;;  %v8271_v57 = vld [vmem:[%s12919_s9 + $0x150] sm:$0xff] }
 0x117   : > { %v849_v62 = vadd.f32 %v9707_v60, %v11128_v37  ;;  %v843_v63 = vpop.f32.mrb[25].mxu0  ;;  %10367 = vmatpush3.bf16.msra.mxu1 %v11141_v61  ;;  %10431 = vmatpush3.bf16.msra.mxu0 %v11141_v61  ;;  %v926_v60 = vld [vmem:[%s12919_s9 + $0x60] sm:$0xff] }
 0x118   : > { %v11189_v0 = vpack.c.bf16 %v905_v58, %v904_v59  ;;  %v844_v1 = vadd.f32 %v11128_v37, %v843_v63  ;;  %v927_v58 = vld [vmem:[%s12919_s9 + $0x68] sm:$0xff]  ;;  %v929_v63 = vld [vmem:[%s12919_s9 + $0x78] sm:$0xff] }
 0x119   : > { %v907_v2 = vmax.f32 %v849_v62, 0.0  ;;  %v8274_v59 = vld [vmem:[%s12919_s9 + $0x168] sm:$0xff]  ;;  %v8273_v62 = vld [vmem:[%s12919_s9 + $0x160] sm:$0xff] }
 0x11a   : > { %v906_v3 = vmax.f32 %v844_v1, 0.0  ;;  %v9710_v5 = vpop.f32.mrb[26].mxu0  ;;  %10369 = vmatprep.subr.bf16.mxu1 %v11189_v0  ;;  %10433 = vmatprep.subr.bf16.mxu0 %v11189_v0  ;;  %v8276_v1 = vld [vmem:[%s12919_s9 + $0x178] sm:$0xff] }
 0x11b   : > { %v859_v6 = vadd.f32 %v9710_v5, %v11128_v37  ;;  %v853_v7 = vpop.f32.mrb[27].mxu0  ;;  %10371 = vmatpush3.bf16.msra.mxu1 %v11145_v4  ;;  %10435 = vmatpush3.bf16.msra.mxu0 %v11145_v4  ;;  %v8246_v5 = vld [vmem:[%s12919_s9 + $0x88] sm:$0xff] }
 0x11c   : > { %v11197_v8 = vpack.c.bf16 %v907_v2, %v906_v3  ;;  %v854_v9 = vadd.f32 %v11128_v37, %v853_v7  ;;  %v928_v2 = vld [vmem:[%s12919_s9 + $0x70] sm:$0xff]  ;;  %v8248_v7 = vld [vmem:[%s12919_s9 + $0x98] sm:$0xff] }
 0x11d   : > { %v909_v10 = vmax.f32 %v859_v6, 0.0  ;;  %v8275_v3 = vld [vmem:[%s12919_s9 + $0x170] sm:$0xff]  ;;  %v8245_v6 = vld [vmem:[%s12919_s9 + $0x80] sm:$0xff] }
 0x11e   : > { %v908_v12 = vmax.f32 %v854_v9, 0.0  ;;  %v9713_v13 = vpop.f32.mrb[28].mxu0  ;;  %10373 = vmatprep.subr.bf16.mxu1 %v11197_v8  ;;  %10437 = vmatprep.subr.bf16.mxu0 %v11197_v8  ;;  %v8247_v9 = vld [vmem:[%s12919_s9 + $0x90] sm:$0xff] }
 0x11f   : > { %v869_v14 = vadd.f32 %v9713_v13, %v11128_v37  ;;  %v863_v15 = vpop.f32.mrb[29].mxu0  ;;  %10375 = vmatpush3.bf16.msra.mxu1 %v11149_v11  ;;  %10439 = vmatpush3.bf16.msra.mxu0 %v11149_v11  ;;  %v8277_v13 = vld [vmem:[%s12919_s9 + $0x180] sm:$0xff] }
 0x120   : > { %v11205_v16 = vpack.c.bf16 %v909_v10, %v908_v12  ;;  %v864_v17 = vadd.f32 %v11128_v37, %v863_v15  ;;  %v8250_v10 = vld [vmem:[%s12919_s9 + $0xa8] sm:$0xff]  ;;  %v8259_v12 = vld [vmem:[%s12919_s9 + $0xf0] sm:$0xff] }
 0x121   : > { %v911_v19 = vmax.f32 %v869_v14, 0.0  ;;  %v8279_v14 = vld [vmem:[%s12919_s9 + $0x190] sm:$0xff]  ;;  %v8282_v15 = vld [vmem:[%s12919_s9 + $0x1a8] sm:$0xff] }
 0x122   : > { %v910_v20 = vmax.f32 %v864_v17, 0.0  ;;  %v9716_v21 = vpop.f32.mrb[30].mxu0  ;;  %10377 = vmatprep.subr.bf16.mxu1 %v11205_v16  ;;  %10441 = vmatprep.subr.bf16.mxu0 %v11205_v16  ;;  %v8283_v17 = vld [vmem:[%s12919_s9 + $0x1b0] sm:$0xff] }
 0x123   : > { %v879_v22 = vadd.f32 %v9716_v21, %v11128_v37  ;;  %v873_v23 = vpop.f32.mrb[31].mxu0  ;;  %10379 = vmatpush3.bf16.msra.mxu1 %v11153_v18  ;;  %10443 = vmatpush3.bf16.msra.mxu0 %v11153_v18  ;;  %v8288_v21 = vld [vmem:[%s12919_s9 + $0x1d8] sm:$0xff] }
 0x124   : > { %v11213_v24 = vpack.c.bf16 %v911_v19, %v910_v20  ;;  %v874_v26 = vadd.f32 %v11128_v37, %v873_v23  ;;  %v914_v37 = vld [vmem:[%s12919_s9] sm:$0xff]  ;;  %v8286_v19 = vld [vmem:[%s12919_s9 + $0x1c8] sm:$0xff] }
 0x125   : > { %v913_v27 = vmax.f32 %v879_v22, 0.0  ;;  %v8285_v20 = vld [vmem:[%s12919_s9 + $0x1c0] sm:$0xff]  ;;  %v8287_v22 = vld [vmem:[%s12919_s9 + $0x1d0] sm:$0xff]  ;;  %v8290_v23 = vld [vmem:[%s12919_s9 + $0x1e8] sm:$0xff] }
 0x126   : > { %v912_v28 = vmax.f32 %v874_v26, 0.0  ;;  %10381 = vmatprep.subr.bf16.mxu1 %v11213_v24  ;;  %10445 = vmatprep.subr.bf16.mxu0 %v11213_v24  ;;  %v8292_v26 = vld [vmem:[%s12919_s9 + $0x1f8] sm:$0xff] }
 0x127   : > { %10383 = vmatpush3.bf16.msra.mxu1 %v11157_v25  ;;  %10447 = vmatpush3.bf16.msra.mxu0 %v11157_v25 }
 0x128   : > { %v11220_v29 = vpack.c.bf16 %v913_v27, %v912_v28  ;;  %v8291_v27 = vld [vmem:[%s12919_s9 + $0x1f0] sm:$0xff]  ;;  %v1425_v28 = vld [vmem:[%s12913_s3] sm:$0xff] }
 0x12a   : > { %10385 = vmatprep.subr.bf16.mxu1 %v11220_v29  ;;  %10449 = vmatprep.subr.bf16.mxu0 %v11220_v29 }
 0x12b   : > { %10387 = vmatpush3.bf16.msra.mxu1 %v11161_v32  ;;  %10451 = vmatpush3.bf16.msra.mxu0 %v11161_v32 }
 0x12c   : > { %10389 = vmatprep.subr.bf16.mxu1 %v11165_v40 }
 0x12e   : > { %995 = vmatmul.mubr.f32.vlgmr.msra.gmra.mrb[0].mxu1 %v914_v37  ;;  %1247 = vmatmul.mubr.f32.vlgmr.msra.gmra.mrb[32].mxu0 %v8261_v30 }
 0x12f   : > { %10391 = vmatpush3.bf16.msra.mxu1 %v11133_v47  ;;  %999 = vmatprep.mubr.f32.mxu1 %v917_v31 }
 0x130   : > { %10393 = vmatprep.subr.bf16.mxu1 %v11173_v48  ;;  %1251 = vmatprep.mubr.f32.mxu0 %v8264_v33 }
 0x132   : > { %1000 = vmatmul.mubr.f32.gmra.mrb[2].mxu1 %v916_v34  ;;  %1252 = vmatmul.mubr.f32.gmra.mrb[34].mxu0 %v8263_v35 }
 0x133   : > { %10395 = vmatpush3.bf16.msra.mxu1 %v11137_v54  ;;  %1004 = vmatprep.mubr.f32.mxu1 %v919_v36 }
 0x134   : > { %10397 = vmatprep.subr.bf16.mxu1 %v11181_v56  ;;  %1256 = vmatprep.mubr.f32.mxu0 %v8266_v38 }
 0x136   : > { %1005 = vmatmul.mubr.f32.gmra.mrb[4].mxu1 %v918_v39  ;;  %1257 = vmatmul.mubr.f32.gmra.mrb[36].mxu0 %v8265_v41 }
 0x137   : > { %10399 = vmatpush3.bf16.msra.mxu1 %v11141_v61  ;;  %1009 = vmatprep.mubr.f32.mxu1 %v921_v42 }
 0x138   : > { %10401 = vmatprep.subr.bf16.mxu1 %v11189_v0  ;;  %1261 = vmatprep.mubr.f32.mxu0 %v8268_v43 }
 0x13a   : > { %1010 = vmatmul.mubr.f32.gmra.mrb[6].mxu1 %v920_v44  ;;  %1262 = vmatmul.mubr.f32.gmra.mrb[38].mxu0 %v8267_v45 }
 0x13b   : > { %10403 = vmatpush3.bf16.msra.mxu1 %v11145_v4  ;;  %1014 = vmatprep.mubr.f32.mxu1 %v923_v46 }
 0x13c   : > { %10405 = vmatprep.subr.bf16.mxu1 %v11197_v8  ;;  %1266 = vmatprep.mubr.f32.mxu0 %v8270_v49 }
 0x13e   : > { %1015 = vmatmul.mubr.f32.gmra.mrb[8].mxu1 %v922_v50  ;;  %1267 = vmatmul.mubr.f32.gmra.mrb[40].mxu0 %v8269_v51 }
 0x13f   : > { %10407 = vmatpush3.bf16.msra.mxu1 %v11149_v11  ;;  %1019 = vmatprep.mubr.f32.mxu1 %v925_v52 }
 0x140   : > { %10409 = vmatprep.subr.bf16.mxu1 %v11205_v16  ;;  %1271 = vmatprep.mubr.f32.mxu0 %v8272_v53 }
 0x142   : > { %1020 = vmatmul.mubr.f32.gmra.mrb[10].mxu1 %v924_v55  ;;  %1272 = vmatmul.mubr.f32.gmra.mrb[42].mxu0 %v8271_v57 }
 0x143   : > { %10411 = vmatpush3.bf16.msra.mxu1 %v11153_v18  ;;  %1024 = vmatprep.mubr.f32.mxu1 %v927_v58 }
 0x144   : > { %10413 = vmatprep.subr.bf16.mxu1 %v11213_v24  ;;  %1276 = vmatprep.mubr.f32.mxu0 %v8274_v59 }
 0x146   : > { %1025 = vmatmul.mubr.f32.gmra.mrb[12].mxu1 %v926_v60  ;;  %1277 = vmatmul.mubr.f32.gmra.mrb[44].mxu0 %v8273_v62 }
 0x147   : > { %10415 = vmatpush3.bf16.msra.mxu1 %v11157_v25  ;;  %1029 = vmatprep.mubr.f32.mxu1 %v929_v63 }
 0x148   : > { %10417 = vmatprep.subr.bf16.mxu1 %v11220_v29  ;;  %1281 = vmatprep.mubr.f32.mxu0 %v8276_v1 }
 0x14a   : > { %1030 = vmatmul.mubr.f32.gmra.mrb[14].mxu1 %v928_v2  ;;  %1282 = vmatmul.mubr.f32.gmra.mrb[46].mxu0 %v8275_v3 }
 0x14b   : > { %10419 = vmatpush3.bf16.msra.mxu1 %v11161_v32  ;;  %1116 = vmatprep.mubr.f32.mxu1 %v8246_v5 }
 0x14c   : > { %10453 = vmatprep.subr.bf16.mxu1 %v11165_v40  ;;  %v8249_v40 = vld [vmem:[%s12919_s9 + $0xa0] sm:$0xff]  ;;  %9733 = vmatprep.mubr.msk.f32.mxu0 %vm1433_vm1, %v1425_v28 }
 0x14e   : > { %1117 = vmatmul.mubr.f32.vlgmr.msra.gmra.mrb[16].mxu1 %v8245_v6 }
 0x14f   : > { %10455 = vmatpush3.bf16.msra.mxu1 %v11133_v47  ;;  %1121 = vmatprep.mubr.f32.mxu1 %v8248_v7  ;;  %v8252_v47 = vld [vmem:[%s12919_s9 + $0xb8] sm:$0xff] }
 0x150   : > { %10457 = vmatprep.subr.bf16.mxu1 %v11173_v48  ;;  %v8251_v48 = vld [vmem:[%s12919_s9 + $0xb0] sm:$0xff] }
 0x152   : > { %1122 = vmatmul.mubr.f32.gmra.mrb[18].mxu1 %v8247_v9 }
 0x153   : > { %10459 = vmatpush3.bf16.msra.mxu1 %v11137_v54  ;;  %1126 = vmatprep.mubr.f32.mxu1 %v8250_v10  ;;  %v8254_v54 = vld [vmem:[%s12919_s9 + $0xc8] sm:$0xff] }
 0x154   : > { %10461 = vmatprep.subr.bf16.mxu1 %v11181_v56  ;;  %v8253_v56 = vld [vmem:[%s12919_s9 + $0xc0] sm:$0xff] }
 0x156   : > { %1127 = vmatmul.mubr.f32.gmra.mrb[20].mxu1 %v8249_v40 }
 0x157   : > { %10463 = vmatpush3.bf16.msra.mxu1 %v11141_v61  ;;  %1131 = vmatprep.mubr.f32.mxu1 %v8252_v47  ;;  %v8256_v61 = vld [vmem:[%s12919_s9 + $0xd8] sm:$0xff] }
 0x158   : > { %10465 = vmatprep.subr.bf16.mxu1 %v11189_v0  ;;  %v8255_v0 = vld [vmem:[%s12919_s9 + $0xd0] sm:$0xff] }
 0x15a   : > { %1132 = vmatmul.mubr.f32.gmra.mrb[22].mxu1 %v8251_v48 }
 0x15b   : > { %10467 = vmatpush3.bf16.msra.mxu1 %v11145_v4  ;;  %1136 = vmatprep.mubr.f32.mxu1 %v8254_v54  ;;  %v8258_v4 = vld [vmem:[%s12919_s9 + $0xe8] sm:$0xff] }
 0x15c   : > { %10469 = vmatprep.subr.bf16.mxu1 %v11197_v8  ;;  %v8257_v8 = vld [vmem:[%s12919_s9 + $0xe0] sm:$0xff] }
 0x15e   : > { %1137 = vmatmul.mubr.f32.gmra.mrb[24].mxu1 %v8253_v56 }
 0x15f   : > { %10471 = vmatpush3.bf16.msra.mxu1 %v11149_v11  ;;  %1141 = vmatprep.mubr.f32.mxu1 %v8256_v61  ;;  %v8260_v11 = vld [vmem:[%s12919_s9 + $0xf8] sm:$0xff] }
 0x160   : > { %10473 = vmatprep.subr.bf16.mxu1 %v11205_v16  ;;  %v8284_v16 = vld [vmem:[%s12919_s9 + $0x1b8] sm:$0xff] }
 0x162   : > { %1142 = vmatmul.mubr.f32.gmra.mrb[26].mxu1 %v8255_v0 }
 0x163   : > { %10475 = vmatpush3.bf16.msra.mxu1 %v11153_v18  ;;  %1146 = vmatprep.mubr.f32.mxu1 %v8258_v4  ;;  %v8278_v18 = vld [vmem:[%s12919_s9 + $0x188] sm:$0xff] }
 0x164   : > { %10477 = vmatprep.subr.bf16.mxu1 %v11213_v24  ;;  %v8289_v24 = vld [vmem:[%s12919_s9 + $0x1e0] sm:$0xff] }
 0x166   : > { %1147 = vmatmul.mubr.f32.gmra.mrb[28].mxu1 %v8257_v8 }
 0x167   : > { %10479 = vmatpush3.bf16.msra.mxu1 %v11157_v25  ;;  %1151 = vmatprep.mubr.f32.mxu1 %v8260_v11  ;;  %v8280_v25 = vld [vmem:[%s12919_s9 + $0x198] sm:$0xff] }
 0x168   : > { %10481 = vmatprep.subr.bf16.mxu1 %v11220_v29 }
 0x16a   : > { %1152 = vmatmul.mubr.f32.gmra.mrb[30].mxu1 %v8259_v12 }
 0x16b   : > { %10483 = vmatpush3.bf16.msra.mxu1 %v11161_v32  ;;  %1376 = vmatprep.mubr.f32.mxu1 %v8278_v18  ;;  %v8281_v32 = vld [vmem:[%s12919_s9 + $0x1a0] sm:$0xff] }
 0x16e   : > { %1377 = vmatmul.mubr.f32.vlgmr.msra.gmra.mrb[32].mxu1 %v8277_v13 }
 0x16f   : > { %1381 = vmatprep.mubr.f32.mxu1 %v8280_v25 }
 0x172   : > { %1382 = vmatmul.mubr.f32.gmra.mrb[34].mxu1 %v8279_v14 }
 0x173   : > { %1386 = vmatprep.mubr.f32.mxu1 %v8282_v15 }
 0x176   : > { %1387 = vmatmul.mubr.f32.gmra.mrb[36].mxu1 %v8281_v32 }
 0x177   : > { %1391 = vmatprep.mubr.f32.mxu1 %v8284_v16 }
 0x17a   : > { %1392 = vmatmul.mubr.f32.gmra.mrb[38].mxu1 %v8283_v17 }
 0x17b   : > { %1396 = vmatprep.mubr.f32.mxu1 %v8286_v19 }
 0x17e   : > { %1397 = vmatmul.mubr.f32.gmra.mrb[40].mxu1 %v8285_v20 }
 0x17f   : > { %1401 = vmatprep.mubr.f32.mxu1 %v8288_v21 }
 0x182   : > { %1402 = vmatmul.mubr.f32.gmra.mrb[42].mxu1 %v8287_v22 }
 0x183   : > { %1406 = vmatprep.mubr.f32.mxu1 %v8290_v23 }
 0x186   : > { %1407 = vmatmul.mubr.f32.gmra.mrb[44].mxu1 %v8289_v24 }
 0x187   : > { %1411 = vmatprep.mubr.f32.mxu1 %v8292_v26 }
 0x18a   : > { %1412 = vmatmul.mubr.f32.gmra.mrb[46].mxu1 %v8291_v27 }
 0x201   : > { %v9054_v29 = vpop.f32.mrb[0].mxu1  ;;  %v9166_v37 = vpop.f32.mrb[32].mxu0 }
 0x202   : > { %v9055_v30 = vpop.f32.mrb[1].mxu1  ;;  %v9167_v31 = vpop.f32.mrb[33].mxu0 }
 0x203   : > { %v9056_v33 = vadd.f32 %v9055_v30, %v9054_v29  ;;  %v9168_v34 = vadd.f32 %v9167_v31, %v9166_v37 }
 0x205   : > { %v9057_v35 = vpop.f32.mrb[2].mxu1  ;;  %v9169_v36 = vpop.f32.mrb[34].mxu0 }
 0x206   : > { %v9058_v38 = vpop.f32.mrb[3].mxu1  ;;  %v9170_v39 = vpop.f32.mrb[35].mxu0 }
 0x207   : > { %v9059_v41 = vadd.f32 %v9058_v38, %v9057_v35  ;;  %v9171_v42 = vadd.f32 %v9170_v39, %v9169_v36 }
 0x209   : > { %v9060_v43 = vpop.f32.mrb[4].mxu1  ;;  %v9172_v44 = vpop.f32.mrb[36].mxu0 }
 0x20a   : > { %v9061_v45 = vpop.f32.mrb[5].mxu1  ;;  %v9173_v46 = vpop.f32.mrb[37].mxu0 }
 0x20b   : > { %v9062_v49 = vadd.f32 %v9061_v45, %v9060_v43  ;;  %v9174_v50 = vadd.f32 %v9173_v46, %v9172_v44 }
 0x20d   : > { %v9063_v51 = vpop.f32.mrb[6].mxu1  ;;  %v9175_v52 = vpop.f32.mrb[38].mxu0 }
 0x20e   : > { %v9064_v53 = vpop.f32.mrb[7].mxu1  ;;  %v9176_v55 = vpop.f32.mrb[39].mxu0 }
 0x20f   : > { %v9065_v57 = vadd.f32 %v9064_v53, %v9063_v51  ;;  %v9177_v58 = vadd.f32 %v9176_v55, %v9175_v52 }
 0x211   : > { %v9066_v59 = vpop.f32.mrb[8].mxu1  ;;  %v9178_v60 = vpop.f32.mrb[40].mxu0 }
 0x212   : > { %v9067_v62 = vpop.f32.mrb[9].mxu1  ;;  %v9179_v63 = vpop.f32.mrb[41].mxu0 }
 0x213   : > { %v9068_v1 = vadd.f32 %v9067_v62, %v9066_v59  ;;  %v9180_v2 = vadd.f32 %v9179_v63, %v9178_v60 }
 0x215   : > { %v9069_v3 = vpop.f32.mrb[10].mxu1  ;;  %v9181_v5 = vpop.f32.mrb[42].mxu0 }
 0x216   : > { %v9070_v6 = vpop.f32.mrb[11].mxu1  ;;  %v9182_v7 = vpop.f32.mrb[43].mxu0 }
 0x217   : > { %v9071_v9 = vadd.f32 %v9070_v6, %v9069_v3  ;;  %v9183_v10 = vadd.f32 %v9182_v7, %v9181_v5 }
 0x219   : > { %v9072_v40 = vpop.f32.mrb[12].mxu1  ;;  %v9184_v47 = vpop.f32.mrb[44].mxu0 }
 0x21a   : > { %v9073_v48 = vpop.f32.mrb[13].mxu1  ;;  %v9185_v54 = vpop.f32.mrb[45].mxu0 }
 0x21b   : > { %v9074_v56 = vadd.f32 %v9073_v48, %v9072_v40  ;;  %v9186_v61 = vadd.f32 %v9185_v54, %v9184_v47 }
 0x21d   : > { %v9075_v0 = vpop.f32.mrb[14].mxu1  ;;  %v9187_v4 = vpop.f32.mrb[46].mxu0 }
 0x21e   : > { %v9076_v8 = vpop.f32.mrb[15].mxu1  ;;  %v9188_v11 = vpop.f32.mrb[47].mxu0 }
 0x21f   : > { %v9077_v12 = vadd.f32 %v9076_v8, %v9075_v0  ;;  %v9189_v18 = vadd.f32 %v9188_v11, %v9187_v4 }
 0x221   : > { %v9110_v13 = vpop.f32.mrb[16].mxu1 }
 0x222   : > { %v9111_v25 = vpop.f32.mrb[17].mxu1 }
 0x223   : > { %v9112_v14 = vadd.f32 %v9111_v25, %v9110_v13 }
 0x225   : > { %v1157_v15 = vmax.f32 %v9056_v33, %v9112_v14  ;;  %v9113_v32 = vpop.f32.mrb[18].mxu1 }
 0x226   : > { %v9114_v16 = vpop.f32.mrb[19].mxu1 }
 0x227   : > { %v1287_v17 = vmax.f32 %v1157_v15, %v9168_v34  ;;  %v9115_v19 = vadd.f32 %v9114_v16, %v9113_v32 }
 0x229   : > { %v1158_v20 = vmax.f32 %v9059_v41, %v9115_v19  ;;  %v9116_v21 = vpop.f32.mrb[20].mxu1 }
 0x22a   : > { %v9117_v22 = vpop.f32.mrb[21].mxu1 }
 0x22b   : > { %v1288_v23 = vmax.f32 %v1158_v20, %v9171_v42  ;;  %v9118_v24 = vadd.f32 %v9117_v22, %v9116_v21 }
 0x22d   : > { %v1159_v26 = vmax.f32 %v9062_v49, %v9118_v24  ;;  %v9119_v27 = vpop.f32.mrb[22].mxu1  ;;  %v1426_v24 = vld [vmem:[%s12913_s3 + $0x8] sm:$0xff] }
 0x22e   : > { %v9120_v28 = vpop.f32.mrb[23].mxu1 }
 0x22f   : > { %v1289_v29 = vmax.f32 %v1159_v26, %v9174_v50  ;;  %v9121_v37 = vadd.f32 %v9120_v28, %v9119_v27  ;;  %v1427_v26 = vld [vmem:[%s12913_s3 + $0x10] sm:$0xff]  ;;  %v1428_v27 = vld [vmem:[%s12913_s3 + $0x18] sm:$0xff]  ;;  %v1429_v28 = vld [vmem:[%s12913_s3 + $0x20] sm:$0xff] }
 0x231   : > { %v1160_v30 = vmax.f32 %v9065_v57, %v9121_v37  ;;  %v9122_v31 = vpop.f32.mrb[24].mxu1  ;;  %v1431_v37 = vld [vmem:[%s12913_s3 + $0x30] sm:$0xff] }
 0x232   : > { %v9123_v35 = vpop.f32.mrb[25].mxu1 }
 0x233   : > { %v1290_v36 = vmax.f32 %v1160_v30, %v9177_v58  ;;  %v9124_v38 = vadd.f32 %v9123_v35, %v9122_v31  ;;  %v1432_v30 = vld [vmem:[%s12913_s3 + $0x38] sm:$0xff]  ;;  %v8301_v31 = vld [vmem:[%s12913_s3 + $0x40] sm:$0xff]  ;;  %v10817_v35 = vld [vmem:[%s12914_s4 + $0x10] sm:$0xff]  }
 0x234   : > { %9773 = vmatprep.subr.bf16.mxu1 %v10817_v35 }
 0x235   : > { %v1161_v33 = vmax.f32 %v9068_v1, %v9124_v38  ;;  %v9125_v39 = vpop.f32.mrb[26].mxu1  ;;  %v8303_v38 = vld [vmem:[%s12913_s3 + $0x50] sm:$0xff]  ;;  %9774 = vmatpush3.bf16.msra.mxu1 %v10817_v35 }
 0x236   : > { %v9126_v43 = vpop.f32.mrb[27].mxu1  ;;  %v8495_v35 = vld [vmem:[%s12913_s3 + $0x230] sm:$0xff] }
 0x237   : > { %v1291_v34 = vmax.f32 %v1161_v33, %v9180_v2  ;;  %v9127_v44 = vadd.f32 %v9126_v43, %v9125_v39  ;;  %v8304_v33 = vld [vmem:[%s12913_s3 + $0x58] sm:$0xff]  ;;  %v8305_v39 = vld [vmem:[%s12913_s3 + $0x60] sm:$0xff]  ;;  %v8306_v43 = vld [vmem:[%s12913_s3 + $0x68] sm:$0xff] }
 0x239   : > { %v1162_v41 = vmax.f32 %v9071_v9, %v9127_v44  ;;  %v9128_v45 = vpop.f32.mrb[28].mxu1  ;;  %v8308_v44 = vld [vmem:[%s12913_s3 + $0x78] sm:$0xff] }
 0x23a   : > { %v9129_v46 = vpop.f32.mrb[29].mxu1 }
 0x23b   : > { %v1292_v42 = vmax.f32 %v1162_v41, %v9183_v10  ;;  %v9130_v51 = vadd.f32 %v9129_v46, %v9128_v45  ;;  %v8333_v41 = vld [vmem:[%s12913_s3 + $0x80] sm:$0xff]  ;;  %v8334_v45 = vld [vmem:[%s12913_s3 + $0x88] sm:$0xff]  ;;  %v8335_v46 = vld [vmem:[%s12913_s3 + $0x90] sm:$0xff] }
 0x23d   : > { %v1163_v49 = vmax.f32 %v9074_v56, %v9130_v51  ;;  %v9131_v52 = vpop.f32.mrb[30].mxu1  ;;  %v8337_v51 = vld [vmem:[%s12913_s3 + $0xa0] sm:$0xff] }
 0x23e   : > { %v9132_v53 = vpop.f32.mrb[31].mxu1 }
 0x23f   : > { %v1293_v50 = vmax.f32 %v1163_v49, %v9186_v61  ;;  %v9133_v55 = vadd.f32 %v9132_v53, %v9131_v52  ;;  %v8338_v49 = vld [vmem:[%s12913_s3 + $0xa8] sm:$0xff]  ;;  %v8339_v52 = vld [vmem:[%s12913_s3 + $0xb0] sm:$0xff]  ;;  %v8340_v53 = vld [vmem:[%s12913_s3 + $0xb8] sm:$0xff] }
 0x241   : > { %v1164_v57 = vmax.f32 %v9077_v12, %v9133_v55  ;;  %v9222_v59 = vpop.f32.mrb[32].mxu1  ;;  %v8360_v55 = vld [vmem:[%s12913_s3 + $0xc8] sm:$0xff] }
 0x242   : > { %v9223_v60 = vpop.f32.mrb[33].mxu1 }
 0x243   : > { %v1294_v58 = vmax.f32 %v1164_v57, %v9189_v18  ;;  %v9224_v62 = vadd.f32 %v9223_v60, %v9222_v59  ;;  %v8361_v57 = vld [vmem:[%s12913_s3 + $0xd0] sm:$0xff]  ;;  %v8362_v59 = vld [vmem:[%s12913_s3 + $0xd8] sm:$0xff]  ;;  %v8363_v60 = vld [vmem:[%s12913_s3 + $0xe0] sm:$0xff] }
 0x245   : > { %v1417_v63 = vmax.f32 %v1287_v17, %v9224_v62  ;;  %v9225_v1 = vpop.f32.mrb[34].mxu1  ;;  %v8365_v62 = vld [vmem:[%s12913_s3 + $0xf0] sm:$0xff] }
 0x246   : > { %v9226_v3 = vpop.f32.mrb[35].mxu1 }
 0x247   : > { %v9227_v2 = vadd.f32 %v9226_v3, %v9225_v1  ;;  %v8385_v1 = vld [vmem:[%s12913_s3 + $0x100] sm:$0xff]  ;;  %v8386_v3 = vld [vmem:[%s12913_s3 + $0x108] sm:$0xff] }
 0x249   : > { %v1418_v5 = vmax.f32 %v1288_v23, %v9227_v2  ;;  %v9228_v6 = vpop.f32.mrb[36].mxu1  ;;  %v8387_v2 = vld [vmem:[%s12913_s3 + $0x110] sm:$0xff] }
 0x24a   : > { %v9229_v7 = vpop.f32.mrb[37].mxu1 }
 0x24b   : > { %v11448_v9 = vpack.c.bf16 %v1418_v5, %v1417_v63  ;;  %v9230_v10 = vadd.f32 %v9229_v7, %v9228_v6  ;;  %v8366_v63 = vld [vmem:[%s12913_s3 + $0xf8] sm:$0xff]  ;;  %v8389_v6 = vld [vmem:[%s12913_s3 + $0x120] sm:$0xff]  ;;  %v8390_v7 = vld [vmem:[%s12913_s3 + $0x128] sm:$0xff] }
 0x24c   : > { %v8388_v5 = vld [vmem:[%s12913_s3 + $0x118] sm:$0xff] }
 0x24d   : > { %v1419_v40 = vmax.f32 %v1289_v29, %v9230_v10  ;;  %v9231_v47 = vpop.f32.mrb[38].mxu1  ;;  %10485 = vmatprep.subr.bf16.mxu0 %v11448_v9  ;;  %v1430_v29 = vld [vmem:[%s12913_s3 + $0x28] sm:$0xff]  ;;  %v8391_v10 = vld [vmem:[%s12913_s3 + $0x130] sm:$0xff] }
 0x24e   : > { %v9232_v48 = vpop.f32.mrb[39].mxu1  ;;  %10487 = vmatpush3.bf16.msra.mxu0 %v11448_v9 }
 0x24f   : > { %v9233_v54 = vadd.f32 %v9232_v48, %v9231_v47  ;;  %v8411_v47 = vld [vmem:[%s12913_s3 + $0x140] sm:$0xff]  ;;  %v8412_v48 = vld [vmem:[%s12913_s3 + $0x148] sm:$0xff] }
 0x251   : > { %v1420_v56 = vmax.f32 %v1290_v36, %v9233_v54  ;;  %v9234_v61 = vpop.f32.mrb[40].mxu1  ;;  %v8302_v36 = vld [vmem:[%s12913_s3 + $0x48] sm:$0xff]  ;;  %v8413_v54 = vld [vmem:[%s12913_s3 + $0x150] sm:$0xff] }
 0x252   : > { %v9235_v0 = vpop.f32.mrb[41].mxu1 }
 0x253   : > { %v11452_v4 = vpack.c.bf16 %v1420_v56, %v1419_v40  ;;  %v9236_v8 = vadd.f32 %v9235_v0, %v9234_v61  ;;  %v8392_v40 = vld [vmem:[%s12913_s3 + $0x138] sm:$0xff]  ;;  %v8415_v61 = vld [vmem:[%s12913_s3 + $0x160] sm:$0xff]  ;;  %v8416_v0 = vld [vmem:[%s12913_s3 + $0x168] sm:$0xff] }
 0x254   : > { %v8414_v56 = vld [vmem:[%s12913_s3 + $0x158] sm:$0xff] }
 0x255   : > { %v1421_v11 = vmax.f32 %v1291_v34, %v9236_v8  ;;  %v9237_v12 = vpop.f32.mrb[42].mxu1  ;;  %10489 = vmatprep.subr.bf16.mxu0 %v11452_v4  ;;  %v8307_v34 = vld [vmem:[%s12913_s3 + $0x70] sm:$0xff] }
 0x256   : > { %v9238_v18 = vpop.f32.mrb[43].mxu1  ;;  %10491 = vmatpush3.bf16.msra.mxu0 %v11452_v4  ;;  %v8417_v8 = vld [vmem:[%s12913_s3 + $0x170] sm:$0xff] }
 0x257   : > { %v9239_v13 = vadd.f32 %v9238_v18, %v9237_v12  ;;  %v8437_v12 = vld [vmem:[%s12913_s3 + $0x180] sm:$0xff]  ;;  %v8438_v18 = vld [vmem:[%s12913_s3 + $0x188] sm:$0xff] }
 0x259   : > { %v1422_v25 = vmax.f32 %v1292_v42, %v9239_v13  ;;  %v9240_v14 = vpop.f32.mrb[44].mxu1  ;;  %v8336_v42 = vld [vmem:[%s12913_s3 + $0x98] sm:$0xff]  ;;  %v8439_v13 = vld [vmem:[%s12913_s3 + $0x190] sm:$0xff] }
 0x25a   : > { %v9241_v15 = vpop.f32.mrb[45].mxu1 }
 0x25b   : > { %v11456_v32 = vpack.c.bf16 %v1422_v25, %v1421_v11  ;;  %v9242_v16 = vadd.f32 %v9241_v15, %v9240_v14  ;;  %v8418_v11 = vld [vmem:[%s12913_s3 + $0x178] sm:$0xff]  ;;  %v8441_v15 = vld [vmem:[%s12913_s3 + $0x1a0] sm:$0xff] }
 0x25c   : > { %v10818_v25 = vld [vmem:[%s12914_s4 + $0x18] sm:$0xff]  }
 0x25d   : > { %v1423_v17 = vmax.f32 %v1293_v50, %v9242_v16  ;;  %v9243_v19 = vpop.f32.mrb[46].mxu1  ;;  %10493 = vmatprep.subr.bf16.mxu0 %v11456_v32  ;;  %v8359_v50 = vld [vmem:[%s12913_s3 + $0xc0] sm:$0xff]  ;;  %v8440_v14 = vld [vmem:[%s12913_s3 + $0x198] sm:$0xff]  ;;  %9775 = vmatprep.subr.bf16.mxu1 %v10818_v25  ;;  %v8442_v16 = vld [vmem:[%s12913_s3 + $0x1a8] sm:$0xff] }
 0x25e   : > { %v9244_v20 = vpop.f32.mrb[47].mxu1  ;;  %10495 = vmatpush3.bf16.msra.mxu0 %v11456_v32  ;;  %9776 = vmatpush3.bf16.msra.mxu1 %v10818_v25 }
 0x25f   : > { %v9245_v21 = vadd.f32 %v9244_v20, %v9243_v19  ;;  %v8444_v19 = vld [vmem:[%s12913_s3 + $0x1b8] sm:$0xff]  ;;  %v8463_v20 = vld [vmem:[%s12913_s3 + $0x1c0] sm:$0xff] }
 0x261   : > { %v1424_v22 = vmax.f32 %v1294_v58, %v9245_v21  ;;  %v8364_v58 = vld [vmem:[%s12913_s3 + $0xe8] sm:$0xff] }
 0x262   : > { %v8464_v21 = vld [vmem:[%s12913_s3 + $0x1c8] sm:$0xff] }
 0x263   : > { %v11460_v23 = vpack.c.bf16 %v1424_v22, %v1423_v17  ;;  %v8443_v17 = vld [vmem:[%s12913_s3 + $0x1b0] sm:$0xff] }
 0x264   : > { %v8465_v22 = vld [vmem:[%s12913_s3 + $0x1d0] sm:$0xff] }
 0x265   : > { %10497 = vmatprep.subr.bf16.mxu0 %v11460_v23 }
 0x266   : > { %10499 = vmatpush3.bf16.msra.mxu0 %v11460_v23 }
 0x267   : > { %10501 = vmatprep.subr.bf16.mxu0 %v11448_v9 }
 0x269   : > { %9734 = vmatmul.mubr.msk.f32.vlgmr.msra.gmra.mrb[48].mxu0 %vm1433_vm1, %v1426_v24  ;;  %v10819_v24 = vld [vmem:[%s12914_s4] sm:$0xff]  }
 0x26a   : > { %10503 = vmatpush3.bf16.msra.mxu0 %v11448_v9  ;;  %9736 = vmatprep.mubr.msk.f32.mxu0 %vm1433_vm1, %v1427_v26  ;;  %v8466_v26 = vld [vmem:[%s12913_s3 + $0x1d8] sm:$0xff] }
 0x26b   : > { %10505 = vmatprep.subr.bf16.mxu0 %v11452_v4  ;;  %9785 = vmatprep.subr.bf16.mxu1 %v10819_v24 }
 0x26d   : > { %9737 = vmatmul.mubr.msk.f32.gmra.mrb[50].mxu0 %vm1433_vm1, %v1428_v27  ;;  %v8467_v27 = vld [vmem:[%s12913_s3 + $0x1e0] sm:$0xff] }
 0x26e   : > { %10507 = vmatpush3.bf16.msra.mxu0 %v11452_v4  ;;  %9739 = vmatprep.mubr.msk.f32.mxu0 %vm1433_vm1, %v1429_v28  ;;  %v8469_v28 = vld [vmem:[%s12913_s3 + $0x1f0] sm:$0xff] }
 0x26f   : > { %10509 = vmatprep.subr.bf16.mxu0 %v11456_v32 }
 0x271   : > { %9740 = vmatmul.mubr.msk.f32.gmra.mrb[52].mxu0 %vm1433_vm1, %v1430_v29  ;;  %v8489_v29 = vld [vmem:[%s12913_s3 + $0x200] sm:$0xff] }
 0x272   : > { %10511 = vmatpush3.bf16.msra.mxu0 %v11456_v32  ;;  %9742 = vmatprep.mubr.msk.f32.mxu0 %vm1433_vm1, %v1431_v37  ;;  %v8491_v37 = vld [vmem:[%s12913_s3 + $0x210] sm:$0xff] }
 0x273   : > { %10513 = vmatprep.subr.bf16.mxu0 %v11460_v23 }
 0x275   : > { %9743 = vmatmul.mubr.msk.f32.gmra.mrb[54].mxu0 %vm1433_vm1, %v1432_v30  ;;  %v8492_v30 = vld [vmem:[%s12913_s3 + $0x218] sm:$0xff] }
 0x276   : > { %10515 = vmatpush3.bf16.msra.mxu0 %v11460_v23  ;;  %9761 = vmatprep.mubr.msk.f32.mxu0 %vm1433_vm1, %v8301_v31  ;;  %v8494_v31 = vld [vmem:[%s12913_s3 + $0x228] sm:$0xff] }
 0x277   : > { %10517 = vmatprep.subr.bf16.mxu0 %v11448_v9 }
 0x279   : > { %9762 = vmatmul.mubr.msk.f32.vlgmr.msra.gmra.mrb[56].mxu0 %vm1433_vm1, %v8302_v36  ;;  %v8496_v36 = vld [vmem:[%s12913_s3 + $0x238] sm:$0xff] }
 0x27a   : > { %10519 = vmatpush3.bf16.msra.mxu0 %v11448_v9  ;;  %9764 = vmatprep.mubr.msk.f32.mxu0 %vm1433_vm1, %v8303_v38 }
 0x27b   : > { %10521 = vmatprep.subr.bf16.mxu0 %v11452_v4 }
 0x27d   : > { %9765 = vmatmul.mubr.msk.f32.gmra.mrb[58].mxu0 %vm1433_vm1, %v8304_v33 }
 0x27e   : > { %10523 = vmatpush3.bf16.msra.mxu0 %v11452_v4  ;;  %9767 = vmatprep.mubr.msk.f32.mxu0 %vm1433_vm1, %v8305_v39 }
 0x27f   : > { %10525 = vmatprep.subr.bf16.mxu0 %v11456_v32 }
 0x281   : > { %9768 = vmatmul.mubr.msk.f32.gmra.mrb[60].mxu0 %vm1433_vm1, %v8306_v43 }
 0x282   : > { %10527 = vmatpush3.bf16.msra.mxu0 %v11456_v32  ;;  %9770 = vmatprep.mubr.msk.f32.mxu0 %vm1433_vm1, %v8307_v34 }
 0x283   : > { %10529 = vmatprep.subr.bf16.mxu0 %v11460_v23 }
 0x285   : > { %9771 = vmatmul.mubr.msk.f32.gmra.mrb[62].mxu0 %vm1433_vm1, %v8308_v44 }
 0x286   : > { %10531 = vmatpush3.bf16.msra.mxu0 %v11460_v23  ;;  %9813 = vmatprep.mubr.msk.f32.mxu0 %vm1433_vm1, %v8333_v41 }
 0x287   : > { %10533 = vmatprep.subr.bf16.mxu0 %v11448_v9 }
 0x289   : > { %9814 = vmatmul.mubr.msk.f32.vlgmr.msra.gmra.mrb[64].mxu0 %vm1433_vm1, %v8334_v45 }
 0x28a   : > { %10535 = vmatpush3.bf16.msra.mxu0 %v11448_v9  ;;  %9816 = vmatprep.mubr.msk.f32.mxu0 %vm1433_vm1, %v8335_v46 }
 0x28b   : > { %10537 = vmatprep.subr.bf16.mxu0 %v11452_v4 }
 0x28d   : > { %9817 = vmatmul.mubr.msk.f32.gmra.mrb[66].mxu0 %vm1433_vm1, %v8336_v42 }
 0x28e   : > { %10539 = vmatpush3.bf16.msra.mxu0 %v11452_v4  ;;  %9819 = vmatprep.mubr.msk.f32.mxu0 %vm1433_vm1, %v8337_v51 }
 0x28f   : > { %10541 = vmatprep.subr.bf16.mxu0 %v11456_v32 }
 0x291   : > { %9820 = vmatmul.mubr.msk.f32.gmra.mrb[68].mxu0 %vm1433_vm1, %v8338_v49 }
 0x292   : > { %10543 = vmatpush3.bf16.msra.mxu0 %v11456_v32  ;;  %9822 = vmatprep.mubr.msk.f32.mxu0 %vm1433_vm1, %v8339_v52 }
 0x293   : > { %10545 = vmatprep.subr.bf16.mxu0 %v11460_v23 }
 0x295   : > { %9823 = vmatmul.mubr.msk.f32.gmra.mrb[70].mxu0 %vm1433_vm1, %v8340_v53 }
 0x296   : > { %10547 = vmatpush3.bf16.msra.mxu0 %v11460_v23  ;;  %9853 = vmatprep.mubr.msk.f32.mxu0 %vm1433_vm1, %v8359_v50 }
 0x297   : > { %10549 = vmatprep.subr.bf16.mxu0 %v11448_v9 }
 0x299   : > { %9854 = vmatmul.mubr.msk.f32.vlgmr.msra.gmra.mrb[72].mxu0 %vm1433_vm1, %v8360_v55 }
 0x29a   : > { %10551 = vmatpush3.bf16.msra.mxu0 %v11448_v9  ;;  %9856 = vmatprep.mubr.msk.f32.mxu0 %vm1433_vm1, %v8361_v57 }
 0x29b   : > { %10553 = vmatprep.subr.bf16.mxu0 %v11452_v4 }
 0x29d   : > { %9857 = vmatmul.mubr.msk.f32.gmra.mrb[74].mxu0 %vm1433_vm1, %v8362_v59 }
 0x29e   : > { %10555 = vmatpush3.bf16.msra.mxu0 %v11452_v4  ;;  %9859 = vmatprep.mubr.msk.f32.mxu0 %vm1433_vm1, %v8363_v60  ;;  %v10820_v60 = vld [vmem:[%s12914_s4 + $0x8] sm:$0xff]  }
 0x29f   : > { %10557 = vmatprep.subr.bf16.mxu0 %v11456_v32 }
 0x2a1   : > { %9860 = vmatmul.mubr.msk.f32.gmra.mrb[76].mxu0 %vm1433_vm1, %v8364_v58 }
 0x2a2   : > { %10559 = vmatpush3.bf16.msra.mxu0 %v11456_v32  ;;  %9862 = vmatprep.mubr.msk.f32.mxu0 %vm1433_vm1, %v8365_v62 }
 0x2a3   : > { %10561 = vmatprep.subr.bf16.mxu0 %v11460_v23 }
 0x2a5   : > { %9863 = vmatmul.mubr.msk.f32.gmra.mrb[78].mxu0 %vm1433_vm1, %v8366_v63 }
 0x2a6   : > { %10563 = vmatpush3.bf16.msra.mxu0 %v11460_v23  ;;  %9893 = vmatprep.mubr.msk.f32.mxu0 %vm1433_vm1, %v8385_v1  ;;  %v10821_v1 = vld [vmem:[%s12914_s4 + $0x20] sm:$0xff]  }
 0x2a7   : > { %10565 = vmatprep.subr.bf16.mxu0 %v11448_v9 }
 0x2a9   : > { %9894 = vmatmul.mubr.msk.f32.vlgmr.msra.gmra.mrb[80].mxu0 %vm1433_vm1, %v8386_v3 }
 0x2aa   : > { %10567 = vmatpush3.bf16.msra.mxu0 %v11448_v9  ;;  %9896 = vmatprep.mubr.msk.f32.mxu0 %vm1433_vm1, %v8387_v2 }
 0x2ab   : > { %10569 = vmatprep.subr.bf16.mxu0 %v11452_v4 }
 0x2ad   : > { %9897 = vmatmul.mubr.msk.f32.gmra.mrb[82].mxu0 %vm1433_vm1, %v8388_v5 }
 0x2ae   : > { %10571 = vmatpush3.bf16.msra.mxu0 %v11452_v4  ;;  %9899 = vmatprep.mubr.msk.f32.mxu0 %vm1433_vm1, %v8389_v6 }
 0x2af   : > { %10573 = vmatprep.subr.bf16.mxu0 %v11456_v32 }
 0x2b1   : > { %9900 = vmatmul.mubr.msk.f32.gmra.mrb[84].mxu0 %vm1433_vm1, %v8390_v7 }
 0x2b2   : > { %10575 = vmatpush3.bf16.msra.mxu0 %v11456_v32  ;;  %9902 = vmatprep.mubr.msk.f32.mxu0 %vm1433_vm1, %v8391_v10 }
 0x2b3   : > { %10577 = vmatprep.subr.bf16.mxu0 %v11460_v23 }
 0x2b5   : > { %9903 = vmatmul.mubr.msk.f32.gmra.mrb[86].mxu0 %vm1433_vm1, %v8392_v40 }
 0x2b6   : > { %10579 = vmatpush3.bf16.msra.mxu0 %v11460_v23  ;;  %9933 = vmatprep.mubr.msk.f32.mxu0 %vm1433_vm1, %v8411_v47 }
 0x2b7   : > { %10581 = vmatprep.subr.bf16.mxu0 %v11448_v9 }
 0x2b9   : > { %9934 = vmatmul.mubr.msk.f32.vlgmr.msra.gmra.mrb[88].mxu0 %vm1433_vm1, %v8412_v48 }
 0x2ba   : > { %10583 = vmatpush3.bf16.msra.mxu0 %v11448_v9  ;;  %9936 = vmatprep.mubr.msk.f32.mxu0 %vm1433_vm1, %v8413_v54  ;;  %v10822_v54 = vld [vmem:[%s12914_s4 + $0x28] sm:$0xff]  }
 0x2bb   : > { %10585 = vmatprep.subr.bf16.mxu0 %v11452_v4 }
 0x2bd   : > { %9937 = vmatmul.mubr.msk.f32.gmra.mrb[90].mxu0 %vm1433_vm1, %v8414_v56 }
 0x2be   : > { %10587 = vmatpush3.bf16.msra.mxu0 %v11452_v4  ;;  %9939 = vmatprep.mubr.msk.f32.mxu0 %vm1433_vm1, %v8415_v61 }
 0x2bf   : > { %10589 = vmatprep.subr.bf16.mxu0 %v11456_v32 }
 0x2c1   : > { %9940 = vmatmul.mubr.msk.f32.gmra.mrb[92].mxu0 %vm1433_vm1, %v8416_v0 }
 0x2c2   : > { %10591 = vmatpush3.bf16.msra.mxu0 %v11456_v32  ;;  %9942 = vmatprep.mubr.msk.f32.mxu0 %vm1433_vm1, %v8417_v8  ;;  %v10823_v8 = vld [vmem:[%s12914_s4 + $0x30] sm:$0xff]  }
 0x2c3   : > { %10593 = vmatprep.subr.bf16.mxu0 %v11460_v23 }
 0x2c5   : > { %9943 = vmatmul.mubr.msk.f32.gmra.mrb[94].mxu0 %vm1433_vm1, %v8418_v11 }
 0x2c6   : > { %10595 = vmatpush3.bf16.msra.mxu0 %v11460_v23  ;;  %9973 = vmatprep.mubr.msk.f32.mxu0 %vm1433_vm1, %v8437_v12 }
 0x2c7   : > { %10597 = vmatprep.subr.bf16.mxu0 %v11448_v9 }
 0x2c9   : > { %9974 = vmatmul.mubr.msk.f32.vlgmr.msra.gmra.mrb[96].mxu0 %vm1433_vm1, %v8438_v18 }
 0x2ca   : > { %10599 = vmatpush3.bf16.msra.mxu0 %v11448_v9  ;;  %9976 = vmatprep.mubr.msk.f32.mxu0 %vm1433_vm1, %v8439_v13 }
 0x2cb   : > { %10601 = vmatprep.subr.bf16.mxu0 %v11452_v4 }
 0x2cd   : > { %9977 = vmatmul.mubr.msk.f32.gmra.mrb[98].mxu0 %vm1433_vm1, %v8440_v14 }
 0x2ce   : > { %10603 = vmatpush3.bf16.msra.mxu0 %v11452_v4  ;;  %9979 = vmatprep.mubr.msk.f32.mxu0 %vm1433_vm1, %v8441_v15 }
 0x2cf   : > { %10605 = vmatprep.subr.bf16.mxu0 %v11456_v32 }
 0x2d1   : > { %9980 = vmatmul.mubr.msk.f32.gmra.mrb[100].mxu0 %vm1433_vm1, %v8442_v16 }
 0x2d2   : > { %10607 = vmatpush3.bf16.msra.mxu0 %v11456_v32  ;;  %9982 = vmatprep.mubr.msk.f32.mxu0 %vm1433_vm1, %v8443_v17 }
 0x2d3   : > { %10609 = vmatprep.subr.bf16.mxu0 %v11460_v23 }
 0x2d5   : > { %9983 = vmatmul.mubr.msk.f32.gmra.mrb[102].mxu0 %vm1433_vm1, %v8444_v19  ;;  %v10824_v19 = vld [vmem:[%s12914_s4 + $0x38] sm:$0xff]  }
 0x2d6   : > { %10611 = vmatpush3.bf16.msra.mxu0 %v11460_v23  ;;  %10013 = vmatprep.mubr.msk.f32.mxu0 %vm1433_vm1, %v8463_v20 }
 0x2d7   : > { %10613 = vmatprep.subr.bf16.mxu0 %v11448_v9 }
 0x2d9   : > { %10014 = vmatmul.mubr.msk.f32.vlgmr.msra.gmra.mrb[104].mxu0 %vm1433_vm1, %v8464_v21 }
 0x2da   : > { %10615 = vmatpush3.bf16.msra.mxu0 %v11448_v9  ;;  %10016 = vmatprep.mubr.msk.f32.mxu0 %vm1433_vm1, %v8465_v22  ;;  %v8468_v9 = vld [vmem:[%s12913_s3 + $0x1e8] sm:$0xff] }
 0x2db   : > { %10617 = vmatprep.subr.bf16.mxu0 %v11452_v4 }
 0x2dd   : > { %10017 = vmatmul.mubr.msk.f32.gmra.mrb[106].mxu0 %vm1433_vm1, %v8466_v26 }
 0x2de   : > { %10619 = vmatpush3.bf16.msra.mxu0 %v11452_v4  ;;  %10019 = vmatprep.mubr.msk.f32.mxu0 %vm1433_vm1, %v8467_v27  ;;  %v8470_v4 = vld [vmem:[%s12913_s3 + $0x1f8] sm:$0xff] }
 0x2df   : > { %10621 = vmatprep.subr.bf16.mxu0 %v11456_v32 }
 0x2e1   : > { %10020 = vmatmul.mubr.msk.f32.gmra.mrb[108].mxu0 %vm1433_vm1, %v8468_v9 }
 0x2e2   : > { %10623 = vmatpush3.bf16.msra.mxu0 %v11456_v32  ;;  %10022 = vmatprep.mubr.msk.f32.mxu0 %vm1433_vm1, %v8469_v28  ;;  %v8490_v32 = vld [vmem:[%s12913_s3 + $0x208] sm:$0xff] }
 0x2e3   : > { %10625 = vmatprep.subr.bf16.mxu0 %v11460_v23 }
 0x2e5   : > { %10023 = vmatmul.mubr.msk.f32.gmra.mrb[110].mxu0 %vm1433_vm1, %v8470_v4 }
 0x2e6   : > { %10627 = vmatpush3.bf16.msra.mxu0 %v11460_v23  ;;  %10053 = vmatprep.mubr.msk.f32.mxu0 %vm1433_vm1, %v8489_v29  ;;  %v8493_v23 = vld [vmem:[%s12913_s3 + $0x220] sm:$0xff] }
 0x2e9   : > { %10054 = vmatmul.mubr.msk.f32.vlgmr.msra.gmra.mrb[112].mxu0 %vm1433_vm1, %v8490_v32 }
 0x2ea   : > { %10056 = vmatprep.mubr.msk.f32.mxu0 %vm1433_vm1, %v8491_v37 }
 0x2ed   : > { %10057 = vmatmul.mubr.msk.f32.gmra.mrb[114].mxu0 %vm1433_vm1, %v8492_v30 }
 0x2ee   : > { %10059 = vmatprep.mubr.msk.f32.mxu0 %vm1433_vm1, %v8493_v23  ;;  %v10826_v23 = vld [vmem:[%s12914_s4 + $0x48] sm:$0xff]  }
 0x2f1   : > { %10060 = vmatmul.mubr.msk.f32.gmra.mrb[116].mxu0 %vm1433_vm1, %v8494_v31 }
 0x2f2   : > { %10062 = vmatprep.mubr.msk.f32.mxu0 %vm1433_vm1, %v8495_v35 }
 0x2f5   : > { %10063 = vmatmul.mubr.msk.f32.gmra.mrb[118].mxu0 %vm1433_vm1, %v8496_v36 }
 0x33c   : > { %v9735_v38 = vpop.f32.mrb[48].mxu0 }
 0x33d   : > { %v1524_v33 = vpop.f32.mrb[49].mxu0 }
 0x33e   : > { %v1563_v39 = vpack.c.bf16 %v9735_v38, %v1524_v33  ;;  %v10827_v38 = vld [vmem:[%s12914_s4 + $0x50] sm:$0xff]  }
 0x340   : > { %v9738_v43 = vpop.f32.mrb[50].mxu0 }
 0x341   : > { %v1534_v34 = vpop.f32.mrb[51].mxu0 }
 0x342   : > { %v1564_v44 = vpack.c.bf16 %v9738_v43, %v1534_v34 }
 0x344   : > { %v9741_v41 = vpop.f32.mrb[52].mxu0 }
 0x345   : > { %v1544_v45 = vpop.f32.mrb[53].mxu0 }
 0x346   : > { %v1565_v46 = vpack.c.bf16 %v9741_v41, %v1544_v45 }
 0x348   : > { %v9744_v42 = vpop.f32.mrb[54].mxu0 }
 0x349   : > { %v1554_v51 = vpop.f32.mrb[55].mxu0 }
 0x34a   : > { %v1566_v49 = vpack.c.bf16 %v9744_v42, %v1554_v51  ;;  %v10828_v51 = vld [vmem:[%s12914_s4 + $0x58] sm:$0xff]  }
 0x34c   : > { %v9763_v52 = vpop.f32.mrb[56].mxu0 }
 0x34d   : > { %v1670_v53 = vpop.f32.mrb[57].mxu0 }
 0x34e   : > { %v1709_v50 = vpack.c.bf16 %v9763_v52, %v1670_v53 }
 0x350   : > { %v9766_v55 = vpop.f32.mrb[58].mxu0  ;;  %9777 = vmatprep.mubr.msk.bf16.mxu1 %vm1730_vm2, %v1709_v50  ;;  %v10829_v50 = vld [vmem:[%s12914_s4 + $0x60] sm:$0xff]  }
 0x351   : > { %v1680_v57 = vpop.f32.mrb[59].mxu0 }
 0x352   : > { %v1710_v59 = vpack.c.bf16 %v9766_v55, %v1680_v57 }
 0x354   : > { %v9769_v58 = vpop.f32.mrb[60].mxu0  ;;  %9778 = vmatmul.mubr.msk.bf16.vlgmr.msra.gmra.mrb[48].mxu1 %vm1730_vm2, %v1710_v59 }
 0x355   : > { %v1690_v62 = vpop.f32.mrb[61].mxu0  ;;  %9786 = vmatpush3.bf16.msra.mxu1 %v10819_v24  ;;  %v10825_v24 = vld [vmem:[%s12914_s4 + $0x40] sm:$0xff]  }
 0x356   : > { %v1711_v63 = vpack.c.bf16 %v9769_v58, %v1690_v62  ;;  %9787 = vmatprep.subr.bf16.mxu1 %v10820_v60 }
 0x358   : > { %v9772_v3 = vpop.f32.mrb[62].mxu0  ;;  %9781 = vmatprep.mubr.msk.bf16.mxu1 %vm1730_vm2, %v1711_v63 }
 0x359   : > { %v1700_v2 = vpop.f32.mrb[63].mxu0  ;;  %9788 = vmatpush3.bf16.msra.mxu1 %v10820_v60 }
 0x35a   : > { %v1712_v5 = vpack.c.bf16 %v9772_v3, %v1700_v2  ;;  %9825 = vmatprep.subr.bf16.mxu1 %v10821_v1  ;;  %v10830_v2 = vld [vmem:[%s12914_s4 + $0x68] sm:$0xff]  }
 0x35c   : > { %9782 = vmatmul.mubr.msk.bf16.gmra.mrb[52].mxu1 %vm1730_vm2, %v1712_v5  ;;  %v9815_v6 = vpop.f32.mrb[64].mxu0 }
 0x35d   : > { %9789 = vmatprep.mubr.msk.bf16.mxu1 %vm1730_vm2, %v1563_v39  ;;  %v1996_v7 = vpop.f32.mrb[65].mxu0 }
 0x35e   : > { %v2035_v10 = vpack.c.bf16 %v9815_v6, %v1996_v7 }
 0x360   : > { %v9818_v40 = vpop.f32.mrb[66].mxu0 }
 0x361   : > { %v2006_v47 = vpop.f32.mrb[67].mxu0 }
 0x362   : > { %v2036_v48 = vpack.c.bf16 %v9818_v40, %v2006_v47 }
 0x364   : > { %9790 = vmatmul.mubr.msk.bf16.vlgmr.msra.gmra.mrb[48].mxu1 %vm1730_vm2, %v1564_v44  ;;  %v9821_v56 = vpop.f32.mrb[68].mxu0 }
 0x365   : > { %9793 = vmatprep.mubr.msk.bf16.mxu1 %vm1730_vm2, %v1565_v46  ;;  %9826 = vmatpush3.bf16.msra.mxu1 %v10821_v1  ;;  %v2016_v61 = vpop.f32.mrb[69].mxu0 }
 0x366   : > { %9827 = vmatprep.subr.bf16.mxu1 %v10822_v54  ;;  %v2037_v0 = vpack.c.bf16 %v9821_v56, %v2016_v61 }
 0x368   : > { %v9824_v11 = vpop.f32.mrb[70].mxu0 }
 0x369   : > { %9828 = vmatpush3.bf16.msra.mxu1 %v10822_v54  ;;  %v2026_v12 = vpop.f32.mrb[71].mxu0 }
 0x36a   : > { %v2038_v18 = vpack.c.bf16 %v9824_v11, %v2026_v12  ;;  %9865 = vmatprep.subr.bf16.mxu1 %v10823_v8  ;;  %v10832_v12 = vld [vmem:[%s12914_s4 + $0x78] sm:$0xff]  }
 0x36c   : > { %9794 = vmatmul.mubr.msk.bf16.gmra.mrb[52].mxu1 %vm1730_vm2, %v1566_v49  ;;  %v9855_v13 = vpop.f32.mrb[72].mxu0 }
 0x36d   : > { %9829 = vmatprep.mubr.msk.bf16.mxu1 %vm1730_vm2, %v2035_v10  ;;  %v2240_v25 = vpop.f32.mrb[73].mxu0  ;;  %v10831_v10 = vld [vmem:[%s12914_s4 + $0x70] sm:$0xff]  }
 0x36e   : > { %v2279_v14 = vpack.c.bf16 %v9855_v13, %v2240_v25 }
 0x370   : > { %v9858_v15 = vpop.f32.mrb[74].mxu0 }
 0x371   : > { %v2250_v16 = vpop.f32.mrb[75].mxu0 }
 0x372   : > { %v2280_v17 = vpack.c.bf16 %v9858_v15, %v2250_v16 }
 0x374   : > { %9830 = vmatmul.mubr.msk.bf16.vlgmr.msra.gmra.mrb[48].mxu1 %vm1730_vm2, %v2036_v48  ;;  %v9861_v20 = vpop.f32.mrb[76].mxu0 }
 0x375   : > { %9833 = vmatprep.mubr.msk.bf16.mxu1 %vm1730_vm2, %v2037_v0  ;;  %9866 = vmatpush3.bf16.msra.mxu1 %v10823_v8  ;;  %v2260_v21 = vpop.f32.mrb[77].mxu0 }
 0x376   : > { %9867 = vmatprep.subr.bf16.mxu1 %v10824_v19  ;;  %v2281_v22 = vpack.c.bf16 %v9861_v20, %v2260_v21 }
 0x378   : > { %v9864_v26 = vpop.f32.mrb[78].mxu0 }
 0x379   : > { %9868 = vmatpush3.bf16.msra.mxu1 %v10824_v19  ;;  %v2270_v27 = vpop.f32.mrb[79].mxu0 }
 0x37a   : > { %v2282_v9 = vpack.c.bf16 %v9864_v26, %v2270_v27  ;;  %9905 = vmatprep.subr.bf16.mxu1 %v10825_v24  ;;  %v10834_v27 = vld [vmem:[%s12914_s4 + $0x88] sm:$0xff]  }
 0x37c   : > { %9834 = vmatmul.mubr.msk.bf16.gmra.mrb[52].mxu1 %vm1730_vm2, %v2038_v18  ;;  %v9895_v28 = vpop.f32.mrb[80].mxu0 }
 0x37d   : > { %9869 = vmatprep.mubr.msk.bf16.mxu1 %vm1730_vm2, %v2279_v14  ;;  %v2484_v4 = vpop.f32.mrb[81].mxu0  ;;  %v10833_v14 = vld [vmem:[%s12914_s4 + $0x80] sm:$0xff]  }
 0x37e   : > { %v2523_v29 = vpack.c.bf16 %v9895_v28, %v2484_v4 }
 0x380   : > { %v9898_v32 = vpop.f32.mrb[82].mxu0 }
 0x381   : > { %v2494_v37 = vpop.f32.mrb[83].mxu0 }
 0x382   : > { %v2524_v30 = vpack.c.bf16 %v9898_v32, %v2494_v37 }
 0x384   : > { %9870 = vmatmul.mubr.msk.bf16.vlgmr.msra.gmra.mrb[48].mxu1 %vm1730_vm2, %v2280_v17  ;;  %v9901_v31 = vpop.f32.mrb[84].mxu0 }
 0x385   : > { %9873 = vmatprep.mubr.msk.bf16.mxu1 %vm1730_vm2, %v2281_v22  ;;  %9906 = vmatpush3.bf16.msra.mxu1 %v10825_v24  ;;  %v2504_v35 = vpop.f32.mrb[85].mxu0 }
 0x386   : > { %9907 = vmatprep.subr.bf16.mxu1 %v10826_v23  ;;  %v2525_v36 = vpack.c.bf16 %v9901_v31, %v2504_v35  ;;  %v8515_v31 = vld [vmem:[%s12915_s5] ss:$0 sm:$0xff] }
 0x388   : > { %v9904_v33 = vpop.f32.mrb[86].mxu0 }
 0x389   : > { %9908 = vmatpush3.bf16.msra.mxu1 %v10826_v23  ;;  %v2514_v39 = vpop.f32.mrb[87].mxu0  ;;  %v8522_v23 = vld [vmem:[%s12920_s10 + $0x20] sm:$0xff] }
 0x38a   : > { %v2526_v43 = vpack.c.bf16 %v9904_v33, %v2514_v39  ;;  %9945 = vmatprep.subr.bf16.mxu1 %v10827_v38 }
 0x38c   : > { %9874 = vmatmul.mubr.msk.bf16.gmra.mrb[52].mxu1 %vm1730_vm2, %v2282_v9  ;;  %v9935_v34 = vpop.f32.mrb[88].mxu0 }
 0x38d   : > { %9909 = vmatprep.mubr.msk.bf16.mxu1 %vm1730_vm2, %v2523_v29  ;;  %v2728_v44 = vpop.f32.mrb[89].mxu0 }
 0x38e   : > { %v2767_v41 = vpack.c.bf16 %v9935_v34, %v2728_v44 }
 0x390   : > { %v9938_v45 = vpop.f32.mrb[90].mxu0 }
 0x391   : > { %v2738_v46 = vpop.f32.mrb[91].mxu0 }
 0x392   : > { %v2768_v42 = vpack.c.bf16 %v9938_v45, %v2738_v46 }
 0x394   : > { %9910 = vmatmul.mubr.msk.bf16.vlgmr.msra.gmra.mrb[48].mxu1 %vm1730_vm2, %v2524_v30  ;;  %v9941_v49 = vpop.f32.mrb[92].mxu0  ;;  %v3628_v30 = vld [vmem:[%s12920_s10] sm:$0xff] }
 0x395   : > { %9913 = vmatprep.mubr.msk.bf16.mxu1 %vm1730_vm2, %v2525_v36  ;;  %9946 = vmatpush3.bf16.msra.mxu1 %v10827_v38  ;;  %v2748_v52 = vpop.f32.mrb[93].mxu0 }
 0x396   : > { %9947 = vmatprep.subr.bf16.mxu1 %v10828_v51  ;;  %v2769_v53 = vpack.c.bf16 %v9941_v49, %v2748_v52  ;;  %10093 = vmatprep.mubr.msk.f32.mxu0 %vm1433_vm1, %v3628_v30  ;;  %v10842_v30 = vld [vmem:[%s12917_s7 + $0x18] sm:$0xff]  }
 0x398   : > { %v9944_v55 = vpop.f32.mrb[94].mxu0 }
 0x399   : > { %9948 = vmatpush3.bf16.msra.mxu1 %v10828_v51  ;;  %v2758_v57 = vpop.f32.mrb[95].mxu0 }
 0x39a   : > { %v2770_v59 = vpack.c.bf16 %v9944_v55, %v2758_v57  ;;  %9985 = vmatprep.subr.bf16.mxu1 %v10829_v50 }
 0x39c   : > { %9914 = vmatmul.mubr.msk.bf16.gmra.mrb[52].mxu1 %vm1730_vm2, %v2526_v43  ;;  %v9975_v60 = vpop.f32.mrb[96].mxu0 }
 0x39d   : > { %9949 = vmatprep.mubr.msk.bf16.mxu1 %vm1730_vm2, %v2767_v41  ;;  %v2972_v58 = vpop.f32.mrb[97].mxu0 }
 0x39e   : > { %v3011_v62 = vpack.c.bf16 %v9975_v60, %v2972_v58 }
 0x3a0   : > { %v9978_v63 = vpop.f32.mrb[98].mxu0 }
 0x3a1   : > { %v2982_v1 = vpop.f32.mrb[99].mxu0 }
 0x3a2   : > { %v3012_v3 = vpack.c.bf16 %v9978_v63, %v2982_v1 }
 0x3a4   : > { %9950 = vmatmul.mubr.msk.bf16.vlgmr.msra.gmra.mrb[48].mxu1 %vm1730_vm2, %v2768_v42  ;;  %v9981_v5 = vpop.f32.mrb[100].mxu0 }
 0x3a5   : > { %9953 = vmatprep.mubr.msk.bf16.mxu1 %vm1730_vm2, %v2769_v53  ;;  %9986 = vmatpush3.bf16.msra.mxu1 %v10829_v50  ;;  %v2992_v6 = vpop.f32.mrb[101].mxu0 }
 0x3a6   : > { %9987 = vmatprep.subr.bf16.mxu1 %v10830_v2  ;;  %v3013_v7 = vpack.c.bf16 %v9981_v5, %v2992_v6  ;;  %v3629_v6 = vld [vmem:[%s12920_s10 + $0x8] sm:$0xff] }
 0x3a8   : > { %v9984_v40 = vpop.f32.mrb[102].mxu0 }
 0x3a9   : > { %9988 = vmatpush3.bf16.msra.mxu1 %v10830_v2  ;;  %v3002_v47 = vpop.f32.mrb[103].mxu0 }
 0x3aa   : > { %v3014_v48 = vpack.c.bf16 %v9984_v40, %v3002_v47  ;;  %10025 = vmatprep.subr.bf16.mxu1 %v10831_v10  ;;  %v8519_v40 = vld [vmem:[%s12920_s10 + $0x18] sm:$0xff]  ;;  %v8526_v47 = vld [vmem:[%s12920_s10 + $0x30] sm:$0xff] }
 0x3ac   : > { %9954 = vmatmul.mubr.msk.bf16.gmra.mrb[52].mxu1 %vm1730_vm2, %v2770_v59  ;;  %v10015_v54 = vpop.f32.mrb[104].mxu0 }
 0x3ad   : > { %9989 = vmatprep.mubr.msk.bf16.mxu1 %vm1730_vm2, %v3011_v62  ;;  %v3216_v56 = vpop.f32.mrb[105].mxu0 }
 0x3ae   : > { %v3255_v61 = vpack.c.bf16 %v10015_v54, %v3216_v56  ;;  %v3969_v54 = vld [vmem:[%s12916_s6] sm:$0xff]  ;;  %v8532_v56 = vld [vmem:[%s12916_s6 + $0x10] sm:$0xff] }
 0x3b0   : > { %v10018_v0 = vpop.f32.mrb[106].mxu0 }
 0x3b1   : > { %v3226_v8 = vpop.f32.mrb[107].mxu0 }
 0x3b2   : > { %v3256_v11 = vpack.c.bf16 %v10018_v0, %v3226_v8 }
 0x3b4   : > { %9990 = vmatmul.mubr.msk.bf16.vlgmr.msra.gmra.mrb[48].mxu1 %vm1730_vm2, %v3012_v3  ;;  %v10021_v18 = vpop.f32.mrb[108].mxu0 }
 0x3b5   : > { %9993 = vmatprep.mubr.msk.bf16.mxu1 %vm1730_vm2, %v3013_v7  ;;  %10026 = vmatpush3.bf16.msra.mxu1 %v10831_v10  ;;  %v3236_v13 = vpop.f32.mrb[109].mxu0  ;;  %v8523_v7 = vld [vmem:[%s12920_s10 + $0x28] sm:$0xff]  ;;  %v8518_v10 = vld [vmem:[%s12920_s10 + $0x10] sm:$0xff] }
 0x3b6   : > { %10027 = vmatprep.subr.bf16.mxu1 %v10832_v12  ;;  %v3257_v25 = vpack.c.bf16 %v10021_v18, %v3236_v13 }
 0x3b8   : > { %v10024_v15 = vpop.f32.mrb[110].mxu0 }
 0x3b9   : > { %10028 = vmatpush3.bf16.msra.mxu1 %v10832_v12  ;;  %v3246_v16 = vpop.f32.mrb[111].mxu0 }
 0x3ba   : > { %v3258_v17 = vpack.c.bf16 %v10024_v15, %v3246_v16  ;;  %10065 = vmatprep.subr.bf16.mxu1 %v10833_v14 }
 0x3bc   : > { %9994 = vmatmul.mubr.msk.bf16.gmra.mrb[52].mxu1 %vm1730_vm2, %v3014_v48  ;;  %v10055_v19 = vpop.f32.mrb[112].mxu0  ;;  %v8527_v48 = vld [vmem:[%s12920_s10 + $0x38] sm:$0xff] }
 0x3bd   : > { %10029 = vmatprep.mubr.msk.bf16.mxu1 %vm1730_vm2, %v3255_v61  ;;  %v3460_v20 = vpop.f32.mrb[113].mxu0 }
 0x3be   : > { %v3499_v21 = vpack.c.bf16 %v10055_v19, %v3460_v20 }
 0x3c0   : > { %v10058_v22 = vpop.f32.mrb[114].mxu0 }
 0x3c1   : > { %v3470_v24 = vpop.f32.mrb[115].mxu0 }
 0x3c2   : > { %v3500_v26 = vpack.c.bf16 %v10058_v22, %v3470_v24  ;;  %v3970_v22 = vld [vmem:[%s12916_s6 + $0x8] sm:$0xff]  ;;  %v8533_v24 = vld [vmem:[%s12916_s6 + $0x18] sm:$0xff] }
 0x3c4   : > { %10030 = vmatmul.mubr.msk.bf16.vlgmr.msra.gmra.mrb[48].mxu1 %vm1730_vm2, %v3256_v11  ;;  %v10061_v9 = vpop.f32.mrb[116].mxu0 }
 0x3c5   : > { %10033 = vmatprep.mubr.msk.bf16.mxu1 %vm1730_vm2, %v3257_v25  ;;  %10066 = vmatpush3.bf16.msra.mxu1 %v10833_v14  ;;  %v3480_v28 = vpop.f32.mrb[117].mxu0 }
 0x3c6   : > { %10067 = vmatprep.subr.bf16.mxu1 %v10834_v27  ;;  %v3501_v4 = vpack.c.bf16 %v10061_v9, %v3480_v28  ;;  %v10943_v9 = vmov 0.0   ;;  %v10836_v28 = vld [vmem:[%s12917_s7 + $0x28] sm:$0xff]  }
 0x3c8   : > { %v10064_v29 = vpop.f32.mrb[118].mxu0 }
 0x3c9   : > { %10068 = vmatpush3.bf16.msra.mxu1 %v10834_v27  ;;  %v3490_v32 = vpop.f32.mrb[119].mxu0  ;;  %v10839_v27 = vld [vmem:[%s12917_s7] sm:$0xff]  }
 0x3ca   : > { %v3502_v37 = vpack.c.bf16 %v10064_v29, %v3490_v32  ;;  %v10837_v29 = vld [vmem:[%s12917_s7 + $0x30] sm:$0xff]  }
 0x3cb   : > { %v10841_v32 = vld [vmem:[%s12917_s7 + $0x10] sm:$0xff]  }
 0x3cc   : > { %10034 = vmatmul.mubr.msk.bf16.gmra.mrb[52].mxu1 %vm1730_vm2, %v3258_v17 }
 0x3cd   : > { %10069 = vmatprep.mubr.msk.bf16.mxu1 %vm1730_vm2, %v3499_v21 }
 0x3d4   : > { %10070 = vmatmul.mubr.msk.bf16.vlgmr.msra.gmra.mrb[48].mxu1 %vm1730_vm2, %v3500_v26  ;;  %v10835_v26 = vld [vmem:[%s12917_s7 + $0x20] sm:$0xff]  }
 0x3d5   : > { %10073 = vmatprep.mubr.msk.bf16.mxu1 %vm1730_vm2, %v3501_v4  ;;  %v10840_v4 = vld [vmem:[%s12917_s7 + $0x8] sm:$0xff]  }
 0x3dc   : > { %10074 = vmatmul.mubr.msk.bf16.gmra.mrb[52].mxu1 %vm1730_vm2, %v3502_v37  ;;  %v10838_v37 = vld [vmem:[%s12917_s7 + $0x38] sm:$0xff]  }
 0x3dd   : > { %10131 = vmatprep.mubr.msk.f32.mxu1 %vm1433_vm1, %v8522_v23 }
 0x4a7   : > { %v10071_v35 = vpop.f32.mrb[48].mxu1 }
 0x4a8   : > { %v3614_v36 = vadd.f32 %v10071_v35, %v8515_v31  ;;  %v3566_v38 = vpop.f32.mrb[49].mxu1 }
 0x4a9   : > { %v3612_v33 = vadd.f32 %v8515_v31, %v3566_v38  ;;  %v10072_v39 = vpop.f32.mrb[50].mxu1  ;;  %v10843_v38 = vld [vmem:[%s12917_s7 + $0x40] sm:$0xff]  }
 0x4aa   : > { %v3615_v43 = vadd.f32 %v10072_v39, %v8515_v31  ;;  %v3569_v34 = vpop.f32.mrb[51].mxu1  ;;  %v3622_v41 = vmax.f32 %v3614_v36, 0.0 }
 0x4ab   : > { %v3613_v44 = vadd.f32 %v8515_v31, %v3569_v34  ;;  %v3620_v46 = vmax.f32 %v3612_v33, 0.0  ;;  %v10844_v34 = vld [vmem:[%s12917_s7 + $0x48] sm:$0xff]  }
 0x4ac   : > { %v3623_v45 = vmax.f32 %v3615_v43, 0.0  ;;  %v8554_v43 = vld [vmem:[%s12916_s6 + $0x20] sm:$0xff] }
 0x4ad   : > { %v3621_v42 = vmax.f32 %v3613_v44, 0.0  ;;  %v8555_v44 = vld [vmem:[%s12916_s6 + $0x28] sm:$0xff] }
 0x4ae   : > { %v10632_v51 = vpack.c.bf16 %v3623_v45, %v3622_v41  ;;  %v10845_v41 = vld [vmem:[%s12917_s7 + $0x50] sm:$0xff]  }
 0x4af   : > { %v10628_v49 = vpack.c.bf16 %v3621_v42, %v3620_v46  ;;  %v10075_v52 = vpop.f32.mrb[52].mxu1  ;;  %v8571_v45 = vld [vmem:[%s12916_s6 + $0x30] sm:$0xff]  ;;  %v10846_v46 = vld [vmem:[%s12917_s7 + $0x58] sm:$0xff]  }
 0x4b0   : > { %v3618_v53 = vadd.f32 %v10075_v52, %v8515_v31  ;;  %v3582_v50 = vpop.f32.mrb[53].mxu1  ;;  %v8572_v42 = vld [vmem:[%s12916_s6 + $0x38] sm:$0xff]  ;;  %v10849_v52 = vld [vmem:[%s12917_s7 + $0x70] sm:$0xff]  }
 0x4b1   : > { %v3616_v55 = vadd.f32 %v8515_v31, %v3582_v50  ;;  %v10076_v57 = vpop.f32.mrb[54].mxu1  ;;  %10629 = vmatprep.subr.bf16.mxu0 %v10628_v49  ;;  %10661 = vmatprep.subr.bf16.mxu1 %v10628_v49 }
 0x4b2   : > { %v3619_v59 = vadd.f32 %v10076_v57, %v8515_v31  ;;  %v3585_v60 = vpop.f32.mrb[55].mxu1  ;;  %10631 = vmatpush3.bf16.msra.mxu0 %v10628_v49  ;;  %10663 = vmatpush3.bf16.msra.mxu1 %v10628_v49  ;;  %v3626_v62 = vmax.f32 %v3618_v53, 0.0  ;;  %v10850_v53 = vld [vmem:[%s12917_s7 + $0x78] sm:$0xff]  }
 0x4b3   : > { %v3617_v58 = vadd.f32 %v8515_v31, %v3585_v60  ;;  %10633 = vmatprep.subr.bf16.mxu0 %v10632_v51  ;;  %10665 = vmatprep.subr.bf16.mxu1 %v10632_v51  ;;  %v3624_v1 = vmax.f32 %v3616_v55, 0.0 }
 0x4b4   : > { %v3627_v63 = vmax.f32 %v3619_v59, 0.0 }
 0x4b5   : > { %v3625_v3 = vmax.f32 %v3617_v58, 0.0 }
 0x4b6   : > { %v10640_v2 = vpack.c.bf16 %v3627_v63, %v3626_v62  ;;  %10635 = vmatpush3.bf16.msra.mxu0 %v10632_v51  ;;  %10667 = vmatpush3.bf16.msra.mxu1 %v10632_v51 }
 0x4b7   : > { %v10636_v5 = vpack.c.bf16 %v3625_v3, %v3624_v1 }
 0x4b9   : > { %10637 = vmatprep.subr.bf16.mxu0 %v10636_v5  ;;  %10669 = vmatprep.subr.bf16.mxu1 %v10636_v5 }
 0x4ba   : > { %10639 = vmatpush3.bf16.msra.mxu0 %v10636_v5  ;;  %10671 = vmatpush3.bf16.msra.mxu1 %v10636_v5 }
 0x4bb   : > { %10641 = vmatprep.subr.bf16.mxu0 %v10640_v2  ;;  %10673 = vmatprep.subr.bf16.mxu1 %v10640_v2 }
 0x4be   : > { %10643 = vmatpush3.bf16.msra.mxu0 %v10640_v2  ;;  %10675 = vmatpush3.bf16.msra.mxu1 %v10640_v2 }
 0x4bf   : > { %10645 = vmatprep.subr.bf16.mxu0 %v10628_v49 }
 0x4c1   : > { %10094 = vmatmul.mubr.msk.f32.vlgmr.msra.gmra.mrb[120].mxu0 %vm1433_vm1, %v3629_v6  ;;  %10132 = vmatmul.mubr.msk.f32.vlgmr.msra.gmra.mrb[56].mxu1 %vm1433_vm1, %v8523_v7  ;;  %v8588_v7 = vld [vmem:[%s12916_s6 + $0x40] sm:$0xff] }
 0x4c2   : > { %10647 = vmatpush3.bf16.msra.mxu0 %v10628_v49  ;;  %10112 = vmatprep.mubr.msk.f32.mxu0 %vm1433_vm1, %v8518_v10 }
 0x4c3   : > { %10649 = vmatprep.subr.bf16.mxu0 %v10632_v51  ;;  %10157 = vmatprep.mubr.msk.f32.mxu1 %vm560_vm0, %v3969_v54  ;;  %v8589_v54 = vld [vmem:[%s12916_s6 + $0x48] sm:$0xff] }
 0x4c6   : > { %10651 = vmatpush3.bf16.msra.mxu0 %v10632_v51 }
 0x4c7   : > { %10653 = vmatprep.subr.bf16.mxu0 %v10636_v5 }
 0x4ca   : > { %10655 = vmatpush3.bf16.msra.mxu0 %v10636_v5 }
 0x4cb   : > { %10657 = vmatprep.subr.bf16.mxu0 %v10640_v2 }
 0x4ce   : > { %10659 = vmatpush3.bf16.msra.mxu0 %v10640_v2 }
 0x4cf   : > { %10677 = vmatprep.subr.bf16.mxu0 %v10628_v49 }
 0x4d1   : > { %10113 = vmatmul.mubr.msk.f32.vlgmr.msra.gmra.mrb[122].mxu0 %vm1433_vm1, %v8519_v40 }
 0x4d2   : > { %10679 = vmatpush3.bf16.msra.mxu0 %v10628_v49  ;;  %10150 = vmatprep.mubr.msk.f32.mxu0 %vm1433_vm1, %v8526_v47  ;;  %v10848_v49 = vld [vmem:[%s12917_s7 + $0x68] sm:$0xff]  }
 0x4d3   : > { %10681 = vmatprep.subr.bf16.mxu0 %v10632_v51 }
 0x4d6   : > { %10683 = vmatpush3.bf16.msra.mxu0 %v10632_v51  ;;  %v10847_v51 = vld [vmem:[%s12917_s7 + $0x60] sm:$0xff]  }
 0x4d7   : > { %10685 = vmatprep.subr.bf16.mxu0 %v10636_v5 }
 0x4da   : > { %10687 = vmatpush3.bf16.msra.mxu0 %v10636_v5 }
 0x4db   : > { %10689 = vmatprep.subr.bf16.mxu0 %v10640_v2 }
 0x4de   : > { %10691 = vmatpush3.bf16.msra.mxu0 %v10640_v2 }
 0x4e1   : > { %10151 = vmatmul.mubr.msk.f32.vlgmr.msra.gmra.mrb[124].mxu0 %vm1433_vm1, %v8527_v48  ;;  %v8605_v48 = vld [vmem:[%s12916_s6 + $0x50] sm:$0xff] }
 0x4e2   : > { %10164 = vmatprep.mubr.msk.f32.mxu0 %vm560_vm0, %v8532_v56  ;;  %v10851_v56 = vld [vmem:[%s12917_s7 + $0x80] sm:$0xff]  }
 0x594   : > { %v10095_v61 = vpop.f32.mrb[120].mxu0  ;;  %v10133_v0 = vpop.f32.mrb[56].mxu1 }
 0x595   : > { %v3702_v8 = vpop.f32.mrb[121].mxu0  ;;  %v3872_v11 = vpop.f32.mrb[57].mxu1 }
 0x5a4   : > { %v10114_v12 = vpop.f32.mrb[122].mxu0 }
 0x5a5   : > { %v3796_v18 = vmax.f32 %v10095_v61, %v10114_v12  ;;  %v3786_v13 = vpop.f32.mrb[123].mxu0  ;;  %v10852_v61 = vld [vmem:[%s12917_s7 + $0x88] sm:$0xff]  }
 0x5a6   : > { %v3795_v25 = vmax.f32 %v3702_v8, %v3786_v13  ;;  %v10853_v8 = vld [vmem:[%s12917_s7 + $0xa0] sm:$0xff]   ;;  %v10855_v12 = vld [vmem:[%s12917_s7 + $0xa8] sm:$0xff]   ;;  %v10857_v13 = vld [vmem:[%s12917_s7 + $0xb0] sm:$0xff]  }
 0x5a7   : > { %v3882_v14 = vmax.f32 %v3796_v18, %v10133_v0  ;;  %v8606_v0 = vld [vmem:[%s12916_s6 + $0x58] sm:$0xff] }
 0x5a8   : > { %v3881_v15 = vmax.f32 %v3795_v25, %v3872_v11  ;;  %v10854_v11 = vld [vmem:[%s12917_s7 + $0x90] sm:$0xff]   ;;  %v10856_v18 = vld [vmem:[%s12917_s7 + $0x98] sm:$0xff]  }
 0x5a9   : > { %v10858_v25 = vld [vmem:[%s12917_s7 + $0xb8] sm:$0xff]  }
 0x5b4   : > { %v10152_v16 = vpop.f32.mrb[124].mxu0 }
 0x5b5   : > { %v3968_v17 = vmax.f32 %v3882_v14, %v10152_v16  ;;  %v3958_v19 = vpop.f32.mrb[125].mxu0 }
 0x5b6   : > { %v3967_v20 = vmax.f32 %v3881_v15, %v3958_v19 }
 0x5b8   : > { %v11945_v21 = vpack.c.bf16 %v3968_v17, %v3967_v20 }
 0x5ba   : > { %10693 = vmatprep.subr.bf16.mxu1 %v11945_v21  ;;  %10697 = vmatprep.subr.bf16.mxu0 %v11945_v21 }
 0x5bb   : > { %10695 = vmatpush3.bf16.msra.mxu1 %v11945_v21  ;;  %10699 = vmatpush3.bf16.msra.mxu0 %v11945_v21 }
 0x5bc   : > { %10167 = vmatprep.subr.bf16.mxu1 %v10943_v9  ;;  %10179 = vmatprep.subr.bf16.mxu0 %v10943_v9 }
 0x5be   : > { %10158 = vmatmul.mubr.msk.f32.vlgmr.msra.gmra.mrb[58].mxu1 %vm560_vm0, %v3970_v22  ;;  %10165 = vmatmul.mubr.msk.f32.vlgmr.msra.gmra.mrb[126].mxu0 %vm560_vm0, %v8533_v24 }
 0x5bf   : > { %10168 = vmatpush3.bf16.msra.mxu1 %v10835_v26  ;;  %10180 = vmatpush3.bf16.msra.mxu0 %v10839_v27 }
 0x5c0   : > { %10169 = vmatprep.subr.bf16.mxu1 %v10943_v9  ;;  %10181 = vmatprep.subr.bf16.mxu0 %v10943_v9 }
 0x5c1   : > { %10175 = vmatprep.mubr.msk.bf16.mxu1 %vm10944_vm3, %v10943_v9  ;;  %10187 = vmatprep.mubr.msk.bf16.mxu0 %vm10944_vm3, %v10943_v9 }
 0x5c3   : > { %10170 = vmatpush3.bf16.msra.mxu1 %v10836_v28  ;;  %10182 = vmatpush3.bf16.msra.mxu0 %v10840_v4 }
 0x5c4   : > { %10171 = vmatprep.subr.bf16.mxu1 %v10943_v9  ;;  %10183 = vmatprep.subr.bf16.mxu0 %v10943_v9 }
 0x5c7   : > { %10172 = vmatpush3.bf16.msra.mxu1 %v10837_v29  ;;  %10184 = vmatpush3.bf16.msra.mxu0 %v10841_v32 }
 0x5c8   : > { %10173 = vmatprep.subr.bf16.mxu1 %v10943_v9  ;;  %10185 = vmatprep.subr.bf16.mxu0 %v10943_v9 }
 0x5cb   : > { %10174 = vmatpush3.bf16.msra.mxu1 %v10838_v37  ;;  %10186 = vmatpush3.bf16.msra.mxu0 %v10842_v30  ;;  %v8622_v30 = vld [vmem:[%s12916_s6 + $0x60] sm:$0xff] }
 0x5cc   : > { %10701 = vmatprep.subr.bf16.mxu1 %v11945_v21  ;;  %10198 = vmatprep.subr.bf16.mxu0 %v10943_v9 }
 0x691   : > { %v10159_v23 = vpop.f32.mrb[58].mxu1  ;;  %v10166_v31 = vpop.f32.mrb[126].mxu0 }
 0x692   : > { %v4043_v35 = vpop.f32.mrb[59].mxu1  ;;  %v4136_v36 = vpop.f32.mrb[127].mxu0 }
 0x693   : > { %v4052_v33 = vpack.c.bf16 %v10159_v23, %v4043_v35  ;;  %v4145_v39 = vpack.c.bf16 %v10166_v31, %v4136_v36  ;;  %v8639_v36 = vld [vmem:[%s12916_s6 + $0x70] sm:$0xff] }
 0x695   : > { %10176 = vmatmul.mubr.msk.bf16.vlgmr.msra.gmra.mrb[60].mxu1 %vm1433_vm1, %v4145_v39  ;;  %10188 = vmatmul.mubr.msk.bf16.vlgmr.msra.gmra.mrb[128].mxu0 %vm1433_vm1, %v4052_v33  ;;  %v10859_v33 = vld [vmem:[%s12917_s7 + $0xc0] sm:$0xff]   ;;  %v10860_v39 = vld [vmem:[%s12917_s7 + $0xc8] sm:$0xff]  }
 0x696   : > { %10703 = vmatpush3.bf16.msra.mxu1 %v11945_v21  ;;  %10199 = vmatpush3.bf16.msra.mxu0 %v10843_v38  ;;  %v8623_v38 = vld [vmem:[%s12916_s6 + $0x68] sm:$0xff] }
 0x697   : > { %10705 = vmatprep.subr.bf16.mxu1 %v11945_v21  ;;  %10200 = vmatprep.subr.bf16.mxu0 %v10943_v9 }
 0x698   : > { %10195 = vmatprep.mubr.msk.f32.mxu1 %vm560_vm0, %v8554_v43  ;;  %10206 = vmatprep.mubr.msk.bf16.mxu0 %vm10944_vm3, %v10943_v9  ;;  %v8640_v43 = vld [vmem:[%s12916_s6 + $0x78] sm:$0xff] }
 0x69a   : > { %10201 = vmatpush3.bf16.msra.mxu0 %v10844_v34  ;;  %v10861_v34 = vld [vmem:[%s12917_s7 + $0xd0] sm:$0xff]  }
 0x69b   : > { %10202 = vmatprep.subr.bf16.mxu0 %v10943_v9 }
 0x69d   : > { %10196 = vmatmul.mubr.msk.f32.vlgmr.msra.gmra.mrb[64].mxu1 %vm560_vm0, %v8555_v44  ;;  %v10862_v44 = vld [vmem:[%s12917_s7 + $0xd8] sm:$0xff]  }
 0x69e   : > { %10203 = vmatpush3.bf16.msra.mxu0 %v10845_v41  ;;  %10707 = vmatpush3.bf16.msra.mxu1 %v11945_v21  ;;  %v10863_v41 = vld [vmem:[%s12917_s7 + $0xe0] sm:$0xff]  }
 0x69f   : > { %10204 = vmatprep.subr.bf16.mxu0 %v10943_v9  ;;  %10214 = vmatprep.mubr.msk.f32.mxu1 %vm560_vm0, %v8571_v45  ;;  %v10864_v45 = vld [vmem:[%s12917_s7 + $0xe8] sm:$0xff]  }
 0x6a0   : > { %10217 = vmatprep.subr.bf16.mxu1 %v10943_v9 }
 0x6a1   : > { %10215 = vmatmul.mubr.msk.f32.vlgmr.msra.gmra.mrb[66].mxu1 %vm560_vm0, %v8572_v42  ;;  %v10866_v42 = vld [vmem:[%s12917_s7 + $0xf8] sm:$0xff]  }
 0x6a2   : > { %10205 = vmatpush3.bf16.msra.mxu0 %v10846_v46  ;;  %10218 = vmatpush3.bf16.msra.mxu1 %v10847_v51  ;;  %v10865_v46 = vld [vmem:[%s12917_s7 + $0xf0] sm:$0xff]  }
 0x6a3   : > { %10709 = vmatprep.subr.bf16.mxu0 %v11945_v21  ;;  %10219 = vmatprep.subr.bf16.mxu1 %v10943_v9 }
 0x6a4   : > { %10225 = vmatprep.mubr.msk.bf16.mxu1 %vm10944_vm3, %v10943_v9 }
 0x6a6   : > { %10220 = vmatpush3.bf16.msra.mxu1 %v10848_v49 }
 0x6a7   : > { %10221 = vmatprep.subr.bf16.mxu1 %v10943_v9 }
 0x6aa   : > { %10222 = vmatpush3.bf16.msra.mxu1 %v10849_v52 }
 0x6ab   : > { %10223 = vmatprep.subr.bf16.mxu1 %v10943_v9 }
 0x6ae   : > { %10224 = vmatpush3.bf16.msra.mxu1 %v10850_v53 }
 0x6af   : > { %10713 = vmatprep.subr.bf16.mxu1 %v11945_v21 }
 0x768   : > { %v4216_v50 = vpop.f32.mrb[60].mxu1  ;;  %v4284_v55 = vpop.f32.mrb[128].mxu0 }
 0x769   : > { %v4285_v57 = vadd.f32 %v4284_v55, %v4216_v50  ;;  %v10177_v59 = vpop.f32.mrb[61].mxu1  ;;  %v10189_v60 = vpop.f32.mrb[129].mxu0 }
 0x76a   : > { %v4219_v58 = vpop.f32.mrb[62].mxu1  ;;  %v4287_v62 = vpop.f32.mrb[130].mxu0 }
 0x76b   : > { %v4288_v63 = vadd.f32 %v4287_v62, %v4219_v58  ;;  %v10178_v1 = vpop.f32.mrb[63].mxu1  ;;  %v10190_v3 = vpop.f32.mrb[131].mxu0 }
 0x770   : > { %v10197_v2 = vpop.f32.mrb[64].mxu1 }
 0x771   : > { %v4366_v5 = vpop.f32.mrb[65].mxu1 }
 0x772   : > { %v4375_v6 = vpack.c.bf16 %v10197_v2, %v4366_v5  ;;  %v8656_v5 = vld [vmem:[%s12916_s6 + $0x80] sm:$0xff] }
 0x774   : > { %10207 = vmatmul.mubr.msk.bf16.vlgmr.msra.gmra.mrb[132].mxu0 %vm1433_vm1, %v4375_v6  ;;  %v10216_v10 = vpop.f32.mrb[66].mxu1 }
 0x775   : > { %10711 = vmatpush3.bf16.msra.mxu0 %v11945_v21  ;;  %v4530_v40 = vpop.f32.mrb[67].mxu1  ;;  %10233 = vmatprep.mubr.msk.f32.mxu0 %vm560_vm0, %v8588_v7 }
 0x776   : > { %v4539_v47 = vpack.c.bf16 %v10216_v10, %v4530_v40  ;;  %10236 = vmatprep.subr.bf16.mxu0 %v10943_v9  ;;  %v8657_v40 = vld [vmem:[%s12916_s6 + $0x88] sm:$0xff] }
 0x778   : > { %10226 = vmatmul.mubr.msk.bf16.vlgmr.msra.gmra.mrb[68].mxu1 %vm1433_vm1, %v4539_v47  ;;  %v10867_v47 = vld [vmem:[%s12917_s7 + $0x100] sm:$0xff]  }
 0x779   : > { %10715 = vmatpush3.bf16.msra.mxu1 %v11945_v21  ;;  %10252 = vmatprep.mubr.msk.f32.mxu1 %vm560_vm0, %v8605_v48  ;;  %v10869_v48 = vld [vmem:[%s12917_s7 + $0x110] sm:$0xff]  }
 0x77a   : > { %10255 = vmatprep.subr.bf16.mxu1 %v10943_v9 }
 0x77c   : > { %10234 = vmatmul.mubr.msk.f32.vlgmr.msra.gmra.mrb[136].mxu0 %vm560_vm0, %v8589_v54  ;;  %v10870_v54 = vld [vmem:[%s12917_s7 + $0x118] sm:$0xff]  }
 0x77d   : > { %10237 = vmatpush3.bf16.msra.mxu0 %v10851_v56  ;;  %10244 = vmatprep.mubr.msk.bf16.mxu0 %vm10944_vm3, %v10943_v9 }
 0x77e   : > { %10238 = vmatprep.subr.bf16.mxu0 %v10943_v9 }
 0x780   : > { %10253 = vmatmul.mubr.msk.f32.vlgmr.msra.gmra.mrb[72].mxu1 %vm560_vm0, %v8606_v0 }
 0x781   : > { %10239 = vmatpush3.bf16.msra.mxu0 %v10852_v61  ;;  %10256 = vmatpush3.bf16.msra.mxu1 %v10853_v8 }
 0x782   : > { %10240 = vmatprep.subr.bf16.mxu0 %v10943_v9  ;;  %10257 = vmatprep.subr.bf16.mxu1 %v10943_v9 }
 0x783   : > { %10263 = vmatprep.mubr.msk.bf16.mxu1 %vm10944_vm3, %v10943_v9 }
 0x785   : > { %10241 = vmatpush3.bf16.msra.mxu0 %v10854_v11  ;;  %10258 = vmatpush3.bf16.msra.mxu1 %v10855_v12 }
 0x786   : > { %10242 = vmatprep.subr.bf16.mxu0 %v10943_v9  ;;  %10259 = vmatprep.subr.bf16.mxu1 %v10943_v9 }
 0x789   : > { %10243 = vmatpush3.bf16.msra.mxu0 %v10856_v18  ;;  %10260 = vmatpush3.bf16.msra.mxu1 %v10857_v13 }
 0x78a   : > { %10717 = vmatprep.subr.bf16.mxu0 %v11945_v21  ;;  %10261 = vmatprep.subr.bf16.mxu1 %v10943_v9 }
 0x78d   : > { %10262 = vmatpush3.bf16.msra.mxu1 %v10858_v25 }
 0x78e   : > { %10721 = vmatprep.subr.bf16.mxu1 %v11945_v21 }
 0x847   : > { %v4446_v14 = vpop.f32.mrb[132].mxu0 }
 0x848   : > { %v4453_v15 = vadd.f32 %v4446_v14, %v4285_v57  ;;  %v10208_v16 = vpop.f32.mrb[133].mxu0 }
 0x849   : > { %v4449_v17 = vpop.f32.mrb[134].mxu0 }
 0x84a   : > { %v4454_v19 = vadd.f32 %v4449_v17, %v4288_v63  ;;  %v10209_v20 = vpop.f32.mrb[135].mxu0 }
 0x84b   : > { %v4610_v22 = vpop.f32.mrb[68].mxu1 }
 0x84c   : > { %v4617_v24 = vadd.f32 %v4610_v22, %v4453_v15  ;;  %v10227_v26 = vpop.f32.mrb[69].mxu1  ;;  %v10945_v22 = vmov 0.0|0.0  }
 0x84d   : > { %v4613_v27 = vpop.f32.mrb[70].mxu1  ;;  %v5758_v26 = vld [vmem:[%s12922_s12 + $0x20] sm:$0xff] }
 0x84e   : > { %v4618_v28 = vadd.f32 %v4613_v27, %v4454_v19  ;;  %v10228_v4 = vpop.f32.mrb[71].mxu1 }
 0x84f   : > { %v10235_v29 = vpop.f32.mrb[136].mxu0 }
 0x850   : > { %v4694_v32 = vpop.f32.mrb[137].mxu0 }
 0x851   : > { %v4703_v37 = vpack.c.bf16 %v10235_v29, %v4694_v32  ;;  %v8673_v29 = vld [vmem:[%s12918_s8] ss:$0 sm:$0xff] }
 0x853   : > { %10245 = vmatmul.mubr.msk.bf16.vlgmr.msra.gmra.mrb[140].mxu0 %vm1433_vm1, %v4703_v37  ;;  %v10254_v23 = vpop.f32.mrb[72].mxu1 }
 0x854   : > { %10719 = vmatpush3.bf16.msra.mxu0 %v11945_v21  ;;  %v4858_v31 = vpop.f32.mrb[73].mxu1  ;;  %10271 = vmatprep.mubr.msk.f32.mxu0 %vm560_vm0, %v8622_v30 }
 0x855   : > { %v4867_v35 = vpack.c.bf16 %v10254_v23, %v4858_v31  ;;  %10274 = vmatprep.subr.bf16.mxu0 %v10943_v9 }
 0x857   : > { %10264 = vmatmul.mubr.msk.bf16.vlgmr.msra.gmra.mrb[76].mxu1 %vm1433_vm1, %v4867_v35 }
 0x858   : > { %10723 = vmatpush3.bf16.msra.mxu1 %v11945_v21  ;;  %10290 = vmatprep.mubr.msk.f32.mxu1 %vm560_vm0, %v8639_v36 }
 0x859   : > { %10293 = vmatprep.subr.bf16.mxu1 %v10943_v9 }
 0x85b   : > { %10272 = vmatmul.mubr.msk.f32.vlgmr.msra.gmra.mrb[138].mxu0 %vm560_vm0, %v8623_v38 }
 0x85c   : > { %10275 = vmatpush3.bf16.msra.mxu0 %v10859_v33  ;;  %10282 = vmatprep.mubr.msk.bf16.mxu0 %vm10944_vm3, %v10943_v9 }
 0x85d   : > { %10276 = vmatprep.subr.bf16.mxu0 %v10943_v9 }
 0x85f   : > { %10291 = vmatmul.mubr.msk.f32.vlgmr.msra.gmra.mrb[74].mxu1 %vm560_vm0, %v8640_v43  ;;  %v5450_v43 = vld [vmem:[%s12921_s11] sm:$0xf] }
 0x860   : > { %10277 = vmatpush3.bf16.msra.mxu0 %v10860_v39  ;;  %10301 = vmatprep.mubr.msk.bf16.mxu1 %vm10944_vm3, %v10943_v9 }
 0x861   : > { %10278 = vmatprep.subr.bf16.mxu0 %v10943_v9  ;;  %10294 = vmatpush3.bf16.msra.mxu1 %v10863_v41  ;;  %v5759_v41 = vld [vmem:[%s12922_s12 + $0x28] sm:$0xff] }
 0x862   : > { %10295 = vmatprep.subr.bf16.mxu1 %v10943_v9 }
 0x864   : > { %10279 = vmatpush3.bf16.msra.mxu0 %v10861_v34  ;;  %v8675_v34 = vld [vmem:[%s12921_s11 + $0x4] sm:$0xf] }
 0x865   : > { %10280 = vmatprep.subr.bf16.mxu0 %v10943_v9  ;;  %10296 = vmatpush3.bf16.msra.mxu1 %v10864_v45  ;;  %v8677_v45 = vld [vmem:[%s12921_s11 + $0x8] sm:$0xf] }
 0x866   : > { %10297 = vmatprep.subr.bf16.mxu1 %v10943_v9 }
 0x868   : > { %10281 = vmatpush3.bf16.msra.mxu0 %v10862_v44  ;;  %v5755_v44 = vld [vmem:[%s12922_s12 + $0x8] sm:$0xff] }
 0x869   : > { %10725 = vmatprep.subr.bf16.mxu0 %v11945_v21  ;;  %10298 = vmatpush3.bf16.msra.mxu1 %v10865_v46  ;;  %v8684_v46 = vcombine.high %v5755_v44, %v5759_v41 }
 0x86a   : > { %10299 = vmatprep.subr.bf16.mxu1 %v10943_v9 }
 0x86d   : > { %10300 = vmatpush3.bf16.msra.mxu1 %v10866_v42  ;;  %v8679_v42 = vld [vmem:[%s12921_s11 + $0xc] sm:$0xf] }
 0x86e   : > { %10728 = vmatprep.subr.bf16.mxu1 %v10945_v22 }
 0x926   : > { %v4774_v51 = vpop.f32.mrb[140].mxu0 }
 0x927   : > { %v4781_v49 = vadd.f32 %v4774_v51, %v4617_v24  ;;  %v10246_v52 = vpop.f32.mrb[141].mxu0  ;;  %v5754_v24 = vld [vmem:[%s12922_s12] sm:$0xff]  ;;  %v8683_v51 = vcombine.low %v5755_v44, %v5759_v41  ;;  %v5780_v41 = vld [vmem:[%s12922_s12 + $0xd0] sm:$0xff] }
 0x928   : > { %v4777_v53 = vpop.f32.mrb[142].mxu0  ;;  %v8681_v27 = vcombine.low %v5754_v24, %v5758_v26  ;;  %v5766_v52 = vld [vmem:[%s12922_s12 + $0x60] sm:$0xff] }
 0x929   : > { %v4782_v50 = vadd.f32 %v4777_v53, %v4618_v28  ;;  %v10247_v55 = vpop.f32.mrb[143].mxu0  ;;  %v8682_v28 = vcombine.high %v5754_v24, %v5758_v26  ;;  %v5764_v26 = vld [vmem:[%s12922_s12 + $0x50] sm:$0xff] }
 0x92a   : > { %v4938_v57 = vpop.f32.mrb[76].mxu1  ;;  %v5767_v55 = vld [vmem:[%s12922_s12 + $0x68] sm:$0xff] }
 0x92b   : > { %v4945_v59 = vadd.f32 %v4938_v57, %v4781_v49  ;;  %v10265_v60 = vpop.f32.mrb[77].mxu1  ;;  %v5762_v49 = vld [vmem:[%s12922_s12 + $0x40] sm:$0xff] }
 0x92c   : > { %v4941_v58 = vpop.f32.mrb[78].mxu1  ;;  %v8689_v53 = vcombine.low %v5762_v49, %v5766_v52  ;;  %v5770_v60 = vld [vmem:[%s12922_s12 + $0x80] sm:$0xff] }
 0x92d   : > { %v4946_v62 = vadd.f32 %v4941_v58, %v4782_v50  ;;  %v10266_v63 = vpop.f32.mrb[79].mxu1  ;;  %v8690_v50 = vcombine.high %v5762_v49, %v5766_v52  ;;  %v5774_v58 = vld [vmem:[%s12922_s12 + $0xa0] sm:$0xff] }
 0x92e   : > { %v10273_v1 = vpop.f32.mrb[138].mxu0  ;;  %v8698_v63 = vcombine.high %v5770_v60, %v5774_v58 }
 0x92f   : > { %v5022_v3 = vpop.f32.mrb[139].mxu0 }
 0x930   : > { %v5031_v2 = vpack.c.bf16 %v10273_v1, %v5022_v3  ;;  %v5775_v1 = vld [vmem:[%s12922_s12 + $0xa8] sm:$0xff]  ;;  %v8697_v3 = vcombine.low %v5770_v60, %v5774_v58 }
 0x932   : > { %10283 = vmatmul.mubr.msk.bf16.vlgmr.msra.gmra.mrb[144].mxu0 %vm1433_vm1, %v5031_v2  ;;  %v10292_v6 = vpop.f32.mrb[74].mxu1 }
 0x933   : > { %10727 = vmatpush3.bf16.msra.mxu0 %v11945_v21  ;;  %v5186_v7 = vpop.f32.mrb[75].mxu1  ;;  %10309 = vmatprep.mubr.msk.f32.mxu0 %vm560_vm0, %v8656_v5  ;;  %v10868_v21 = vld [vmem:[%s12917_s7 + $0x108] sm:$0xff]  }
 0x934   : > { %v5195_v10 = vpack.c.bf16 %v10292_v6, %v5186_v7  ;;  %10312 = vmatprep.subr.bf16.mxu0 %v10943_v9  ;;  %v5778_v6 = vld [vmem:[%s12922_s12 + $0xc0] sm:$0xff] }
 0x935   : > { %v5782_v7 = vld [vmem:[%s12922_s12 + $0xe0] sm:$0xff] }
 0x936   : > { %10302 = vmatmul.mubr.msk.bf16.vlgmr.msra.gmra.mrb[80].mxu1 %vm1433_vm1, %v5195_v10  ;;  %v5779_v10 = vld [vmem:[%s12922_s12 + $0xc8] sm:$0xff] }
 0x937   : > { %10328 = vmatprep.mubr.msk.f32.mxu1 %vm10944_vm3, %v10943_v9 }
 0x93a   : > { %10310 = vmatmul.mubr.msk.f32.vlgmr.msra.gmra.mrb[148].mxu0 %vm560_vm0, %v8657_v40  ;;  %v8706_v40 = vcombine.high %v5778_v6, %v5782_v7 }
 0x93b   : > { %10313 = vmatpush3.bf16.msra.mxu0 %v10867_v47  ;;  %10320 = vmatprep.mubr.msk.bf16.mxu0 %vm10944_vm3, %v10943_v9  ;;  %v5783_v47 = vld [vmem:[%s12922_s12 + $0xe8] sm:$0xff] }
 0x93c   : > { %10314 = vmatprep.subr.bf16.mxu0 %v10943_v9 }
 0x93f   : > { %10315 = vmatpush3.bf16.msra.mxu0 %v10868_v21  ;;  %v8705_v21 = vcombine.low %v5778_v6, %v5782_v7 }
 0x940   : > { %10316 = vmatprep.subr.bf16.mxu0 %v10943_v9 }
 0x943   : > { %10317 = vmatpush3.bf16.msra.mxu0 %v10869_v48  ;;  %v8707_v48 = vcombine.low %v5779_v10, %v5783_v47 }
 0x944   : > { %10318 = vmatprep.subr.bf16.mxu0 %v10943_v9 }
 0x947   : > { %10319 = vmatpush3.bf16.msra.mxu0 %v10870_v54  ;;  %v8708_v54 = vcombine.high %v5779_v10, %v5783_v47  ;;  %v8737_v47 = vld [vmem:[%s12922_s12 + $0x1a0] sm:$0xff] }
 0x948   : > { %5949 = vmatprep.subr.bf16.mxu0 %v8682_v28  ;;  %v5768_v28 = vld [vmem:[%s12922_s12 + $0x70] sm:$0xff] }
 0xa05   : > { %v5102_v56 = vpop.f32.mrb[144].mxu0 }
 0xa06   : > { %v5109_v61 = vadd.f32 %v5102_v56, %v4945_v59  ;;  %v10284_v0 = vpop.f32.mrb[145].mxu0  ;;  %v5756_v56 = vld [vmem:[%s12922_s12 + $0x10] sm:$0xff] }
 0xa07   : > { %v5105_v8 = vpop.f32.mrb[146].mxu0  ;;  %v5757_v0 = vld [vmem:[%s12922_s12 + $0x18] sm:$0xff] }
 0xa08   : > { %v5110_v11 = vadd.f32 %v5105_v8, %v4946_v62  ;;  %v10285_v12 = vpop.f32.mrb[147].mxu0  ;;  %v5771_v62 = vld [vmem:[%s12922_s12 + $0x88] sm:$0xff] }
 0xa09   : > { %v5266_v18 = vpop.f32.mrb[80].mxu1  ;;  %v8699_v2 = vcombine.low %v5771_v62, %v5775_v1  ;;  %v8700_v5 = vcombine.high %v5771_v62, %v5775_v1  ;;  %v5761_v12 = vld [vmem:[%s12922_s12 + $0x38] sm:$0xff]  ;;  %v8729_v1 = vld [vmem:[%s12922_s12 + $0x160] sm:$0xff] }
 0xa0a   : > { %v5273_v13 = vadd.f32 %v5266_v18, %v5109_v61  ;;  %v10303_v25 = vpop.f32.mrb[81].mxu1  ;;  %v5760_v61 = vld [vmem:[%s12922_s12 + $0x30] sm:$0xff]  ;;  %v10946_v18 = vmov 0  }
 0xa0b   : > { %v5269_v14 = vpop.f32.mrb[82].mxu1  ;;  %v8685_v8 = vcombine.low %v5756_v56, %v5760_v61  ;;  %v8688_v25 = vcombine.high %v5757_v0, %v5761_v12 }
 0xa0c   : > { %v5274_v15 = vadd.f32 %v5269_v14, %v5110_v11  ;;  %v10304_v16 = vpop.f32.mrb[83].mxu1  ;;  %v8686_v11 = vcombine.high %v5756_v56, %v5760_v61 }
 0xa0d   : > { %v10311_v17 = vpop.f32.mrb[148].mxu0 }
 0xa0e   : > { %v5350_v19 = vpop.f32.mrb[149].mxu0 }
 0xa0f   : > { %v5359_v20 = vpack.c.bf16 %v10311_v17, %v5350_v19 }
 0xa11   : > { %10321 = vmatmul.mubr.msk.bf16.vlgmr.msra.gmra.mrb[152].mxu0 %vm1433_vm1, %v5359_v20 }
 0xa12   : > { %5950 = vmatpush1.bf16.msra.mxu0 %v8681_v27  ;;  %5981 = vmatprep.mubr.bf16.mxu0 %v10946_v18 }
 0xa13   : > { %5951 = vmatprep.subr.bf16.mxu0 %v8690_v50  ;;  %v8721_v50 = vld [vmem:[%s12922_s12 + $0x120] sm:$0xff] }
 0xa16   : > { %5952 = vmatpush1.bf16.msra.mxu0 %v8689_v53  ;;  %v8717_v53 = vld [vmem:[%s12922_s12 + $0x100] sm:$0xff] }
 0xa17   : > { %5953 = vmatprep.subr.bf16.mxu0 %v8698_v63  ;;  %v8750_v58 = vcombine.high %v8717_v53, %v8721_v50  ;;  %v8725_v63 = vld [vmem:[%s12922_s12 + $0x140] sm:$0xff] }
 0xa18   : > { %v8758_v7 = vcombine.high %v8725_v63, %v8729_v1 }
 0xa1a   : > { %5954 = vmatpush1.bf16.msra.mxu0 %v8697_v3  ;;  %v8726_v3 = vld [vmem:[%s12922_s12 + $0x148] sm:$0xff] }
 0xa1b   : > { %5955 = vmatprep.subr.bf16.mxu0 %v8706_v40  ;;  %v8733_v40 = vld [vmem:[%s12922_s12 + $0x180] sm:$0xff] }
 0xa1c   : > { %v8766_v61 = vcombine.high %v8733_v40, %v8737_v47 }
 0xa1e   : > { %5956 = vmatpush1.bf16.msra.mxu0 %v8705_v21  ;;  %v8734_v21 = vld [vmem:[%s12922_s12 + $0x188] sm:$0xff] }
 0xa1f   : > { %6031 = vmatprep.subr.bf16.mxu0 %v8686_v11  ;;  %v8745_v11 = vld [vmem:[%s12922_s12 + $0x1e0] sm:$0xff] }
 0xae4   : > { %v5430_v4 = vpop.f32.mrb[152].mxu0 }
 0xae5   : > { %v5437_v32 = vadd.f32 %v5430_v4, %v5273_v13  ;;  %v10322_v37 = vpop.f32.mrb[153].mxu0  ;;  %v8687_v13 = vcombine.low %v5757_v0, %v5761_v12  ;;  %v5765_v4 = vld [vmem:[%s12922_s12 + $0x58] sm:$0xff]  ;;  %v8742_v12 = vld [vmem:[%s12922_s12 + $0x1c8] sm:$0xff] }
 0xae6   : > { %v5433_v30 = vpop.f32.mrb[154].mxu0 }
 0xae7   : > { %v5446_v23 = vadd.f32 %v8673_v29, %v5437_v32  ;;  %v5438_v31 = vadd.f32 %v5433_v30, %v5274_v15  ;;  %v10323_v35 = vpop.f32.mrb[155].mxu0 }
 0xae8   : > { %v5772_v35 = vld [vmem:[%s12922_s12 + $0x90] sm:$0xff] }
 0xae9   : > { %v5447_v36 = vadd.f32 %v8673_v29, %v5438_v31  ;;  %v5448_v38 = vmax.f32 %v5446_v23, 0.0  ;;  %v5769_v29 = vld [vmem:[%s12922_s12 + $0x78] sm:$0xff]  ;;  %v8694_v23 = vcombine.high %v5764_v26, %v5768_v28 }
 0xaea   : > { %v8696_v31 = vcombine.high %v5765_v4, %v5769_v29 }
 0xaeb   : > { %v5449_v33 = vmax.f32 %v5447_v36, 0.0  ;;  %v5776_v36 = vld [vmem:[%s12922_s12 + $0xb0] sm:$0xff] }
 0xaed   : > { %v10729_v39 = vpack.c.bf16 %v5449_v33, %v5448_v38  ;;  %v5773_v38 = vld [vmem:[%s12922_s12 + $0x98] sm:$0xff] }
 0xaee   : > { %v5777_v33 = vld [vmem:[%s12922_s12 + $0xb8] sm:$0xff] }
 0xaef   : > { %10730 = vmatpush3.bf16.msra.mxu1 %v10729_v39  ;;  %v8704_v44 = vcombine.high %v5773_v38, %v5777_v33  ;;  %v8703_v49 = vcombine.low %v5773_v38, %v5777_v33  ;;  %v8735_v33 = vld [vmem:[%s12922_s12 + $0x190] sm:$0xff] }
 0xaf0   : > { %10731 = vmatprep.subr.bf16.mxu1 %v10945_v22 }
 0xaf2   : > { %10329 = vmatmul.mubr.msk.f32.vlgmr.msra.gmra.mrb[84].mxu1 %vm560_vm0, %v5450_v43  ;;  %v8695_v43 = vcombine.low %v5765_v4, %v5769_v29  ;;  %v8727_v4 = vld [vmem:[%s12922_s12 + $0x150] sm:$0xff] }
 0xaf3   : > { %10733 = vmatpush3.bf16.msra.mxu1 %v10729_v39  ;;  %10335 = vmatprep.mubr.msk.f32.mxu1 %vm10944_vm3, %v10943_v9  ;;  %v8731_v29 = vld [vmem:[%s12922_s12 + $0x170] sm:$0xff] }
 0xaf4   : > { %10734 = vmatprep.subr.bf16.mxu1 %v10945_v22 }
 0xaf6   : > { %10336 = vmatmul.mubr.msk.f32.vlgmr.msra.gmra.mrb[86].mxu1 %vm560_vm0, %v8675_v34  ;;  %v8702_v34 = vcombine.high %v5772_v35, %v5776_v36 }
 0xaf7   : > { %10736 = vmatpush3.bf16.msra.mxu1 %v10729_v39  ;;  %10342 = vmatprep.mubr.msk.f32.mxu1 %vm10944_vm3, %v10943_v9 }
 0xaf8   : > { %10737 = vmatprep.subr.bf16.mxu1 %v10945_v22 }
 0xafa   : > { %10343 = vmatmul.mubr.msk.f32.vlgmr.msra.gmra.mrb[88].mxu1 %vm560_vm0, %v8677_v45  ;;  %v5784_v45 = vld [vmem:[%s12922_s12 + $0xf0] sm:$0xff] }
 0xafb   : > { %10739 = vmatpush3.bf16.msra.mxu1 %v10729_v39  ;;  %10349 = vmatprep.mubr.msk.f32.mxu1 %vm10944_vm3, %v10943_v9  ;;  %v5763_v9 = vld [vmem:[%s12922_s12 + $0x48] sm:$0xff]  ;;  %v8693_v39 = vcombine.low %v5764_v26, %v5768_v28  ;;  %v8710_v52 = vcombine.high %v5780_v41, %v5784_v45 }
 0xafc   : > { %5990 = vmatprep.subr.bf16.mxu1 %v8684_v46  ;;  %v8691_v57 = vcombine.low %v5763_v9, %v5767_v55  ;;  %v8692_v59 = vcombine.high %v5763_v9, %v5767_v55  ;;  %v5781_v46 = vld [vmem:[%s12922_s12 + $0xd8] sm:$0xff]  ;;  %v8718_v55 = vld [vmem:[%s12922_s12 + $0x108] sm:$0xff] }
 0xafe   : > { %10350 = vmatmul.mubr.msk.f32.vlgmr.msra.gmra.mrb[90].mxu1 %vm560_vm0, %v8679_v42  ;;  %v5785_v42 = vld [vmem:[%s12922_s12 + $0xf8] sm:$0xff] }
 0xaff   : > { %5991 = vmatpush1.bf16.msra.mxu1 %v8683_v51  ;;  %6022 = vmatprep.mubr.bf16.mxu1 %v10946_v18  ;;  %v8701_v51 = vcombine.low %v5772_v35, %v5776_v36  ;;  %v8712_v9 = vcombine.high %v5781_v46, %v5785_v42  ;;  %v8711_v60 = vcombine.low %v5781_v46, %v5785_v42  ;;  %v8743_v42 = vld [vmem:[%s12922_s12 + $0x1d0] sm:$0xff] }
 0xb00   : > { %5992 = vmatprep.subr.bf16.mxu1 %v8692_v59  ;;  %v8709_v59 = vcombine.low %v5780_v41, %v5784_v45  ;;  %v8762_v36 = vcombine.high %v8727_v4, %v8731_v29 }
 0xb03   : > { %5993 = vmatpush1.bf16.msra.mxu1 %v8691_v57  ;;  %v8722_v57 = vld [vmem:[%s12922_s12 + $0x128] sm:$0xff] }
 0xb04   : > { %5994 = vmatprep.subr.bf16.mxu1 %v8700_v5  ;;  %v8752_v62 = vcombine.high %v8718_v55, %v8722_v57  ;;  %v8749_v5 = vcombine.low %v8717_v53, %v8721_v50  ;;  %v8751_v6 = vcombine.low %v8718_v55, %v8722_v57  ;;  %v8785_v57 = vld [vmem:[%s12922_s12 + $0x200] sm:$0xff] }
 0xb07   : > { %5995 = vmatpush1.bf16.msra.mxu1 %v8699_v2  ;;  %v8730_v2 = vld [vmem:[%s12922_s12 + $0x168] sm:$0xff] }
 0xb08   : > { %5996 = vmatprep.subr.bf16.mxu1 %v8708_v54  ;;  %v8760_v10 = vcombine.high %v8726_v3, %v8730_v2  ;;  %v8757_v54 = vcombine.low %v8725_v63, %v8729_v1  ;;  %v8759_v56 = vcombine.low %v8726_v3, %v8730_v2  ;;  %v8793_v2 = vld [vmem:[%s12922_s12 + $0x240] sm:$0xff] }
 0xb0b   : > { %5997 = vmatpush1.bf16.msra.mxu1 %v8707_v48  ;;  %v8738_v48 = vld [vmem:[%s12922_s12 + $0x1a8] sm:$0xff] }
 0xb0c   : > { %6072 = vmatprep.subr.bf16.mxu1 %v8688_v25  ;;  %v8768_v0 = vcombine.high %v8734_v21, %v8738_v48  ;;  %v8765_v25 = vcombine.low %v8733_v40, %v8737_v47 }
 0xbc5   : > { %v5520_v14 = vpop.f32.mrb[84].mxu1 }
 0xbc6   : > { %v10330_v15 = vpop.f32.mrb[85].mxu1 }
 0xbc9   : > { %v5595_v16 = vpop.f32.mrb[86].mxu1 }
 0xbca   : > { %v5599_v17 = vmax.f32 %v5520_v14, %v5595_v16  ;;  %v10337_v19 = vpop.f32.mrb[87].mxu1  ;;  %v8767_v14 = vcombine.low %v8734_v21, %v8738_v48  ;;  %v8801_v48 = vld [vmem:[%s12922_s12 + $0x280] sm:$0xff] }
 0xbcb   : > { %v8723_v19 = vld [vmem:[%s12922_s12 + $0x130] sm:$0xff] }
 0xbcd   : > { %v5671_v20 = vpop.f32.mrb[88].mxu1 }
 0xbce   : > { %v5675_v22 = vmax.f32 %v5599_v17, %v5671_v20  ;;  %v10344_v24 = vpop.f32.mrb[89].mxu1  ;;  %v8719_v17 = vld [vmem:[%s12922_s12 + $0x110] sm:$0xff]  ;;  %v8720_v20 = vld [vmem:[%s12922_s12 + $0x118] sm:$0xff] }
 0xbd1   : > { %v5747_v27 = vpop.f32.mrb[90].mxu1 }
 0xbd2   : > { %v5751_v32 = vmax.f32 %v5675_v22, %v5747_v27  ;;  %v10351_v37 = vpop.f32.mrb[91].mxu1  ;;  %v8724_v22 = vld [vmem:[%s12922_s12 + $0x138] sm:$0xff]  ;;  %v8754_v27 = vcombine.high %v8719_v17, %v8723_v19 }
 0xbd3   : > { %v8756_v28 = vcombine.high %v8720_v20, %v8724_v22  ;;  %v8732_v37 = vld [vmem:[%s12922_s12 + $0x178] sm:$0xff] }
 0xbd4   : > { %v12301_v30 = vpack.c.bf16 %v5751_v32, %v5751_v32  ;;  %v8728_v32 = vld [vmem:[%s12922_s12 + $0x158] sm:$0xff] }
 0xbd5   : > { %v8764_v38 = vcombine.high %v8728_v32, %v8732_v37  ;;  %v8763_v41 = vcombine.low %v8728_v32, %v8732_v37  ;;  %v8795_v37 = vld [vmem:[%s12922_s12 + $0x250] sm:$0xff] }
 0xbd6   : > { %8713 = vmatmul.mubr.msk.bf16.vlgmr.msra.gmra.mrb[156].mxu0 %vm1433_vm1, %v12301_v30  ;;  %8714 = vmatmul.mubr.msk.bf16.vlgmr.msra.gmra.mrb[92].mxu1 %vm1433_vm1, %v12301_v30  ;;  %v12412_v35 = vshrl.u32 %v12301_v30, 16 }
 0xbd7   : > { %6032 = vmatpush1.bf16.msra.mxu0 %v8685_v8  ;;  %6073 = vmatpush1.bf16.msra.mxu1 %v8687_v13  ;;  %v8741_v8 = vld [vmem:[%s12922_s12 + $0x1c0] sm:$0xff]  ;;  %v8746_v13 = vld [vmem:[%s12922_s12 + $0x1e8] sm:$0xff] }
 0xbd8   : > { %6033 = vmatprep.subr.bf16.mxu0 %v8694_v23  ;;  %6074 = vmatprep.subr.bf16.mxu1 %v8696_v31  ;;  %v8774_v15 = vcombine.high %v8741_v8, %v8745_v11  ;;  %v8776_v16 = vcombine.high %v8742_v12, %v8746_v13  ;;  %v8773_v24 = vcombine.low %v8741_v8, %v8745_v11 }
 0xbd9   : > { %6063 = vmatprep.mubr.bf16.mxu0 %v10946_v18  ;;  %6104 = vmatprep.mubr.bf16.mxu1 %v10946_v18  ;;  %v8775_v26 = vcombine.low %v8742_v12, %v8746_v13  ;;  %v8753_v23 = vcombine.low %v8719_v17, %v8723_v19  ;;  %v8755_v31 = vcombine.low %v8720_v20, %v8724_v22  ;;  %v8809_v13 = vld [vmem:[%s12922_s12 + $0x2c0] sm:$0xff]  ;;  %v8787_v22 = vld [vmem:[%s12922_s12 + $0x210] sm:$0xff] }
 0xbdb   : > { %6034 = vmatpush1.bf16.msra.mxu0 %v8693_v39  ;;  %6075 = vmatpush1.bf16.msra.mxu1 %v8695_v43  ;;  %v8739_v39 = vld [vmem:[%s12922_s12 + $0x1b0] sm:$0xff]  ;;  %v8736_v43 = vld [vmem:[%s12922_s12 + $0x198] sm:$0xff] }
 0xbdc   : > { %6035 = vmatprep.subr.bf16.mxu0 %v8702_v34  ;;  %6076 = vmatprep.subr.bf16.mxu1 %v8704_v44  ;;  %v8740_v34 = vld [vmem:[%s12922_s12 + $0x1b8] sm:$0xff]  ;;  %v8761_v44 = vcombine.low %v8727_v4, %v8731_v29  ;;  %v8770_v45 = vcombine.high %v8735_v33, %v8739_v39 }
 0xbdd   : > { %v8772_v46 = vcombine.high %v8736_v43, %v8740_v34  ;;  %v8771_v53 = vcombine.low %v8736_v43, %v8740_v34 }
 0xbdf   : > { %6036 = vmatpush1.bf16.msra.mxu0 %v8701_v51  ;;  %6077 = vmatpush1.bf16.msra.mxu1 %v8703_v49  ;;  %v8747_v51 = vld [vmem:[%s12922_s12 + $0x1f0] sm:$0xff]  ;;  %v8744_v49 = vld [vmem:[%s12922_s12 + $0x1d8] sm:$0xff] }
 0xbe0   : > { %6037 = vmatprep.subr.bf16.mxu0 %v8710_v52  ;;  %6078 = vmatprep.subr.bf16.mxu1 %v8712_v9  ;;  %v8748_v52 = vld [vmem:[%s12922_s12 + $0x1f8] sm:$0xff]  ;;  %v8769_v9 = vcombine.low %v8735_v33, %v8739_v39  ;;  %v8778_v50 = vcombine.high %v8743_v42, %v8747_v51  ;;  %v6627_v39 = vrot.slane %v12301_v30, 1 }
 0xbe1   : > { %v8780_v55 = vcombine.high %v8744_v49, %v8748_v52  ;;  %v8779_v63 = vcombine.low %v8744_v49, %v8748_v52  ;;  %v8811_v52 = vld [vmem:[%s12922_s12 + $0x2d0] sm:$0xff] }
 0xbe3   : > { %6038 = vmatpush1.bf16.msra.mxu0 %v8709_v59  ;;  %6079 = vmatpush1.bf16.msra.mxu1 %v8711_v60  ;;  %v8789_v59 = vld [vmem:[%s12922_s12 + $0x220] sm:$0xff]  ;;  %v8786_v60 = vld [vmem:[%s12922_s12 + $0x208] sm:$0xff] }
 0xbe4   : > { %6370 = vmatprep.subr.bf16.mxu0 %v8750_v58  ;;  %6411 = vmatprep.subr.bf16.mxu1 %v8752_v62  ;;  %v8790_v58 = vld [vmem:[%s12922_s12 + $0x228] sm:$0xff]  ;;  %v8777_v62 = vcombine.low %v8743_v42, %v8747_v51  ;;  %v8818_v1 = vcombine.high %v8785_v57, %v8789_v59 }
 0xbe5   : > { %v8820_v3 = vcombine.high %v8786_v60, %v8790_v58  ;;  %v8819_v40 = vcombine.low %v8786_v60, %v8790_v58  ;;  %v8853_v58 = vld [vmem:[%s12922_s12 + $0x300] sm:$0xff] }
 0xbe6   : > { %8715 = vmatmul.mubr.msk.bf16.vlgmr.msra.gmra.mrb[160].mxu0 %vm1433_vm1, %v12301_v30  ;;  %8716 = vmatmul.mubr.msk.bf16.vlgmr.msra.gmra.mrb[96].mxu1 %vm1433_vm1, %v12301_v30  ;;  %v8808_v30 = vld [vmem:[%s12922_s12 + $0x2b8] sm:$0xff] }
 0xbe7   : > { %6371 = vmatpush1.bf16.msra.mxu0 %v8749_v5  ;;  %6412 = vmatpush1.bf16.msra.mxu1 %v8751_v6  ;;  %v8797_v5 = vld [vmem:[%s12922_s12 + $0x260] sm:$0xff]  ;;  %v8794_v6 = vld [vmem:[%s12922_s12 + $0x248] sm:$0xff] }
 0xbe8   : > { %6372 = vmatprep.subr.bf16.mxu0 %v8758_v7  ;;  %6413 = vmatprep.subr.bf16.mxu1 %v8760_v10  ;;  %v8798_v7 = vld [vmem:[%s12922_s12 + $0x268] sm:$0xff]  ;;  %v8817_v10 = vcombine.low %v8785_v57, %v8789_v59  ;;  %v8826_v47 = vcombine.high %v8793_v2, %v8797_v5 }
 0xbe9   : > { %6402 = vmatprep.mubr.bf16.mxu0 %v10946_v18  ;;  %6443 = vmatprep.mubr.bf16.mxu1 %v10946_v18  ;;  %v8828_v21 = vcombine.high %v8794_v6, %v8798_v7  ;;  %v8827_v8 = vcombine.low %v8794_v6, %v8798_v7  ;;  %v8861_v7 = vld [vmem:[%s12922_s12 + $0x340] sm:$0xff] }
 0xbeb   : > { %6373 = vmatpush1.bf16.msra.mxu0 %v8757_v54  ;;  %6414 = vmatpush1.bf16.msra.mxu1 %v8759_v56  ;;  %v8805_v54 = vld [vmem:[%s12922_s12 + $0x2a0] sm:$0xff]  ;;  %v8802_v56 = vld [vmem:[%s12922_s12 + $0x288] sm:$0xff] }
 0xbec   : > { %6374 = vmatprep.subr.bf16.mxu0 %v8766_v61  ;;  %6415 = vmatprep.subr.bf16.mxu1 %v8768_v0  ;;  %v8806_v61 = vld [vmem:[%s12922_s12 + $0x2a8] sm:$0xff]  ;;  %v8825_v0 = vcombine.low %v8793_v2, %v8797_v5  ;;  %v8834_v11 = vcombine.high %v8801_v48, %v8805_v54 }
 0xbed   : > { %v8836_v12 = vcombine.high %v8802_v56, %v8806_v61  ;;  %v8835_v17 = vcombine.low %v8802_v56, %v8806_v61  ;;  %v8869_v61 = vld [vmem:[%s12922_s12 + $0x380] sm:$0xff] }
 0xbef   : > { %6375 = vmatpush1.bf16.msra.mxu0 %v8765_v25  ;;  %6416 = vmatpush1.bf16.msra.mxu1 %v8767_v14  ;;  %v8813_v25 = vld [vmem:[%s12922_s12 + $0x2e0] sm:$0xff]  ;;  %v8810_v14 = vld [vmem:[%s12922_s12 + $0x2c8] sm:$0xff] }
 0xbf0   : > { %6376 = vmatprep.subr.bf16.mxu0 %v8774_v15  ;;  %6417 = vmatprep.subr.bf16.mxu1 %v8776_v16  ;;  %v8814_v15 = vld [vmem:[%s12922_s12 + $0x2e8] sm:$0xff]  ;;  %v8833_v16 = vcombine.low %v8801_v48, %v8805_v54  ;;  %v8842_v19 = vcombine.high %v8809_v13, %v8813_v25 }
 0xbf1   : > { %v8844_v20 = vcombine.high %v8810_v14, %v8814_v15  ;;  %v8843_v4 = vcombine.low %v8810_v14, %v8814_v15  ;;  %v8877_v15 = vld [vmem:[%s12922_s12 + $0x3c0] sm:$0xff] }
 0xbf3   : > { %6377 = vmatpush1.bf16.msra.mxu0 %v8773_v24  ;;  %6418 = vmatpush1.bf16.msra.mxu1 %v8775_v26  ;;  %v8791_v24 = vld [vmem:[%s12922_s12 + $0x230] sm:$0xff]  ;;  %v8788_v26 = vld [vmem:[%s12922_s12 + $0x218] sm:$0xff] }
 0xbf4   : > { %6452 = vmatprep.subr.bf16.mxu0 %v8754_v27  ;;  %6493 = vmatprep.subr.bf16.mxu1 %v8756_v28  ;;  %v8792_v27 = vld [vmem:[%s12922_s12 + $0x238] sm:$0xff]  ;;  %v8841_v28 = vcombine.low %v8809_v13, %v8813_v25  ;;  %v8822_v29 = vcombine.high %v8787_v22, %v8791_v24 }
 0xbf5   : > { %v8824_v32 = vcombine.high %v8788_v26, %v8792_v27  ;;  %v8823_v33 = vcombine.low %v8788_v26, %v8792_v27  ;;  %v8855_v27 = vld [vmem:[%s12922_s12 + $0x310] sm:$0xff] }
 0xbf6   : > { %8781 = vmatmul.mubr.msk.bf16.vlgmr.msra.gmra.mrb[164].mxu0 %vm1433_vm1, %v12412_v35  ;;  %8782 = vmatmul.mubr.msk.bf16.vlgmr.msra.gmra.mrb[100].mxu1 %vm1433_vm1, %v12412_v35 }
 0xbf7   : > { %6453 = vmatpush1.bf16.msra.mxu0 %v8753_v23  ;;  %6494 = vmatpush1.bf16.msra.mxu1 %v8755_v31  ;;  %v8799_v23 = vld [vmem:[%s12922_s12 + $0x270] sm:$0xff]  ;;  %v8796_v31 = vld [vmem:[%s12922_s12 + $0x258] sm:$0xff] }
 0xbf8   : > { %6454 = vmatprep.subr.bf16.mxu0 %v8762_v36  ;;  %6495 = vmatprep.subr.bf16.mxu1 %v8764_v38  ;;  %v8800_v36 = vld [vmem:[%s12922_s12 + $0x278] sm:$0xff]  ;;  %v8821_v38 = vcombine.low %v8787_v22, %v8791_v24  ;;  %v8830_v43 = vcombine.high %v8795_v37, %v8799_v23 }
 0xbf9   : > { %6484 = vmatprep.mubr.bf16.mxu0 %v10946_v18  ;;  %6525 = vmatprep.mubr.bf16.mxu1 %v10946_v18  ;;  %v8832_v34 = vcombine.high %v8796_v31, %v8800_v36  ;;  %v8831_v42 = vcombine.low %v8796_v31, %v8800_v36  ;;  %v8863_v36 = vld [vmem:[%s12922_s12 + $0x350] sm:$0xff] }
 0xbfb   : > { %6455 = vmatpush1.bf16.msra.mxu0 %v8761_v44  ;;  %6496 = vmatpush1.bf16.msra.mxu1 %v8763_v41  ;;  %v8803_v44 = vld [vmem:[%s12922_s12 + $0x290] sm:$0xff] }
 0xbfc   : > { %6456 = vmatprep.subr.bf16.mxu0 %v8770_v45  ;;  %6497 = vmatprep.subr.bf16.mxu1 %v8772_v46  ;;  %v8807_v41 = vld [vmem:[%s12922_s12 + $0x2b0] sm:$0xff]  ;;  %v8804_v45 = vld [vmem:[%s12922_s12 + $0x298] sm:$0xff]  ;;  %v8829_v46 = vcombine.low %v8795_v37, %v8799_v23 }
 0xbfd   : > { %v8838_v51 = vcombine.high %v8803_v44, %v8807_v41  ;;  %v8840_v49 = vcombine.high %v8804_v45, %v8808_v30  ;;  %v8839_v57 = vcombine.low %v8804_v45, %v8808_v30  ;;  %v8871_v30 = vld [vmem:[%s12922_s12 + $0x390] sm:$0xff] }
 0xbff   : > { %6457 = vmatpush1.bf16.msra.mxu0 %v8769_v9  ;;  %6498 = vmatpush1.bf16.msra.mxu1 %v8771_v53  ;;  %v8815_v9 = vld [vmem:[%s12922_s12 + $0x2f0] sm:$0xff]  ;;  %v8812_v53 = vld [vmem:[%s12922_s12 + $0x2d8] sm:$0xff] }
 0xc00   : > { %6458 = vmatprep.subr.bf16.mxu0 %v8778_v50  ;;  %6499 = vmatprep.subr.bf16.mxu1 %v8780_v55  ;;  %v8816_v50 = vld [vmem:[%s12922_s12 + $0x2f8] sm:$0xff]  ;;  %v8837_v55 = vcombine.low %v8803_v44, %v8807_v41  ;;  %v8846_v59 = vcombine.high %v8811_v52, %v8815_v9  ;;  %v7047_v44 = vrot.slane %v12412_v35, 1 }
 0xc01   : > { %v8848_v60 = vcombine.high %v8812_v53, %v8816_v50  ;;  %v8847_v2 = vcombine.low %v8812_v53, %v8816_v50  ;;  %v8879_v53 = vld [vmem:[%s12922_s12 + $0x3d0] sm:$0xff] }
 0xc02   : > { %v8883_v50 = vld [vmem:[%s12922_s12 + $0x3f0] sm:$0xff] }
 0xc03   : > { %6459 = vmatpush1.bf16.msra.mxu0 %v8777_v62  ;;  %6500 = vmatpush1.bf16.msra.mxu1 %v8779_v63  ;;  %v8857_v62 = vld [vmem:[%s12922_s12 + $0x320] sm:$0xff]  ;;  %v8854_v63 = vld [vmem:[%s12922_s12 + $0x308] sm:$0xff] }
 0xc04   : > { %6791 = vmatprep.subr.bf16.mxu0 %v8818_v1  ;;  %6832 = vmatprep.subr.bf16.mxu1 %v8820_v3  ;;  %v8858_v1 = vld [vmem:[%s12922_s12 + $0x328] sm:$0xff]  ;;  %v8845_v3 = vcombine.low %v8811_v52, %v8815_v9  ;;  %v8886_v5 = vcombine.high %v8853_v58, %v8857_v62 }
 0xc05   : > { %v8888_v6 = vcombine.high %v8854_v63, %v8858_v1  ;;  %v8887_v48 = vcombine.low %v8854_v63, %v8858_v1  ;;  %v8913_v63 = vcombine.low %v8879_v53, %v8883_v50 }
 0xc06   : > { %8783 = vmatmul.mubr.msk.bf16.vlgmr.msra.gmra.mrb[168].mxu0 %vm1433_vm1, %v12412_v35  ;;  %8784 = vmatmul.mubr.msk.bf16.vlgmr.msra.gmra.mrb[104].mxu1 %vm1433_vm1, %v12412_v35  ;;  %v8876_v35 = vld [vmem:[%s12922_s12 + $0x3b8] sm:$0xff] }
 0xc07   : > { %6792 = vmatpush1.bf16.msra.mxu0 %v8817_v10  ;;  %6833 = vmatpush1.bf16.msra.mxu1 %v8819_v40  ;;  %v8865_v10 = vld [vmem:[%s12922_s12 + $0x360] sm:$0xff]  ;;  %v8862_v40 = vld [vmem:[%s12922_s12 + $0x348] sm:$0xff] }
 0xc08   : > { %6793 = vmatprep.subr.bf16.mxu0 %v8826_v47  ;;  %6834 = vmatprep.subr.bf16.mxu1 %v8828_v21  ;;  %v8866_v47 = vld [vmem:[%s12922_s12 + $0x368] sm:$0xff]  ;;  %v8885_v21 = vcombine.low %v8853_v58, %v8857_v62  ;;  %v8894_v54 = vcombine.high %v8861_v7, %v8865_v10  ;;  %v8914_v58 = vcombine.high %v8879_v53, %v8883_v50 }
 0xc09   : > { %6823 = vmatprep.mubr.bf16.mxu0 %v10946_v18  ;;  %6864 = vmatprep.mubr.bf16.mxu1 %v10946_v18  ;;  %v8896_v56 = vcombine.high %v8862_v40, %v8866_v47  ;;  %v8895_v13 = vcombine.low %v8862_v40, %v8866_v47  ;;  %v10878_v40 = vld [vmem:[%s12924_s14 + $0x88] sm:$0xff]   ;;  %v10879_v47 = vld [vmem:[%s12924_s14 + $0x50] sm:$0xff]  }
 0xc0b   : > { %6794 = vmatpush1.bf16.msra.mxu0 %v8825_v0  ;;  %6835 = vmatpush1.bf16.msra.mxu1 %v8827_v8  ;;  %v8873_v0 = vld [vmem:[%s12922_s12 + $0x3a0] sm:$0xff]  ;;  %v8870_v8 = vld [vmem:[%s12922_s12 + $0x388] sm:$0xff] }
 0xc0c   : > { %6795 = vmatprep.subr.bf16.mxu0 %v8834_v11  ;;  %6836 = vmatprep.subr.bf16.mxu1 %v8836_v12  ;;  %v8874_v11 = vld [vmem:[%s12922_s12 + $0x3a8] sm:$0xff]  ;;  %v8893_v12 = vcombine.low %v8861_v7, %v8865_v10  ;;  %v8902_v25 = vcombine.high %v8869_v61, %v8873_v0 }
 0xc0d   : > { %v8904_v14 = vcombine.high %v8870_v8, %v8874_v11  ;;  %v8903_v22 = vcombine.low %v8870_v8, %v8874_v11  ;;  %v10876_v7 = vld [vmem:[%s12924_s14 + $0xc8] sm:$0xff]   ;;  %v10886_v8 = vld [vmem:[%s12924_s14 + $0x98] sm:$0xff]   ;;  %v10887_v11 = vld [vmem:[%s12924_s14 + $0x60] sm:$0xff]  }
 0xc0e   : > { %v10877_v10 = vld [vmem:[%s12924_s14 + $0x8] sm:$0xff]  }
 0xc0f   : > { %6796 = vmatpush1.bf16.msra.mxu0 %v8833_v16  ;;  %6837 = vmatpush1.bf16.msra.mxu1 %v8835_v17  ;;  %v8881_v16 = vld [vmem:[%s12922_s12 + $0x3e0] sm:$0xff]  ;;  %v8878_v17 = vld [vmem:[%s12922_s12 + $0x3c8] sm:$0xff] }
 0xc10   : > { %6797 = vmatprep.subr.bf16.mxu0 %v8842_v19  ;;  %6838 = vmatprep.subr.bf16.mxu1 %v8844_v20  ;;  %v8882_v19 = vld [vmem:[%s12922_s12 + $0x3e8] sm:$0xff]  ;;  %v8901_v20 = vcombine.low %v8869_v61, %v8873_v0  ;;  %v8910_v24 = vcombine.high %v8877_v15, %v8881_v16  ;;  %v10884_v61 = vld [vmem:[%s12924_s14 + $0xd8] sm:$0xff]  }
 0xc11   : > { %v8912_v26 = vcombine.high %v8878_v17, %v8882_v19  ;;  %v8911_v37 = vcombine.low %v8878_v17, %v8882_v19  ;;  %v10885_v0 = vld [vmem:[%s12924_s14 + $0x18] sm:$0xff]   ;;  %v10894_v17 = vld [vmem:[%s12924_s14 + $0xa8] sm:$0xff]   ;;  %v10947_v19 = vmov 1966171168  }
 0xc13   : > { %6798 = vmatpush1.bf16.msra.mxu0 %v8841_v28  ;;  %6839 = vmatpush1.bf16.msra.mxu1 %v8843_v4  ;;  %v8859_v28 = vld [vmem:[%s12922_s12 + $0x330] sm:$0xff]  ;;  %v8856_v4 = vld [vmem:[%s12922_s12 + $0x318] sm:$0xff] }
 0xc14   : > { %6873 = vmatprep.subr.bf16.mxu0 %v8822_v29  ;;  %6914 = vmatprep.subr.bf16.mxu1 %v8824_v32  ;;  %v8860_v29 = vld [vmem:[%s12922_s12 + $0x338] sm:$0xff]  ;;  %v8909_v32 = vcombine.low %v8877_v15, %v8881_v16  ;;  %v8890_v23 = vcombine.high %v8855_v27, %v8859_v28  ;;  %v10892_v15 = vld [vmem:[%s12924_s14 + $0xe8] sm:$0xff]  }
 0xc15   : > { %v8892_v31 = vcombine.high %v8856_v4, %v8860_v29  ;;  %v10893_v16 = vld [vmem:[%s12924_s14 + $0x28] sm:$0xff]  }
 0xc16   : > { %8849 = vmatmul.mubr.msk.bf16.vlgmr.msra.gmra.mrb[172].mxu0 %vm1433_vm1, %v6627_v39  ;;  %8850 = vmatmul.mubr.msk.bf16.vlgmr.msra.gmra.mrb[108].mxu1 %vm1433_vm1, %v6627_v39 }
 0xc17   : > { %6874 = vmatpush1.bf16.msra.mxu0 %v8821_v38  ;;  %6915 = vmatpush1.bf16.msra.mxu1 %v8823_v33  ;;  %v8867_v38 = vld [vmem:[%s12922_s12 + $0x370] sm:$0xff]  ;;  %v8864_v33 = vld [vmem:[%s12922_s12 + $0x358] sm:$0xff] }
 0xc18   : > { %6875 = vmatprep.subr.bf16.mxu0 %v8830_v43  ;;  %6916 = vmatprep.subr.bf16.mxu1 %v8832_v34  ;;  %v8889_v43 = vcombine.low %v8855_v27, %v8859_v28  ;;  %v8891_v34 = vcombine.low %v8856_v4, %v8860_v29  ;;  %v8898_v41 = vcombine.high %v8863_v36, %v8867_v38  ;;  %v10897_v27 = vld [vmem:[%s12924_s14 + $0x30] sm:$0xff]  }
 0xc19   : > { %6905 = vmatprep.mubr.bf16.mxu0 %v10946_v18  ;;  %6946 = vmatprep.mubr.bf16.mxu1 %v10946_v18  ;;  %v10898_v28 = vld [vmem:[%s12924_s14 + $0xb0] sm:$0xff]  }
 0xc1b   : > { %6876 = vmatpush1.bf16.msra.mxu0 %v8829_v46  ;;  %6917 = vmatpush1.bf16.msra.mxu1 %v8831_v42  ;;  %v8875_v46 = vld [vmem:[%s12922_s12 + $0x3b0] sm:$0xff]  ;;  %v8872_v42 = vld [vmem:[%s12922_s12 + $0x398] sm:$0xff] }
 0xc1c   : > { %6877 = vmatprep.subr.bf16.mxu0 %v8838_v51  ;;  %6918 = vmatprep.subr.bf16.mxu1 %v8840_v49  ;;  %v8897_v51 = vcombine.low %v8863_v36, %v8867_v38  ;;  %v8906_v52 = vcombine.high %v8871_v30, %v8875_v46  ;;  %v8908_v9 = vcombine.high %v8872_v42, %v8876_v35 }
 0xc1f   : > { %6878 = vmatpush1.bf16.msra.mxu0 %v8837_v55  ;;  %6919 = vmatpush1.bf16.msra.mxu1 %v8839_v57  ;;  %v8880_v55 = vld [vmem:[%s12922_s12 + $0x3d8] sm:$0xff] }
 0xc20   : > { %6879 = vmatprep.subr.bf16.mxu0 %v8846_v59  ;;  %6920 = vmatprep.subr.bf16.mxu1 %v8848_v60  ;;  %v8884_v57 = vld [vmem:[%s12922_s12 + $0x3f8] sm:$0xff]  ;;  %v8905_v59 = vcombine.low %v8871_v30, %v8875_v46  ;;  %v8907_v60 = vcombine.low %v8872_v42, %v8876_v35  ;;  %v10903_v30 = vld [vmem:[%s12924_s14 + $0x140] sm:$0xff]  }
 0xc21   : > { %v8916_v62 = vcombine.high %v8880_v55, %v8884_v57  ;;  %v8915_v1 = vcombine.low %v8880_v55, %v8884_v57  ;;  %v10904_v46 = vld [vmem:[%s12924_s14 + $0x1c0] sm:$0xff]  }
 0xc23   : > { %6880 = vmatpush1.bf16.msra.mxu0 %v8845_v3  ;;  %6921 = vmatpush1.bf16.msra.mxu1 %v8847_v2  ;;  %v10872_v3 = vld [vmem:[%s12924_s14 + $0xc0] sm:$0xff]  }
 0xc24   : > { %7211 = vmatprep.subr.bf16.mxu0 %v8886_v5  ;;  %7252 = vmatprep.subr.bf16.mxu1 %v8888_v6  ;;  %v10873_v2 = vld [vmem:[%s12924_s14] sm:$0xff]   ;;  %v10875_v6 = vld [vmem:[%s12924_s14 + $0x48] sm:$0xff]  }
 0xc25   : > { %v10874_v5 = vld [vmem:[%s12924_s14 + $0x80] sm:$0xff]  }
 0xc26   : > { %8851 = vmatmul.mubr.msk.bf16.vlgmr.msra.gmra.mrb[176].mxu0 %vm1433_vm1, %v6627_v39  ;;  %8852 = vmatmul.mubr.msk.bf16.vlgmr.msra.gmra.mrb[112].mxu1 %vm1433_vm1, %v6627_v39  ;;  %v8868_v39 = vld [vmem:[%s12922_s12 + $0x378] sm:$0xff] }
 0xc27   : > { %7212 = vmatpush1.bf16.msra.mxu0 %v8885_v21  ;;  %7253 = vmatpush1.bf16.msra.mxu1 %v8887_v48  ;;  %v8900_v45 = vcombine.high %v8864_v33, %v8868_v39  ;;  %v8899_v49 = vcombine.low %v8864_v33, %v8868_v39  ;;  %v10880_v21 = vld [vmem:[%s12924_s14 + $0xd0] sm:$0xff]  }
 0xc28   : > { %7213 = vmatprep.subr.bf16.mxu0 %v8894_v54  ;;  %7254 = vmatprep.subr.bf16.mxu1 %v8896_v56  ;;  %v10881_v48 = vld [vmem:[%s12924_s14 + $0x10] sm:$0xff]   ;;  %v10883_v56 = vld [vmem:[%s12924_s14 + $0x58] sm:$0xff]  }
 0xc29   : > { %7243 = vmatprep.mubr.bf16.mxu0 %v10946_v18  ;;  %7284 = vmatprep.mubr.bf16.mxu1 %v10946_v18  ;;  %v10882_v54 = vld [vmem:[%s12924_s14 + $0x90] sm:$0xff]  }
 0xc2b   : > { %7214 = vmatpush1.bf16.msra.mxu0 %v8893_v12  ;;  %7255 = vmatpush1.bf16.msra.mxu1 %v8895_v13  ;;  %v10888_v12 = vld [vmem:[%s12924_s14 + $0xe0] sm:$0xff]  }
 0xc2c   : > { %7215 = vmatprep.subr.bf16.mxu0 %v8902_v25  ;;  %7256 = vmatprep.subr.bf16.mxu1 %v8904_v14  ;;  %v10889_v13 = vld [vmem:[%s12924_s14 + $0x20] sm:$0xff]   ;;  %v10891_v14 = vld [vmem:[%s12924_s14 + $0x68] sm:$0xff]  }
 0xc2d   : > { %v10890_v25 = vld [vmem:[%s12924_s14 + $0xa0] sm:$0xff]  }
 0xc2f   : > { %7216 = vmatpush1.bf16.msra.mxu0 %v8901_v20  ;;  %7257 = vmatpush1.bf16.msra.mxu1 %v8903_v22  ;;  %v6126_v20 = vunpack.c.l.s4 %v10947_v19  ;;  %v6128_v22 = vlaneseq }
 0xc30   : > { %7217 = vmatprep.subr.bf16.mxu0 %v8910_v24  ;;  %7258 = vmatprep.subr.bf16.mxu1 %v8912_v26  ;;  %v10895_v24 = vld [vmem:[%s12924_s14 + $0x70] sm:$0xff]  }
 0xc31   : > { %v10896_v26 = vld [vmem:[%s12924_s14 + $0xf0] sm:$0xff]   ;;  %v6127_v4 = vunpack.c.0.s8 %v6126_v20  ;;  %v12742_v29 = vshrl.u32 %v6128_v22, 7 }
 0xc33   : > { %7218 = vmatpush1.bf16.msra.mxu0 %v8909_v32  ;;  %7259 = vmatpush1.bf16.msra.mxu1 %v8911_v37  ;;  %v10899_v32 = vld [vmem:[%s12924_s14 + $0x78] sm:$0xff]   ;;  %v12757_v33 = vsub.s32 %v6127_v4, %v12742_v29  ;;  %v5752_v4 = vld [vmem:[%s12923_s13] sm:$0xff] }
 0xc34   : > { %7293 = vmatprep.subr.bf16.mxu0 %v8890_v23  ;;  %7334 = vmatprep.subr.bf16.mxu1 %v8892_v31  ;;  %v10900_v37 = vld [vmem:[%s12924_s14 + $0xf8] sm:$0xff]  }
 0xc35   : > { %v10901_v23 = vld [vmem:[%s12924_s14 + $0x38] sm:$0xff]  }
 0xc36   : > { %8917 = vmatmul.mubr.msk.bf16.vlgmr.msra.gmra.mrb[180].mxu0 %vm1433_vm1, %v7047_v44  ;;  %8918 = vmatmul.mubr.msk.bf16.vlgmr.msra.gmra.mrb[116].mxu1 %vm1433_vm1, %v7047_v44  ;;  %v10902_v31 = vld [vmem:[%s12924_s14 + $0xb8] sm:$0xff]  }
 0xc37   : > { %7294 = vmatpush1.bf16.msra.mxu0 %v8889_v43  ;;  %7335 = vmatpush1.bf16.msra.mxu1 %v8891_v34 }
 0xc38   : > { %7295 = vmatprep.subr.bf16.mxu0 %v8898_v41  ;;  %7336 = vmatprep.subr.bf16.mxu1 %v8900_v45 }
 0xc39   : > { %7325 = vmatprep.mubr.bf16.mxu0 %v10946_v18  ;;  %7366 = vmatprep.mubr.bf16.mxu1 %v10946_v18  ;;  %v10871_v18 = vld [vmem:[%s12924_s14 + $0x40] sm:$0xff]  }
 0xc3b   : > { %7296 = vmatpush1.bf16.msra.mxu0 %v8897_v51  ;;  %7337 = vmatpush1.bf16.msra.mxu1 %v8899_v49 }
 0xc3c   : > { %7297 = vmatprep.subr.bf16.mxu0 %v8906_v52  ;;  %7338 = vmatprep.subr.bf16.mxu1 %v8908_v9 }
 0xc3f   : > { %7298 = vmatpush1.bf16.msra.mxu0 %v8905_v59  ;;  %7339 = vmatpush1.bf16.msra.mxu1 %v8907_v60 }
 0xc40   : > { %7299 = vmatprep.subr.bf16.mxu0 %v8914_v58  ;;  %7340 = vmatprep.subr.bf16.mxu1 %v8916_v62 }
 0xc43   : > { %7300 = vmatpush1.bf16.msra.mxu0 %v8913_v63  ;;  %7341 = vmatpush1.bf16.msra.mxu1 %v8915_v1 }
 0xc44   : > { %9577 = vmatprep.subr.bf16.mxu0 %v10871_v18  ;;  %9599 = vmatprep.subr.bf16.mxu1 %v10872_v3 }
 0xc46   : > { %8919 = vmatmul.mubr.msk.bf16.vlgmr.msra.gmra.mrb[184].mxu0 %vm1433_vm1, %v7047_v44  ;;  %8920 = vmatmul.mubr.msk.bf16.vlgmr.msra.gmra.mrb[120].mxu1 %vm1433_vm1, %v7047_v44 }
 0xc47   : > { %9578 = vmatpush3.bf16.msra.mxu0 %v10873_v2  ;;  %9600 = vmatpush3.bf16.msra.mxu1 %v10874_v5 }
 0xc48   : > { %9579 = vmatprep.subr.bf16.mxu0 %v10875_v6  ;;  %9601 = vmatprep.subr.bf16.mxu1 %v10876_v7 }
 0xc4b   : > { %9580 = vmatpush3.bf16.msra.mxu0 %v10877_v10  ;;  %9602 = vmatpush3.bf16.msra.mxu1 %v10878_v40 }
 0xc4c   : > { %9581 = vmatprep.subr.bf16.mxu0 %v10879_v47  ;;  %9603 = vmatprep.subr.bf16.mxu1 %v10880_v21 }
 0xc4f   : > { %9582 = vmatpush3.bf16.msra.mxu0 %v10881_v48  ;;  %9604 = vmatpush3.bf16.msra.mxu1 %v10882_v54 }
 0xc50   : > { %9583 = vmatprep.subr.bf16.mxu0 %v10883_v56  ;;  %9605 = vmatprep.subr.bf16.mxu1 %v10884_v61 }
 0xc53   : > { %9584 = vmatpush3.bf16.msra.mxu0 %v10885_v0  ;;  %9606 = vmatpush3.bf16.msra.mxu1 %v10886_v8 }
 0xc54   : > { %9585 = vmatprep.subr.bf16.mxu0 %v10887_v11  ;;  %9607 = vmatprep.subr.bf16.mxu1 %v10888_v12 }
 0xc57   : > { %9586 = vmatpush3.bf16.msra.mxu0 %v10889_v13  ;;  %9608 = vmatpush3.bf16.msra.mxu1 %v10890_v25 }
 0xc58   : > { %9587 = vmatprep.subr.bf16.mxu0 %v10891_v14  ;;  %9609 = vmatprep.subr.bf16.mxu1 %v10892_v15 }
 0xc5b   : > { %9588 = vmatpush3.bf16.msra.mxu0 %v10893_v16  ;;  %9610 = vmatpush3.bf16.msra.mxu1 %v10894_v17 }
 0xc5c   : > { %9589 = vmatprep.subr.bf16.mxu0 %v10895_v24  ;;  %9611 = vmatprep.subr.bf16.mxu1 %v10896_v26 }
 0xc5f   : > { %9590 = vmatpush3.bf16.msra.mxu0 %v10897_v27  ;;  %9612 = vmatpush3.bf16.msra.mxu1 %v10898_v28 }
 0xc60   : > { %9591 = vmatprep.subr.bf16.mxu0 %v10899_v32  ;;  %9613 = vmatprep.subr.bf16.mxu1 %v10900_v37 }
 0xc63   : > { %9592 = vmatpush3.bf16.msra.mxu0 %v10901_v23  ;;  %9614 = vmatpush3.bf16.msra.mxu1 %v10902_v31 }
 0xc64   : > { %9621 = vmatprep.subr.bf16.mxu0 %v10903_v30  ;;  %9643 = vmatprep.subr.bf16.mxu1 %v10904_v46 }
 0xca9   : > { %v5983_v36 = vpop.f32.mrb[156].mxu0  ;;  %v6024_v38 = vpop.f32.mrb[92].mxu1 }
 0xcaa   : > { %v5985_v39 = vpop.f32.mrb[157].mxu0  ;;  %v6026_v43 = vpop.f32.mrb[93].mxu1 }
 0xcab   : > { %v6121_v34 = vcombine.low %v5983_v36, %v5985_v39  ;;  %v6122_v44 = vcombine.low %v6024_v38, %v6026_v43  ;;  %v5987_v41 = vpop.f32.mrb[158].mxu0  ;;  %v6028_v45 = vpop.f32.mrb[94].mxu1 }
 0xcac   : > { %v5988_v42 = vpop.f32.mrb[159].mxu0  ;;  %v6029_v35 = vpop.f32.mrb[95].mxu1 }
 0xcad   : > { %v6131_v51 = vrot.slane %v6121_v34, %v12757_v33  ;;  %v6138_v49 = vrot.slane %v6122_v44, %v12757_v33 }
 0xcaf   : > { %v6153_v52 = vcombine.low %v6131_v51, %v6138_v49 }
 0xcb1   : > { %v6161_v2 = vrot.slane %v6153_v52, %v12757_v33 }
 0xcb9   : > { %v6065_v9 = vpop.f32.mrb[160].mxu0  ;;  %v6106_v53 = vpop.f32.mrb[96].mxu1 }
 0xcba   : > { %v6067_v50 = vpop.f32.mrb[161].mxu0  ;;  %v6108_v55 = vpop.f32.mrb[97].mxu1 }
 0xcbb   : > { %v6123_v57 = vcombine.low %v6065_v9, %v6067_v50  ;;  %v6124_v59 = vcombine.low %v6106_v53, %v6108_v55  ;;  %v6069_v60 = vpop.f32.mrb[162].mxu0  ;;  %v6110_v58 = vpop.f32.mrb[98].mxu1 }
 0xcbc   : > { %v6070_v62 = vpop.f32.mrb[163].mxu0  ;;  %v6111_v63 = vpop.f32.mrb[99].mxu1 }
 0xcbd   : > { %v6145_v1 = vrot.slane %v6123_v57, %v12757_v33  ;;  %v6152_v18 = vrot.slane %v6124_v59, %v12757_v33 }
 0xcbf   : > { %v6154_v3 = vcombine.low %v6145_v1, %v6152_v18 }
 0xcc1   : > { %v6168_v5 = vrot.slane %v6154_v3, %v12757_v33 }
 0xcc3   : > { %v6169_v6 = vcombine.low %v6161_v2, %v6168_v5 }
 0xcc5   : > { %v6171_v23 = vadd.f32 %v6169_v6, %v5752_v4 }
 0xcc9   : > { %v6404_v7 = vpop.f32.mrb[164].mxu0  ;;  %v6445_v10 = vpop.f32.mrb[100].mxu1 }
 0xcca   : > { %v6406_v40 = vpop.f32.mrb[165].mxu0  ;;  %v6447_v47 = vpop.f32.mrb[101].mxu1 }
 0xccb   : > { %v6542_v21 = vcombine.low %v6404_v7, %v6406_v40  ;;  %v6543_v48 = vcombine.low %v6445_v10, %v6447_v47  ;;  %v6408_v54 = vpop.f32.mrb[166].mxu0  ;;  %v6449_v56 = vpop.f32.mrb[102].mxu1 }
 0xccc   : > { %v6409_v61 = vpop.f32.mrb[167].mxu0  ;;  %v6450_v0 = vpop.f32.mrb[103].mxu1 }
 0xccd   : > { %v6552_v8 = vrot.slane %v6542_v21, %v12757_v33  ;;  %v6559_v11 = vrot.slane %v6543_v48, %v12757_v33 }
 0xccf   : > { %v6574_v12 = vcombine.low %v6552_v8, %v6559_v11 }
 0xcd1   : > { %v6582_v32 = vrot.slane %v6574_v12, %v12757_v33 }
 0xcd9   : > { %v6486_v13 = vpop.f32.mrb[168].mxu0  ;;  %v6527_v25 = vpop.f32.mrb[104].mxu1 }
 0xcda   : > { %v6488_v14 = vpop.f32.mrb[169].mxu0  ;;  %v6529_v15 = vpop.f32.mrb[105].mxu1 }
 0xcdb   : > { %v6544_v16 = vcombine.low %v6486_v13, %v6488_v14  ;;  %v6545_v17 = vcombine.low %v6527_v25, %v6529_v15  ;;  %v6490_v19 = vpop.f32.mrb[170].mxu0  ;;  %v6531_v20 = vpop.f32.mrb[106].mxu1 }
 0xcdc   : > { %v6491_v22 = vpop.f32.mrb[171].mxu0  ;;  %v6532_v24 = vpop.f32.mrb[107].mxu1 }
 0xcdd   : > { %v6566_v26 = vrot.slane %v6544_v16, %v12757_v33  ;;  %v6573_v27 = vrot.slane %v6545_v17, %v12757_v33 }
 0xcdf   : > { %v6575_v28 = vcombine.low %v6566_v26, %v6573_v27 }
 0xce1   : > { %v6589_v37 = vrot.slane %v6575_v28, %v12757_v33 }
 0xce3   : > { %v6590_v31 = vcombine.low %v6582_v32, %v6589_v37 }
 0xce5   : > { %v6592_v36 = vadd.f32 %v6590_v31, %v6171_v23  ;;  %v7442_v23 = vsub.s32 1, %v12742_v29 }
 0xce9   : > { %v6825_v38 = vpop.f32.mrb[172].mxu0  ;;  %v6866_v39 = vpop.f32.mrb[108].mxu1 }
 0xcea   : > { %v6827_v43 = vpop.f32.mrb[173].mxu0  ;;  %v6868_v34 = vpop.f32.mrb[109].mxu1 }
 0xceb   : > { %v6963_v44 = vcombine.low %v6825_v38, %v6827_v43  ;;  %v6964_v41 = vcombine.low %v6866_v39, %v6868_v34  ;;  %v6829_v45 = vpop.f32.mrb[174].mxu0  ;;  %v6870_v30 = vpop.f32.mrb[110].mxu1  ;;  %v7438_v38 = vsub.s32 0, %v12742_v29  ;;  %v7446_v39 = vsub.s32 2, %v12742_v29 }
 0xcec   : > { %v6830_v46 = vpop.f32.mrb[175].mxu0  ;;  %v6871_v42 = vpop.f32.mrb[111].mxu1  ;;  %v7458_v43 = vsub.s32 5, %v12742_v29  ;;  %v7466_v34 = vsub.s32 7, %v12742_v29 }
 0xced   : > { %v6973_v35 = vrot.slane %v6963_v44, %v12757_v33  ;;  %v6980_v51 = vrot.slane %v6964_v41, %v12757_v33 }
 0xcef   : > { %v6995_v49 = vcombine.low %v6973_v35, %v6980_v51 }
 0xcf1   : > { %v7003_v3 = vrot.slane %v6995_v49, %v12757_v33 }
 0xcf9   : > { %v6907_v52 = vpop.f32.mrb[176].mxu0  ;;  %v6948_v9 = vpop.f32.mrb[112].mxu1 }
 0xcfa   : > { %v6909_v53 = vpop.f32.mrb[177].mxu0  ;;  %v6950_v50 = vpop.f32.mrb[113].mxu1 }
 0xcfb   : > { %v6965_v55 = vcombine.low %v6907_v52, %v6909_v53  ;;  %v6966_v57 = vcombine.low %v6948_v9, %v6950_v50  ;;  %v6911_v59 = vpop.f32.mrb[178].mxu0  ;;  %v6952_v60 = vpop.f32.mrb[114].mxu1  ;;  %v10905_v9 = vld [vmem:[%s12924_s14 + $0x100] sm:$0xff]   ;;  %v10907_v50 = vld [vmem:[%s12924_s14 + $0x148] sm:$0xff]  }
 0xcfc   : > { %v6912_v58 = vpop.f32.mrb[179].mxu0  ;;  %v6953_v62 = vpop.f32.mrb[115].mxu1  ;;  %v10906_v53 = vld [vmem:[%s12924_s14 + $0x180] sm:$0xff]   ;;  %v10909_v60 = vld [vmem:[%s12924_s14 + $0x108] sm:$0xff]  }
 0xcfd   : > { %v6987_v63 = vrot.slane %v6965_v55, %v12757_v33  ;;  %v6994_v1 = vrot.slane %v6966_v57, %v12757_v33  ;;  %v10908_v55 = vld [vmem:[%s12924_s14 + $0x1c8] sm:$0xff]   ;;  %v10911_v62 = vld [vmem:[%s12924_s14 + $0x150] sm:$0xff]  }
 0xcfe   : > { %v10910_v58 = vld [vmem:[%s12924_s14 + $0x188] sm:$0xff]  }
 0xcff   : > { %v6996_v18 = vcombine.low %v6987_v63, %v6994_v1  ;;  %v10912_v63 = vld [vmem:[%s12924_s14 + $0x1d0] sm:$0xff]  }
 0xd00   : > { %v10913_v1 = vld [vmem:[%s12924_s14 + $0x110] sm:$0xff]  }
 0xd01   : > { %v7010_v2 = vrot.slane %v6996_v18, %v12757_v33  ;;  %v10914_v18 = vld [vmem:[%s12924_s14 + $0x190] sm:$0xff]  }
 0xd03   : > { %v7011_v5 = vcombine.low %v7003_v3, %v7010_v2  ;;  %v10915_v3 = vld [vmem:[%s12924_s14 + $0x158] sm:$0xff]  }
 0xd04   : > { %v10916_v2 = vld [vmem:[%s12924_s14 + $0x1d8] sm:$0xff]  }
 0xd05   : > { %v7013_v6 = vadd.f32 %v7011_v5, %v6592_v36  ;;  %v7450_v36 = vsub.s32 3, %v12742_v29  ;;  %v10917_v5 = vld [vmem:[%s12924_s14 + $0x118] sm:$0xff]  }
 0xd09   : > { %v7245_v7 = vpop.f32.mrb[180].mxu0  ;;  %v7286_v10 = vpop.f32.mrb[116].mxu1 }
 0xd0a   : > { %v7247_v40 = vpop.f32.mrb[181].mxu0  ;;  %v7288_v47 = vpop.f32.mrb[117].mxu1 }
 0xd0b   : > { %v7383_v21 = vcombine.low %v7245_v7, %v7247_v40  ;;  %v7384_v48 = vcombine.low %v7286_v10, %v7288_v47  ;;  %v7249_v54 = vpop.f32.mrb[182].mxu0  ;;  %v7290_v56 = vpop.f32.mrb[118].mxu1  ;;  %v10919_v7 = vld [vmem:[%s12924_s14 + $0x160] sm:$0xff]  }
 0xd0c   : > { %v7250_v61 = vpop.f32.mrb[183].mxu0  ;;  %v7291_v0 = vpop.f32.mrb[119].mxu1  ;;  %v10920_v10 = vld [vmem:[%s12924_s14 + $0x1e0] sm:$0xff]   ;;  %v10925_v54 = vld [vmem:[%s12924_s14 + $0x128] sm:$0xff]  }
 0xd0d   : > { %v7393_v8 = vrot.slane %v7383_v21, %v12757_v33  ;;  %v7400_v11 = vrot.slane %v7384_v48, %v12757_v33  ;;  %v10921_v40 = vld [vmem:[%s12924_s14 + $0x120] sm:$0xff]   ;;  %v10923_v21 = vld [vmem:[%s12924_s14 + $0x168] sm:$0xff]   ;;  %v10927_v61 = vld [vmem:[%s12924_s14 + $0x170] sm:$0xff]  }
 0xd0e   : > { %v10922_v47 = vld [vmem:[%s12924_s14 + $0x1a0] sm:$0xff]   ;;  %v10924_v48 = vld [vmem:[%s12924_s14 + $0x1e8] sm:$0xff]   ;;  %v10928_v0 = vld [vmem:[%s12924_s14 + $0x1f0] sm:$0xff]  }
 0xd0f   : > { %v7415_v12 = vcombine.low %v7393_v8, %v7400_v11  ;;  %v10926_v56 = vld [vmem:[%s12924_s14 + $0x1a8] sm:$0xff]   ;;  %v10929_v8 = vld [vmem:[%s12924_s14 + $0x130] sm:$0xff]  }
 0xd10   : > { %v10930_v11 = vld [vmem:[%s12924_s14 + $0x1b0] sm:$0xff]  }
 0xd11   : > { %v7423_v4 = vrot.slane %v7415_v12, %v12757_v33  ;;  %v10931_v12 = vld [vmem:[%s12924_s14 + $0x178] sm:$0xff]  }
 0xd19   : > { %v7327_v13 = vpop.f32.mrb[184].mxu0  ;;  %v7368_v25 = vpop.f32.mrb[120].mxu1 }
 0xd1a   : > { %v7329_v14 = vpop.f32.mrb[185].mxu0  ;;  %v7370_v15 = vpop.f32.mrb[121].mxu1 }
 0xd1b   : > { %v7385_v16 = vcombine.low %v7327_v13, %v7329_v14  ;;  %v7386_v17 = vcombine.low %v7368_v25, %v7370_v15  ;;  %v7331_v19 = vpop.f32.mrb[186].mxu0  ;;  %v7372_v20 = vpop.f32.mrb[122].mxu1  ;;  %v10932_v13 = vld [vmem:[%s12924_s14 + $0x1f8] sm:$0xff]   ;;  %v7454_v25 = vsub.s32 4, %v12742_v29  ;;  %v7462_v14 = vsub.s32 6, %v12742_v29 }
 0xd1c   : > { %v7332_v22 = vpop.f32.mrb[187].mxu0  ;;  %v7373_v24 = vpop.f32.mrb[123].mxu1  ;;  %v10933_v15 = vld [vmem:[%s12924_s14 + $0x138] sm:$0xff]  }
 0xd1d   : > { %v7407_v26 = vrot.slane %v7385_v16, %v12757_v33  ;;  %v7414_v27 = vrot.slane %v7386_v17, %v12757_v33  ;;  %v10934_v16 = vld [vmem:[%s12924_s14 + $0x1b8] sm:$0xff]  }
 0xd1f   : > { %v7416_v28 = vcombine.low %v7407_v26, %v7414_v27  ;;  %v7612_v26 = vld [vmem:[%s12925_s15] sm:$0x1] }
 0xd21   : > { %v7430_v32 = vrot.slane %v7416_v28, %v12757_v33 }
 0xd23   : > { %v7431_v37 = vcombine.low %v7423_v4, %v7430_v32 }
 0xd25   : > { %v7433_v31 = vadd.f32 %v7431_v37, %v7013_v6  ;;  %v10918_v6 = vld [vmem:[%s12924_s14 + $0x198] sm:$0xff]  }
 0xd27   : > { %v12798_v44 = vmax.f32 %v7433_v31, 0.0 }
 0xd29   : > { %v7443_v41 = vrot.slane %v12798_v44, %v7442_v23  ;;  %v7451_v33 = vrot.slane %v12798_v44, %v7450_v36  ;;  %v7439_v45 = vrot.slane %v12798_v44, %v7438_v38  ;;  %v7447_v30 = vrot.slane %v12798_v44, %v7446_v39 }
 0xd2a   : > { %v7459_v46 = vrot.slane %v12798_v44, %v7458_v43  ;;  %v7467_v42 = vrot.slane %v12798_v44, %v7466_v34  ;;  %v7455_v17 = vrot.slane %v12798_v44, %v7454_v25  ;;  %v7463_v19 = vrot.slane %v12798_v44, %v7462_v14 }
 0xd2b   : > { %v7477_v35 = vpack.c.bf16 %v7443_v41, %v7443_v41  ;;  %v7479_v51 = vpack.c.bf16 %v7451_v33, %v7451_v33  ;;  %v7476_v49 = vpack.c.bf16 %v7439_v45, %v7439_v45  ;;  %v7478_v52 = vpack.c.bf16 %v7447_v30, %v7447_v30 }
 0xd2c   : > { %v7481_v57 = vpack.c.bf16 %v7459_v46, %v7459_v46  ;;  %v7483_v59 = vpack.c.bf16 %v7467_v42, %v7467_v42  ;;  %v7480_v20 = vpack.c.bf16 %v7455_v17, %v7455_v17  ;;  %v7482_v29 = vpack.c.bf16 %v7463_v19, %v7463_v19 }
 0xd2d   : > { %8029 = vmatprep.mubr.bf16.mxu0 %v7477_v35  ;;  %8069 = vmatprep.mubr.bf16.mxu1 %v7479_v51 }
 0xd2e   : > { %8030 = vmatmul.mubr.bf16.vlgmr.msra.gmra.mrb[188].mxu0 %v7476_v49  ;;  %8070 = vmatmul.mubr.bf16.vlgmr.msra.gmra.mrb[124].mxu1 %v7478_v52 }
 0xd2f   : > { %9622 = vmatpush3.bf16.msra.mxu0 %v10905_v9  ;;  %9644 = vmatpush3.bf16.msra.mxu1 %v10906_v53 }
 0xd30   : > { %8109 = vmatprep.mubr.bf16.mxu0 %v7481_v57  ;;  %8149 = vmatprep.mubr.bf16.mxu1 %v7483_v59 }
 0xd31   : > { %9623 = vmatprep.subr.bf16.mxu0 %v10907_v50  ;;  %9645 = vmatprep.subr.bf16.mxu1 %v10908_v55 }
 0xd33   : > { %9624 = vmatpush3.bf16.msra.mxu0 %v10909_v60  ;;  %9646 = vmatpush3.bf16.msra.mxu1 %v10910_v58 }
 0xd34   : > { %9625 = vmatprep.subr.bf16.mxu0 %v10911_v62  ;;  %9647 = vmatprep.subr.bf16.mxu1 %v10912_v63 }
 0xd37   : > { %9626 = vmatpush3.bf16.msra.mxu0 %v10913_v1  ;;  %9648 = vmatpush3.bf16.msra.mxu1 %v10914_v18 }
 0xd38   : > { %9627 = vmatprep.subr.bf16.mxu0 %v10915_v3  ;;  %9649 = vmatprep.subr.bf16.mxu1 %v10916_v2 }
 0xd3b   : > { %9628 = vmatpush3.bf16.msra.mxu0 %v10917_v5  ;;  %9650 = vmatpush3.bf16.msra.mxu1 %v10918_v6 }
 0xd3c   : > { %9629 = vmatprep.subr.bf16.mxu0 %v10919_v7  ;;  %9651 = vmatprep.subr.bf16.mxu1 %v10920_v10 }
 0xd3f   : > { %9630 = vmatpush3.bf16.msra.mxu0 %v10921_v40  ;;  %9652 = vmatpush3.bf16.msra.mxu1 %v10922_v47 }
 0xd40   : > { %9631 = vmatprep.subr.bf16.mxu0 %v10923_v21  ;;  %9653 = vmatprep.subr.bf16.mxu1 %v10924_v48 }
 0xd43   : > { %9632 = vmatpush3.bf16.msra.mxu0 %v10925_v54  ;;  %9654 = vmatpush3.bf16.msra.mxu1 %v10926_v56 }
 0xd44   : > { %9633 = vmatprep.subr.bf16.mxu0 %v10927_v61  ;;  %9655 = vmatprep.subr.bf16.mxu1 %v10928_v0 }
 0xd47   : > { %9634 = vmatpush3.bf16.msra.mxu0 %v10929_v8  ;;  %9656 = vmatpush3.bf16.msra.mxu1 %v10930_v11 }
 0xd48   : > { %9635 = vmatprep.subr.bf16.mxu0 %v10931_v12  ;;  %9657 = vmatprep.subr.bf16.mxu1 %v10932_v13 }
 0xd4b   : > { %9636 = vmatpush3.bf16.msra.mxu0 %v10933_v15  ;;  %9658 = vmatpush3.bf16.msra.mxu1 %v10934_v16 }
 0xd4e   : > { %8110 = vmatmul.mubr.bf16.vlgmr.msra.gmra.mrb[192].mxu0 %v7480_v20  ;;  %8150 = vmatmul.mubr.bf16.vlgmr.msra.gmra.mrb[128].mxu1 %v7482_v29 }
 0xe01   : > { %v9593_v22 = vpop.f32.mrb[188].mxu0  ;;  %v9615_v24 = vpop.f32.mrb[124].mxu1 }
 0xe02   : > { %v9594_v27 = vpop.f32.mrb[189].mxu0  ;;  %v9616_v28 = vpop.f32.mrb[125].mxu1 }
 0xe03   : > { %v9595_v4 = vadd.f32 %v9594_v27, %v9593_v22  ;;  %v9617_v32 = vadd.f32 %v9616_v28, %v9615_v24  ;;  %v9596_v37 = vpop.f32.mrb[190].mxu0  ;;  %v9618_v23 = vpop.f32.mrb[126].mxu1 }
 0xe04   : > { %v9597_v31 = vpop.f32.mrb[191].mxu0  ;;  %v9619_v36 = vpop.f32.mrb[127].mxu1 }
 0xe05   : > { %v8032_v38 = vadd.f32 %v9595_v4, %v7612_v26 }
 0xe07   : > { %v8072_v39 = vadd.f32 %v9617_v32, %v8032_v38 }
 0xe21   : > { %v9637_v43 = vpop.f32.mrb[192].mxu0  ;;  %v9659_v34 = vpop.f32.mrb[128].mxu1 }
 0xe22   : > { %v9638_v44 = vpop.f32.mrb[193].mxu0  ;;  %v9660_v41 = vpop.f32.mrb[129].mxu1 }
 0xe23   : > { %v9639_v33 = vadd.f32 %v9638_v44, %v9637_v43  ;;  %v9661_v45 = vadd.f32 %v9660_v41, %v9659_v34  ;;  %v9640_v30 = vpop.f32.mrb[194].mxu0  ;;  %v9662_v46 = vpop.f32.mrb[130].mxu1 }
 0xe24   : > { %v9641_v42 = vpop.f32.mrb[195].mxu0  ;;  %v9663_v35 = vpop.f32.mrb[131].mxu1 }
 0xe25   : > { %v8112_v51 = vadd.f32 %v9639_v33, %v8072_v39 }
 0xe27   : > { %v8152_v49 = vadd.f32 %v9661_v45, %v8112_v51 }
 0xe29   : > { %8157 = vst [vmem:[%s517_s23] sm:$0x1] %v8152_v49 }
 0xe2a PF: > { %s26_s21 = sadd.s32 1, %s10941_s21  }
 0xe2b   : > { %p23_p4 = scmp.ge.s32.totalorder %s26_s21, 4  }
 0xe2d   :  { %25 = sbr.rel (!%p23_p4) target bundleno = 2 (0x2), region = 158 }

</bundles_post_ra>
